<compile_context>
chip_gen: v7x
topology: tpu7x:2x2x1
jax: 0.10.0
libtpu: 0.0.40
codegen_flags: <defaults>
</compile_context>

<pallas_src>
import jax
import jax.numpy as jnp
from jax import lax
from jax.experimental import pallas as pl
from jax.experimental.pallas import tpu as pltpu

INPUT = 128
HIDDEN = 256
OUT = 40 * 3          # 120
OUT_PAD = 128         # lane-dense padded output width
EPS = 1e-5
NEG_SLOPE = 0.01      # torch.nn.LeakyReLU default


def _leaky_relu(x):
    return jnp.where(x > 0, x, NEG_SLOPE * x)


def _batchnorm_train(x, gamma, beta):
    # BatchNorm1d in training mode: biased variance over the batch axis.
    # (running_mean / running_var momentum updates are not modeled.)
    mean = jnp.mean(x, axis=0, keepdims=True)
    xc = x - mean
    var = jnp.mean(xc * xc, axis=0, keepdims=True)
    return gamma * (xc * lax.rsqrt(var + EPS)) + beta


def lstm_decoder_kernel(
    x_ref,        # (S*B, 128)  f32  flattened input
    wih_ref,      # (128, 1024) bf16 weight_ih_l0.T, gate cols permuted (i,f,o,g)
    whh_ref,      # (256, 1024) bf16 weight_hh_l0.T, gate cols permuted (i,f,o,g)
    b_ref,        # (1, 1024)   f32  bias_ih + bias_hh, permuted (i,f,o,g)
    w1_ref,       # (256, 256)  bf16 fc1.weight.T
    g1_ref, bt1_ref,   # (1, 256) f32 bn1 gamma / beta
    w2_ref,       # (256, 128)  bf16 fc2.weight.T
    g2_ref, bt2_ref,   # (1, 128) f32 bn2 gamma / beta
    wout_ref,     # (128, 128)  bf16 fc_out.weight.T zero-padded to 128 cols
    bout_ref,     # (1, 128)    f32  fc_out.bias zero-padded
    out_ref,      # (B, 128)    f32  padded output (real cols: [:, :120])
    xw_ref,       # (S*B, 1024) f32  VMEM scratch: hoisted input-side gate pre-acts
):
    SB = x_ref.shape[0]
    B = out_ref.shape[0]
    S = SB // B
    bf = jnp.bfloat16

    whh = whh_ref[...]            # bf16, stays in VMEM
    bias = b_ref[...]

    # Input-side matmul hoisted out of the recurrence: one M = S*B matmul that
    # fills MXU rows; result parked in explicit VMEM scratch (not a live SSA
    # value across the unrolled loop).
    xw_ref[...] = jnp.dot(x_ref[...].astype(bf), wih_ref[...],
                          preferred_element_type=jnp.float32) + bias   # (S*B, 1024)

    h = jnp.zeros((B, HIDDEN), jnp.float32)
    c = jnp.zeros((B, HIDDEN), jnp.float32)

    # Static unroll of the short recurrence -> LLO scheduler overlaps MXU
    # push/pop, EUP activations and VPU elementwise work across steps.
    # h/c and all activation math stay f32 (v5e has no bf16 VPU/EUP datapath).
    for t in range(S):
        gates = xw_ref[pl.ds(t * B, B), :] + jnp.dot(
            h.astype(bf), whh, preferred_element_type=jnp.float32)     # (B, 1024)

        # Gate columns were permuted to (i, f, o, g) so the three sigmoid gates
        # form one contiguous 768-wide slab: sigmoid(x) = 0.5*(tanh(x/2)+1) ->
        # a single EUP tanh push for i,f,o plus one tanh for g.
        sig = 0.5 * (jnp.tanh(0.5 * gates[:, 0:3 * HIDDEN]) + 1.0)
        i = sig[:, 0:HIDDEN]
        f = sig[:, HIDDEN:2 * HIDDEN]
        o = sig[:, 2 * HIDDEN:3 * HIDDEN]
        g = jnp.tanh(gates[:, 3 * HIDDEN:4 * HIDDEN])

        c = f * c + i * g
        h = o * jnp.tanh(c)

    # MLP head: fc1 -> bn1 -> leaky, fc2 -> bn2 -> leaky, fc_out (+bias).
    y = jnp.dot(h.astype(bf), w1_ref[...], preferred_element_type=jnp.float32)
    y = _leaky_relu(_batchnorm_train(y, g1_ref[...], bt1_ref[...]))

    y = jnp.dot(y.astype(bf), w2_ref[...], preferred_element_type=jnp.float32)
    y = _leaky_relu(_batchnorm_train(y, g2_ref[...], bt2_ref[...]))

    # Lane-dense (B, 128) output store; real 120 columns sliced in the wrapper.
    y = jnp.dot(y.astype(bf), wout_ref[...],
                preferred_element_type=jnp.float32) + bout_ref[...]
    out_ref[...] = y.astype(out_ref.dtype)


def prepare_params(p):
    """One-time (per-parameter-set) prep: gate permutation, bf16 weights, fc_out pad."""
    bf = jnp.bfloat16

    def perm_gates(w):
        # PyTorch gate order (i, f, g, o) -> (i, f, o, g) along the last axis.
        return jnp.concatenate(
            [w[..., 0:2 * HIDDEN], w[..., 3 * HIDDEN:4 * HIDDEN],
             w[..., 2 * HIDDEN:3 * HIDDEN]], axis=-1)

    wout_p = jnp.zeros((INPUT, OUT_PAD), jnp.float32).at[:, :OUT].set(p["wout"])
    bout_p = jnp.zeros((1, OUT_PAD), jnp.float32).at[:, :OUT].set(p["bout"])

    return {
        "wih": perm_gates(p["wih"]).astype(bf),
        "whh": perm_gates(p["whh"]).astype(bf),
        "b": perm_gates(p["b"]),                       # f32
        "w1": p["w1"].astype(bf),
        "g1": p["g1"], "bt1": p["bt1"],
        "w2": p["w2"].astype(bf),
        "g2": p["g2"], "bt2": p["bt2"],
        "wout": wout_p.astype(bf),
        "bout": bout_p,                                # f32
    }


def lstm_decoder(x, prep):
    """x: (S, B, 128) f32; prep: output of prepare_params. Returns (B, 120) f32."""
    S, B, _ = x.shape

    args = (
        x.reshape(S * B, INPUT),
        prep["wih"], prep["whh"], prep["b"],
        prep["w1"], prep["g1"], prep["bt1"],
        prep["w2"], prep["g2"], prep["bt2"],
        prep["wout"], prep["bout"],
    )
    vmem_spec = pl.BlockSpec(memory_space=pltpu.MemorySpace.VMEM)
    out = pl.pallas_call(
        lstm_decoder_kernel,
        out_shape=jax.ShapeDtypeStruct((B, OUT_PAD), jnp.float32),
        in_specs=[vmem_spec] * len(args),
        out_specs=vmem_spec,
        scratch_shapes=[pltpu.VMEM((S * B, 4 * HIDDEN), jnp.float32)],
        # Live working set ~2-3 MiB with bf16 weights; 8 MiB leaves headroom on
        # every generation without over-reserving scoped VMEM.
        compiler_params=pltpu.CompilerParams(vmem_limit_bytes=8 << 20),
    )(*args)
    return out[:, :OUT]


def lstm_decoder_ref(x, p, weight_dtype=jnp.float32):
    """Pure-JAX reference, PyTorch gate order + exp-based sigmoid.

    weight_dtype=jnp.bfloat16 gives a numerics-matched reference (catches
    gate-permutation / layout bugs independently of bf16 quantization);
    weight_dtype=jnp.float32 is the PyTorch-faithful f32 reference.
    """
    S, B, _ = x.shape
    wd = weight_dtype
    xw = jnp.dot(x.reshape(S * B, INPUT).astype(wd), p["wih"].astype(wd),
                 preferred_element_type=jnp.float32) + p["b"]
    whh = p["whh"].astype(wd)
    h = jnp.zeros((B, HIDDEN), jnp.float32)
    c = jnp.zeros((B, HIDDEN), jnp.float32)
    for t in range(S):
        gates = xw[t * B:(t + 1) * B] + jnp.dot(
            h.astype(wd), whh, preferred_element_type=jnp.float32)
        i = jax.nn.sigmoid(gates[:, 0:256])
        f = jax.nn.sigmoid(gates[:, 256:512])
        g = jnp.tanh(gates[:, 512:768])
        o = jax.nn.sigmoid(gates[:, 768:1024])
        c = f * c + i * g
        h = o * jnp.tanh(c)
    y = jnp.dot(h.astype(wd), p["w1"].astype(wd), preferred_element_type=jnp.float32)
    y = _leaky_relu(_batchnorm_train(y, p["g1"], p["bt1"]))
    y = jnp.dot(y.astype(wd), p["w2"].astype(wd), preferred_element_type=jnp.float32)
    y = _leaky_relu(_batchnorm_train(y, p["g2"], p["bt2"]))
    return jnp.dot(y.astype(wd), p["wout"].astype(wd),
                   preferred_element_type=jnp.float32) + p["bout"]


def init_params(key):
    ks = jax.random.split(key, 8)
    scale = 0.1
    return {
        # LSTM weights (stored transposed: (in, 4*hidden)), gate order i,f,g,o
        "wih": scale * jax.random.normal(ks[0], (INPUT, 4 * HIDDEN), jnp.float32),
        "whh": scale * jax.random.normal(ks[1], (HIDDEN, 4 * HIDDEN), jnp.float32),
        "b": scale * jax.random.normal(ks[2], (1, 4 * HIDDEN), jnp.float32),
        # fc1 / bn1
        "w1": scale * jax.random.normal(ks[3], (HIDDEN, HIDDEN), jnp.float32),
        "g1": jnp.ones((1, HIDDEN), jnp.float32),
        "bt1": jnp.zeros((1, HIDDEN), jnp.float32),
        # fc2 / bn2
        "w2": scale * jax.random.normal(ks[4], (HIDDEN, INPUT), jnp.float32),
        "g2": jnp.ones((1, INPUT), jnp.float32),
        "bt2": jnp.zeros((1, INPUT), jnp.float32),
        # fc_out
        "wout": scale * jax.random.normal(ks[5], (INPUT, OUT), jnp.float32),
        "bout": scale * jax.random.normal(ks[6], (1, OUT), jnp.float32),
    }


if __name__ == "__main__":
    key = jax.random.PRNGKey(0)
    kx, kp = jax.random.split(key)

    S, B = 8, 8   # seq_len=8, batch=8 (BatchNorm needs batch>1; 8 = one sublane tile)
    x = jax.random.normal(kx, (S, B, INPUT), jnp.float32)
    params = init_params(kp)
    prep = prepare_params(params)   # bf16 weights + gate permute, done once

    out = jax.block_until_ready(lstm_decoder(x, prep))
    assert out.shape == (B, OUT), out.shape

    # (a) bf16-matched reference (original gate order, exp sigmoid): tight check
    #     of the kernel implementation (permutation, slicing, head math).
    ref_bf16 = lstm_decoder_ref(x, params, weight_dtype=jnp.bfloat16)
    assert jnp.allclose(out, ref_bf16, rtol=1e-2, atol=1e-2), \
        "mismatch vs bf16-matched reference"

    # (b) pure-f32 PyTorch-faithful reference: documented looser tolerance to
    #     absorb the bf16 MXU-operand quantization of the weights.
    ref_f32 = lstm_decoder_ref(x, params, weight_dtype=jnp.float32)
    assert jnp.allclose(out, ref_f32, rtol=1e-1, atol=1e-1), \
        "mismatch vs f32 reference beyond bf16-quantization tolerance"

    print("KERNEL_OK")
</pallas_src>

<mosaic_0001>
module attributes {stable_mosaic.version = 11 : i64} {
  func.func @lstm_decoder_kernel(%arg0: memref<64x128xf32, #tpu.memory_space<vmem>>, %arg1: memref<128x1024xbf16, #tpu.memory_space<vmem>>, %arg2: memref<256x1024xbf16, #tpu.memory_space<vmem>>, %arg3: memref<1x1024xf32, #tpu.memory_space<vmem>>, %arg4: memref<256x256xbf16, #tpu.memory_space<vmem>>, %arg5: memref<1x256xf32, #tpu.memory_space<vmem>>, %arg6: memref<1x256xf32, #tpu.memory_space<vmem>>, %arg7: memref<256x128xbf16, #tpu.memory_space<vmem>>, %arg8: memref<1x128xf32, #tpu.memory_space<vmem>>, %arg9: memref<1x128xf32, #tpu.memory_space<vmem>>, %arg10: memref<128x128xbf16, #tpu.memory_space<vmem>>, %arg11: memref<1x128xf32, #tpu.memory_space<vmem>>, %arg12: memref<8x128xf32, #tpu.memory_space<vmem>>, %arg13: memref<64x1024xf32, #tpu.memory_space<vmem>>) attributes {dimension_semantics = [], scalar_prefetch = 0 : i64, scratch_operands = 1 : i64, tpu.core_type = #tpu.core_type<tc>} {
    %c0 = arith.constant 0 : index
    %c0_0 = arith.constant 0 : index
    %0 = vector.load %arg2[%c0, %c0_0] : memref<256x1024xbf16, #tpu.memory_space<vmem>>, vector<256x1024xbf16>
    %c0_1 = arith.constant 0 : index
    %c0_2 = arith.constant 0 : index
    %1 = vector.load %arg3[%c0_1, %c0_2] : memref<1x1024xf32, #tpu.memory_space<vmem>>, vector<1x1024xf32>
    %c0_3 = arith.constant 0 : index
    %c0_4 = arith.constant 0 : index
    %2 = vector.load %arg0[%c0_3, %c0_4] : memref<64x128xf32, #tpu.memory_space<vmem>>, vector<64x128xf32>
    %3 = arith.truncf %2 : vector<64x128xf32> to vector<64x128xbf16>
    %c0_5 = arith.constant 0 : index
    %c0_6 = arith.constant 0 : index
    %4 = vector.load %arg1[%c0_5, %c0_6] : memref<128x1024xbf16, #tpu.memory_space<vmem>>, vector<128x1024xbf16>
    %cst = arith.constant dense<0.000000e+00> : vector<64x1024xf32>
    %5 = tpu.matmul %3, %4, %cst {dimension_numbers = #tpu.dot_dimension_numbers<[1], [0], [0], [1], [0, 0, 1, 1], [], []>} : vector<64x128xbf16>, vector<128x1024xbf16>, vector<64x1024xf32> -> vector<64x1024xf32>
    %6 = vector.broadcast %1 : vector<1x1024xf32> to vector<64x1024xf32>
    %7 = arith.addf %5, %6 : vector<64x1024xf32>
    %c0_7 = arith.constant 0 : index
    %c0_8 = arith.constant 0 : index
    %8 = vector.load %arg13[%c0_7, %c0_8] : memref<64x1024xf32, #tpu.memory_space<vmem>>, vector<64x1024xf32>
    tpu.vector_store %arg13[%c0_7, %c0_8], %7 {strides = array<i32>} : memref<64x1024xf32, #tpu.memory_space<vmem>>, vector<64x1024xf32>,
    %cst_9 = arith.constant 0.000000e+00 : f32
    %9 = vector.broadcast %cst_9 : f32 to vector<8x256xf32>
    %cst_10 = arith.constant 0.000000e+00 : f32
    %10 = vector.broadcast %cst_10 : f32 to vector<8x256xf32>
    %c0_11 = arith.constant 0 : index
    %c0_12 = arith.constant 0 : index
    %11 = vector.load %arg13[%c0_11, %c0_12] : memref<64x1024xf32, #tpu.memory_space<vmem>>, vector<8x1024xf32>
    %12 = arith.truncf %9 : vector<8x256xf32> to vector<8x256xbf16>
    %cst_13 = arith.constant dense<0.000000e+00> : vector<8x1024xf32>
    %13 = tpu.matmul %12, %0, %cst_13 {dimension_numbers = #tpu.dot_dimension_numbers<[1], [0], [0], [1], [0, 0, 1, 1], [], []>} : vector<8x256xbf16>, vector<256x1024xbf16>, vector<8x1024xf32> -> vector<8x1024xf32>
    %14 = arith.addf %11, %13 : vector<8x1024xf32>
    %15 = vector.extract_strided_slice %14 {offsets = [0, 0], sizes = [8, 768], strides = [1, 1]} : vector<8x1024xf32> to vector<8x768xf32>
    %cst_14 = arith.constant 5.000000e-01 : f32
    %16 = vector.broadcast %cst_14 : f32 to vector<8x768xf32>
    %17 = arith.mulf %16, %15 : vector<8x768xf32>
    %18 = math.tanh %17 : vector<8x768xf32>
    %cst_15 = arith.constant 1.000000e+00 : f32
    %19 = vector.broadcast %cst_15 : f32 to vector<8x768xf32>
    %20 = arith.addf %18, %19 : vector<8x768xf32>
    %cst_16 = arith.constant 5.000000e-01 : f32
    %21 = vector.broadcast %cst_16 : f32 to vector<8x768xf32>
    %22 = arith.mulf %21, %20 : vector<8x768xf32>
    %23 = vector.extract_strided_slice %22 {offsets = [0, 0], sizes = [8, 256], strides = [1, 1]} : vector<8x768xf32> to vector<8x256xf32>
    %24 = vector.extract_strided_slice %22 {offsets = [0, 256], sizes = [8, 256], strides = [1, 1]} : vector<8x768xf32> to vector<8x256xf32>
    %25 = vector.extract_strided_slice %22 {offsets = [0, 512], sizes = [8, 256], strides = [1, 1]} : vector<8x768xf32> to vector<8x256xf32>
    %26 = vector.extract_strided_slice %14 {offsets = [0, 768], sizes = [8, 256], strides = [1, 1]} : vector<8x1024xf32> to vector<8x256xf32>
    %27 = math.tanh %26 : vector<8x256xf32>
    %28 = arith.mulf %24, %10 : vector<8x256xf32>
    %29 = arith.mulf %23, %27 : vector<8x256xf32>
    %30 = arith.addf %28, %29 : vector<8x256xf32>
    %31 = math.tanh %30 : vector<8x256xf32>
    %32 = arith.mulf %25, %31 : vector<8x256xf32>
    %c8 = arith.constant 8 : index
    %c0_17 = arith.constant 0 : index
    %33 = vector.load %arg13[%c8, %c0_17] : memref<64x1024xf32, #tpu.memory_space<vmem>>, vector<8x1024xf32>
    %34 = arith.truncf %32 : vector<8x256xf32> to vector<8x256xbf16>
    %cst_18 = arith.constant dense<0.000000e+00> : vector<8x1024xf32>
    %35 = tpu.matmul %34, %0, %cst_18 {dimension_numbers = #tpu.dot_dimension_numbers<[1], [0], [0], [1], [0, 0, 1, 1], [], []>} : vector<8x256xbf16>, vector<256x1024xbf16>, vector<8x1024xf32> -> vector<8x1024xf32>
    %36 = arith.addf %33, %35 : vector<8x1024xf32>
    %37 = vector.extract_strided_slice %36 {offsets = [0, 0], sizes = [8, 768], strides = [1, 1]} : vector<8x1024xf32> to vector<8x768xf32>
    %cst_19 = arith.constant 5.000000e-01 : f32
    %38 = vector.broadcast %cst_19 : f32 to vector<8x768xf32>
    %39 = arith.mulf %38, %37 : vector<8x768xf32>
    %40 = math.tanh %39 : vector<8x768xf32>
    %cst_20 = arith.constant 1.000000e+00 : f32
    %41 = vector.broadcast %cst_20 : f32 to vector<8x768xf32>
    %42 = arith.addf %40, %41 : vector<8x768xf32>
    %cst_21 = arith.constant 5.000000e-01 : f32
    %43 = vector.broadcast %cst_21 : f32 to vector<8x768xf32>
    %44 = arith.mulf %43, %42 : vector<8x768xf32>
    %45 = vector.extract_strided_slice %44 {offsets = [0, 0], sizes = [8, 256], strides = [1, 1]} : vector<8x768xf32> to vector<8x256xf32>
    %46 = vector.extract_strided_slice %44 {offsets = [0, 256], sizes = [8, 256], strides = [1, 1]} : vector<8x768xf32> to vector<8x256xf32>
    %47 = vector.extract_strided_slice %44 {offsets = [0, 512], sizes = [8, 256], strides = [1, 1]} : vector<8x768xf32> to vector<8x256xf32>
    %48 = vector.extract_strided_slice %36 {offsets = [0, 768], sizes = [8, 256], strides = [1, 1]} : vector<8x1024xf32> to vector<8x256xf32>
    %49 = math.tanh %48 : vector<8x256xf32>
    %50 = arith.mulf %46, %30 : vector<8x256xf32>
    %51 = arith.mulf %45, %49 : vector<8x256xf32>
    %52 = arith.addf %50, %51 : vector<8x256xf32>
    %53 = math.tanh %52 : vector<8x256xf32>
    %54 = arith.mulf %47, %53 : vector<8x256xf32>
    %c16 = arith.constant 16 : index
    %c0_22 = arith.constant 0 : index
    %55 = vector.load %arg13[%c16, %c0_22] : memref<64x1024xf32, #tpu.memory_space<vmem>>, vector<8x1024xf32>
    %56 = arith.truncf %54 : vector<8x256xf32> to vector<8x256xbf16>
    %cst_23 = arith.constant dense<0.000000e+00> : vector<8x1024xf32>
    %57 = tpu.matmul %56, %0, %cst_23 {dimension_numbers = #tpu.dot_dimension_numbers<[1], [0], [0], [1], [0, 0, 1, 1], [], []>} : vector<8x256xbf16>, vector<256x1024xbf16>, vector<8x1024xf32> -> vector<8x1024xf32>
    %58 = arith.addf %55, %57 : vector<8x1024xf32>
    %59 = vector.extract_strided_slice %58 {offsets = [0, 0], sizes = [8, 768], strides = [1, 1]} : vector<8x1024xf32> to vector<8x768xf32>
    %cst_24 = arith.constant 5.000000e-01 : f32
    %60 = vector.broadcast %cst_24 : f32 to vector<8x768xf32>
    %61 = arith.mulf %60, %59 : vector<8x768xf32>
    %62 = math.tanh %61 : vector<8x768xf32>
    %cst_25 = arith.constant 1.000000e+00 : f32
    %63 = vector.broadcast %cst_25 : f32 to vector<8x768xf32>
    %64 = arith.addf %62, %63 : vector<8x768xf32>
    %cst_26 = arith.constant 5.000000e-01 : f32
    %65 = vector.broadcast %cst_26 : f32 to vector<8x768xf32>
    %66 = arith.mulf %65, %64 : vector<8x768xf32>
    %67 = vector.extract_strided_slice %66 {offsets = [0, 0], sizes = [8, 256], strides = [1, 1]} : vector<8x768xf32> to vector<8x256xf32>
    %68 = vector.extract_strided_slice %66 {offsets = [0, 256], sizes = [8, 256], strides = [1, 1]} : vector<8x768xf32> to vector<8x256xf32>
    %69 = vector.extract_strided_slice %66 {offsets = [0, 512], sizes = [8, 256], strides = [1, 1]} : vector<8x768xf32> to vector<8x256xf32>
    %70 = vector.extract_strided_slice %58 {offsets = [0, 768], sizes = [8, 256], strides = [1, 1]} : vector<8x1024xf32> to vector<8x256xf32>
    %71 = math.tanh %70 : vector<8x256xf32>
    %72 = arith.mulf %68, %52 : vector<8x256xf32>
    %73 = arith.mulf %67, %71 : vector<8x256xf32>
    %74 = arith.addf %72, %73 : vector<8x256xf32>
    %75 = math.tanh %74 : vector<8x256xf32>
    %76 = arith.mulf %69, %75 : vector<8x256xf32>
    %c24 = arith.constant 24 : index
    %c0_27 = arith.constant 0 : index
    %77 = vector.load %arg13[%c24, %c0_27] : memref<64x1024xf32, #tpu.memory_space<vmem>>, vector<8x1024xf32>
    %78 = arith.truncf %76 : vector<8x256xf32> to vector<8x256xbf16>
    %cst_28 = arith.constant dense<0.000000e+00> : vector<8x1024xf32>
    %79 = tpu.matmul %78, %0, %cst_28 {dimension_numbers = #tpu.dot_dimension_numbers<[1], [0], [0], [1], [0, 0, 1, 1], [], []>} : vector<8x256xbf16>, vector<256x1024xbf16>, vector<8x1024xf32> -> vector<8x1024xf32>
    %80 = arith.addf %77, %79 : vector<8x1024xf32>
    %81 = vector.extract_strided_slice %80 {offsets = [0, 0], sizes = [8, 768], strides = [1, 1]} : vector<8x1024xf32> to vector<8x768xf32>
    %cst_29 = arith.constant 5.000000e-01 : f32
    %82 = vector.broadcast %cst_29 : f32 to vector<8x768xf32>
    %83 = arith.mulf %82, %81 : vector<8x768xf32>
    %84 = math.tanh %83 : vector<8x768xf32>
    %cst_30 = arith.constant 1.000000e+00 : f32
    %85 = vector.broadcast %cst_30 : f32 to vector<8x768xf32>
    %86 = arith.addf %84, %85 : vector<8x768xf32>
    %cst_31 = arith.constant 5.000000e-01 : f32
    %87 = vector.broadcast %cst_31 : f32 to vector<8x768xf32>
    %88 = arith.mulf %87, %86 : vector<8x768xf32>
    %89 = vector.extract_strided_slice %88 {offsets = [0, 0], sizes = [8, 256], strides = [1, 1]} : vector<8x768xf32> to vector<8x256xf32>
    %90 = vector.extract_strided_slice %88 {offsets = [0, 256], sizes = [8, 256], strides = [1, 1]} : vector<8x768xf32> to vector<8x256xf32>
    %91 = vector.extract_strided_slice %88 {offsets = [0, 512], sizes = [8, 256], strides = [1, 1]} : vector<8x768xf32> to vector<8x256xf32>
    %92 = vector.extract_strided_slice %80 {offsets = [0, 768], sizes = [8, 256], strides = [1, 1]} : vector<8x1024xf32> to vector<8x256xf32>
    %93 = math.tanh %92 : vector<8x256xf32>
    %94 = arith.mulf %90, %74 : vector<8x256xf32>
    %95 = arith.mulf %89, %93 : vector<8x256xf32>
    %96 = arith.addf %94, %95 : vector<8x256xf32>
    %97 = math.tanh %96 : vector<8x256xf32>
    %98 = arith.mulf %91, %97 : vector<8x256xf32>
    %c32 = arith.constant 32 : index
    %c0_32 = arith.constant 0 : index
    %99 = vector.load %arg13[%c32, %c0_32] : memref<64x1024xf32, #tpu.memory_space<vmem>>, vector<8x1024xf32>
    %100 = arith.truncf %98 : vector<8x256xf32> to vector<8x256xbf16>
    %cst_33 = arith.constant dense<0.000000e+00> : vector<8x1024xf32>
    %101 = tpu.matmul %100, %0, %cst_33 {dimension_numbers = #tpu.dot_dimension_numbers<[1], [0], [0], [1], [0, 0, 1, 1], [], []>} : vector<8x256xbf16>, vector<256x1024xbf16>, vector<8x1024xf32> -> vector<8x1024xf32>
    %102 = arith.addf %99, %101 : vector<8x1024xf32>
    %103 = vector.extract_strided_slice %102 {offsets = [0, 0], sizes = [8, 768], strides = [1, 1]} : vector<8x1024xf32> to vector<8x768xf32>
    %cst_34 = arith.constant 5.000000e-01 : f32
    %104 = vector.broadcast %cst_34 : f32 to vector<8x768xf32>
    %105 = arith.mulf %104, %103 : vector<8x768xf32>
    %106 = math.tanh %105 : vector<8x768xf32>
    %cst_35 = arith.constant 1.000000e+00 : f32
    %107 = vector.broadcast %cst_35 : f32 to vector<8x768xf32>
    %108 = arith.addf %106, %107 : vector<8x768xf32>
    %cst_36 = arith.constant 5.000000e-01 : f32
    %109 = vector.broadcast %cst_36 : f32 to vector<8x768xf32>
    %110 = arith.mulf %109, %108 : vector<8x768xf32>
    %111 = vector.extract_strided_slice %110 {offsets = [0, 0], sizes = [8, 256], strides = [1, 1]} : vector<8x768xf32> to vector<8x256xf32>
    %112 = vector.extract_strided_slice %110 {offsets = [0, 256], sizes = [8, 256], strides = [1, 1]} : vector<8x768xf32> to vector<8x256xf32>
    %113 = vector.extract_strided_slice %110 {offsets = [0, 512], sizes = [8, 256], strides = [1, 1]} : vector<8x768xf32> to vector<8x256xf32>
    %114 = vector.extract_strided_slice %102 {offsets = [0, 768], sizes = [8, 256], strides = [1, 1]} : vector<8x1024xf32> to vector<8x256xf32>
    %115 = math.tanh %114 : vector<8x256xf32>
    %116 = arith.mulf %112, %96 : vector<8x256xf32>
    %117 = arith.mulf %111, %115 : vector<8x256xf32>
    %118 = arith.addf %116, %117 : vector<8x256xf32>
    %119 = math.tanh %118 : vector<8x256xf32>
    %120 = arith.mulf %113, %119 : vector<8x256xf32>
    %c40 = arith.constant 40 : index
    %c0_37 = arith.constant 0 : index
    %121 = vector.load %arg13[%c40, %c0_37] : memref<64x1024xf32, #tpu.memory_space<vmem>>, vector<8x1024xf32>
    %122 = arith.truncf %120 : vector<8x256xf32> to vector<8x256xbf16>
    %cst_38 = arith.constant dense<0.000000e+00> : vector<8x1024xf32>
    %123 = tpu.matmul %122, %0, %cst_38 {dimension_numbers = #tpu.dot_dimension_numbers<[1], [0], [0], [1], [0, 0, 1, 1], [], []>} : vector<8x256xbf16>, vector<256x1024xbf16>, vector<8x1024xf32> -> vector<8x1024xf32>
    %124 = arith.addf %121, %123 : vector<8x1024xf32>
    %125 = vector.extract_strided_slice %124 {offsets = [0, 0], sizes = [8, 768], strides = [1, 1]} : vector<8x1024xf32> to vector<8x768xf32>
    %cst_39 = arith.constant 5.000000e-01 : f32
    %126 = vector.broadcast %cst_39 : f32 to vector<8x768xf32>
    %127 = arith.mulf %126, %125 : vector<8x768xf32>
    %128 = math.tanh %127 : vector<8x768xf32>
    %cst_40 = arith.constant 1.000000e+00 : f32
    %129 = vector.broadcast %cst_40 : f32 to vector<8x768xf32>
    %130 = arith.addf %128, %129 : vector<8x768xf32>
    %cst_41 = arith.constant 5.000000e-01 : f32
    %131 = vector.broadcast %cst_41 : f32 to vector<8x768xf32>
    %132 = arith.mulf %131, %130 : vector<8x768xf32>
    %133 = vector.extract_strided_slice %132 {offsets = [0, 0], sizes = [8, 256], strides = [1, 1]} : vector<8x768xf32> to vector<8x256xf32>
    %134 = vector.extract_strided_slice %132 {offsets = [0, 256], sizes = [8, 256], strides = [1, 1]} : vector<8x768xf32> to vector<8x256xf32>
    %135 = vector.extract_strided_slice %132 {offsets = [0, 512], sizes = [8, 256], strides = [1, 1]} : vector<8x768xf32> to vector<8x256xf32>
    %136 = vector.extract_strided_slice %124 {offsets = [0, 768], sizes = [8, 256], strides = [1, 1]} : vector<8x1024xf32> to vector<8x256xf32>
    %137 = math.tanh %136 : vector<8x256xf32>
    %138 = arith.mulf %134, %118 : vector<8x256xf32>
    %139 = arith.mulf %133, %137 : vector<8x256xf32>
    %140 = arith.addf %138, %139 : vector<8x256xf32>
    %141 = math.tanh %140 : vector<8x256xf32>
    %142 = arith.mulf %135, %141 : vector<8x256xf32>
    %c48 = arith.constant 48 : index
    %c0_42 = arith.constant 0 : index
    %143 = vector.load %arg13[%c48, %c0_42] : memref<64x1024xf32, #tpu.memory_space<vmem>>, vector<8x1024xf32>
    %144 = arith.truncf %142 : vector<8x256xf32> to vector<8x256xbf16>
    %cst_43 = arith.constant dense<0.000000e+00> : vector<8x1024xf32>
    %145 = tpu.matmul %144, %0, %cst_43 {dimension_numbers = #tpu.dot_dimension_numbers<[1], [0], [0], [1], [0, 0, 1, 1], [], []>} : vector<8x256xbf16>, vector<256x1024xbf16>, vector<8x1024xf32> -> vector<8x1024xf32>
    %146 = arith.addf %143, %145 : vector<8x1024xf32>
    %147 = vector.extract_strided_slice %146 {offsets = [0, 0], sizes = [8, 768], strides = [1, 1]} : vector<8x1024xf32> to vector<8x768xf32>
    %cst_44 = arith.constant 5.000000e-01 : f32
    %148 = vector.broadcast %cst_44 : f32 to vector<8x768xf32>
    %149 = arith.mulf %148, %147 : vector<8x768xf32>
    %150 = math.tanh %149 : vector<8x768xf32>
    %cst_45 = arith.constant 1.000000e+00 : f32
    %151 = vector.broadcast %cst_45 : f32 to vector<8x768xf32>
    %152 = arith.addf %150, %151 : vector<8x768xf32>
    %cst_46 = arith.constant 5.000000e-01 : f32
    %153 = vector.broadcast %cst_46 : f32 to vector<8x768xf32>
    %154 = arith.mulf %153, %152 : vector<8x768xf32>
    %155 = vector.extract_strided_slice %154 {offsets = [0, 0], sizes = [8, 256], strides = [1, 1]} : vector<8x768xf32> to vector<8x256xf32>
    %156 = vector.extract_strided_slice %154 {offsets = [0, 256], sizes = [8, 256], strides = [1, 1]} : vector<8x768xf32> to vector<8x256xf32>
    %157 = vector.extract_strided_slice %154 {offsets = [0, 512], sizes = [8, 256], strides = [1, 1]} : vector<8x768xf32> to vector<8x256xf32>
    %158 = vector.extract_strided_slice %146 {offsets = [0, 768], sizes = [8, 256], strides = [1, 1]} : vector<8x1024xf32> to vector<8x256xf32>
    %159 = math.tanh %158 : vector<8x256xf32>
    %160 = arith.mulf %156, %140 : vector<8x256xf32>
    %161 = arith.mulf %155, %159 : vector<8x256xf32>
    %162 = arith.addf %160, %161 : vector<8x256xf32>
    %163 = math.tanh %162 : vector<8x256xf32>
    %164 = arith.mulf %157, %163 : vector<8x256xf32>
    %c56 = arith.constant 56 : index
    %c0_47 = arith.constant 0 : index
    %165 = vector.load %arg13[%c56, %c0_47] : memref<64x1024xf32, #tpu.memory_space<vmem>>, vector<8x1024xf32>
    %166 = arith.truncf %164 : vector<8x256xf32> to vector<8x256xbf16>
    %cst_48 = arith.constant dense<0.000000e+00> : vector<8x1024xf32>
    %167 = tpu.matmul %166, %0, %cst_48 {dimension_numbers = #tpu.dot_dimension_numbers<[1], [0], [0], [1], [0, 0, 1, 1], [], []>} : vector<8x256xbf16>, vector<256x1024xbf16>, vector<8x1024xf32> -> vector<8x1024xf32>
    %168 = arith.addf %165, %167 : vector<8x1024xf32>
    %169 = vector.extract_strided_slice %168 {offsets = [0, 0], sizes = [8, 768], strides = [1, 1]} : vector<8x1024xf32> to vector<8x768xf32>
    %cst_49 = arith.constant 5.000000e-01 : f32
    %170 = vector.broadcast %cst_49 : f32 to vector<8x768xf32>
    %171 = arith.mulf %170, %169 : vector<8x768xf32>
    %172 = math.tanh %171 : vector<8x768xf32>
    %cst_50 = arith.constant 1.000000e+00 : f32
    %173 = vector.broadcast %cst_50 : f32 to vector<8x768xf32>
    %174 = arith.addf %172, %173 : vector<8x768xf32>
    %cst_51 = arith.constant 5.000000e-01 : f32
    %175 = vector.broadcast %cst_51 : f32 to vector<8x768xf32>
    %176 = arith.mulf %175, %174 : vector<8x768xf32>
    %177 = vector.extract_strided_slice %176 {offsets = [0, 0], sizes = [8, 256], strides = [1, 1]} : vector<8x768xf32> to vector<8x256xf32>
    %178 = vector.extract_strided_slice %176 {offsets = [0, 256], sizes = [8, 256], strides = [1, 1]} : vector<8x768xf32> to vector<8x256xf32>
    %179 = vector.extract_strided_slice %176 {offsets = [0, 512], sizes = [8, 256], strides = [1, 1]} : vector<8x768xf32> to vector<8x256xf32>
    %180 = vector.extract_strided_slice %168 {offsets = [0, 768], sizes = [8, 256], strides = [1, 1]} : vector<8x1024xf32> to vector<8x256xf32>
    %181 = math.tanh %180 : vector<8x256xf32>
    %182 = arith.mulf %178, %162 : vector<8x256xf32>
    %183 = arith.mulf %177, %181 : vector<8x256xf32>
    %184 = arith.addf %182, %183 : vector<8x256xf32>
    %185 = math.tanh %184 : vector<8x256xf32>
    %186 = arith.mulf %179, %185 : vector<8x256xf32>
    %187 = arith.truncf %186 : vector<8x256xf32> to vector<8x256xbf16>
    %c0_52 = arith.constant 0 : index
    %c0_53 = arith.constant 0 : index
    %188 = vector.load %arg4[%c0_52, %c0_53] : memref<256x256xbf16, #tpu.memory_space<vmem>>, vector<256x256xbf16>
    %cst_54 = arith.constant dense<0.000000e+00> : vector<8x256xf32>
    %189 = tpu.matmul %187, %188, %cst_54 {dimension_numbers = #tpu.dot_dimension_numbers<[1], [0], [0], [1], [0, 0, 1, 1], [], []>} : vector<8x256xbf16>, vector<256x256xbf16>, vector<8x256xf32> -> vector<8x256xf32>
    %c0_55 = arith.constant 0 : index
    %c0_56 = arith.constant 0 : index
    %190 = vector.load %arg5[%c0_55, %c0_56] : memref<1x256xf32, #tpu.memory_space<vmem>>, vector<1x256xf32>
    %c0_57 = arith.constant 0 : index
    %c0_58 = arith.constant 0 : index
    %191 = vector.load %arg6[%c0_57, %c0_58] : memref<1x256xf32, #tpu.memory_space<vmem>>, vector<1x256xf32>
    %cst_59 = arith.constant dense<0.000000e+00> : vector<256xf32>
    %192 = vector.multi_reduction <add>, %189, %cst_59 [0] : vector<8x256xf32> to vector<256xf32>
    %193 = vector.shape_cast %192 : vector<256xf32> to vector<1x256xf32>
    %cst_60 = arith.constant 8.000000e+00 : f32
    %194 = vector.broadcast %cst_60 : f32 to vector<1x256xf32>
    %195 = arith.divf %193, %194 : vector<1x256xf32>
    %196 = vector.broadcast %195 : vector<1x256xf32> to vector<8x256xf32>
    %197 = arith.subf %189, %196 : vector<8x256xf32>
    %198 = arith.mulf %197, %197 : vector<8x256xf32>
    %cst_61 = arith.constant dense<0.000000e+00> : vector<256xf32>
    %199 = vector.multi_reduction <add>, %198, %cst_61 [0] : vector<8x256xf32> to vector<256xf32>
    %200 = vector.shape_cast %199 : vector<256xf32> to vector<1x256xf32>
    %cst_62 = arith.constant 8.000000e+00 : f32
    %201 = vector.broadcast %cst_62 : f32 to vector<1x256xf32>
    %202 = arith.divf %200, %201 : vector<1x256xf32>
    %cst_63 = arith.constant 9.99999974E-6 : f32
    %203 = vector.broadcast %cst_63 : f32 to vector<1x256xf32>
    %204 = arith.addf %202, %203 : vector<1x256xf32>
    %205 = math.rsqrt %204 : vector<1x256xf32>
    %206 = vector.broadcast %205 : vector<1x256xf32> to vector<8x256xf32>
    %207 = arith.mulf %197, %206 : vector<8x256xf32>
    %208 = vector.broadcast %190 : vector<1x256xf32> to vector<8x256xf32>
    %209 = arith.mulf %208, %207 : vector<8x256xf32>
    %210 = vector.broadcast %191 : vector<1x256xf32> to vector<8x256xf32>
    %211 = arith.addf %209, %210 : vector<8x256xf32>
    %cst_64 = arith.constant 0.000000e+00 : f32
    %212 = vector.broadcast %cst_64 : f32 to vector<8x256xf32>
    %213 = arith.cmpf ogt, %211, %212 : vector<8x256xf32>
    %cst_65 = arith.constant 0.00999999977 : f32
    %214 = vector.broadcast %cst_65 : f32 to vector<8x256xf32>
    %215 = arith.mulf %214, %211 : vector<8x256xf32>
    %216 = arith.select %213, %211, %215 : vector<8x256xi1>, vector<8x256xf32>
    %217 = arith.truncf %216 : vector<8x256xf32> to vector<8x256xbf16>
    %c0_66 = arith.constant 0 : index
    %c0_67 = arith.constant 0 : index
    %218 = vector.load %arg7[%c0_66, %c0_67] : memref<256x128xbf16, #tpu.memory_space<vmem>>, vector<256x128xbf16>
    %cst_68 = arith.constant dense<0.000000e+00> : vector<8x128xf32>
    %219 = tpu.matmul %217, %218, %cst_68 {dimension_numbers = #tpu.dot_dimension_numbers<[1], [0], [0], [1], [0, 0, 1, 1], [], []>} : vector<8x256xbf16>, vector<256x128xbf16>, vector<8x128xf32> -> vector<8x128xf32>
    %c0_69 = arith.constant 0 : index
    %c0_70 = arith.constant 0 : index
    %220 = vector.load %arg8[%c0_69, %c0_70] : memref<1x128xf32, #tpu.memory_space<vmem>>, vector<1x128xf32>
    %c0_71 = arith.constant 0 : index
    %c0_72 = arith.constant 0 : index
    %221 = vector.load %arg9[%c0_71, %c0_72] : memref<1x128xf32, #tpu.memory_space<vmem>>, vector<1x128xf32>
    %cst_73 = arith.constant dense<0.000000e+00> : vector<128xf32>
    %222 = vector.multi_reduction <add>, %219, %cst_73 [0] : vector<8x128xf32> to vector<128xf32>
    %223 = vector.shape_cast %222 : vector<128xf32> to vector<1x128xf32>
    %cst_74 = arith.constant 8.000000e+00 : f32
    %224 = vector.broadcast %cst_74 : f32 to vector<1x128xf32>
    %225 = arith.divf %223, %224 : vector<1x128xf32>
    %226 = vector.broadcast %225 : vector<1x128xf32> to vector<8x128xf32>
    %227 = arith.subf %219, %226 : vector<8x128xf32>
    %228 = arith.mulf %227, %227 : vector<8x128xf32>
    %cst_75 = arith.constant dense<0.000000e+00> : vector<128xf32>
    %229 = vector.multi_reduction <add>, %228, %cst_75 [0] : vector<8x128xf32> to vector<128xf32>
    %230 = vector.shape_cast %229 : vector<128xf32> to vector<1x128xf32>
    %cst_76 = arith.constant 8.000000e+00 : f32
    %231 = vector.broadcast %cst_76 : f32 to vector<1x128xf32>
    %232 = arith.divf %230, %231 : vector<1x128xf32>
    %cst_77 = arith.constant 9.99999974E-6 : f32
    %233 = vector.broadcast %cst_77 : f32 to vector<1x128xf32>
    %234 = arith.addf %232, %233 : vector<1x128xf32>
    %235 = math.rsqrt %234 : vector<1x128xf32>
    %236 = vector.broadcast %235 : vector<1x128xf32> to vector<8x128xf32>
    %237 = arith.mulf %227, %236 : vector<8x128xf32>
    %238 = vector.broadcast %220 : vector<1x128xf32> to vector<8x128xf32>
    %239 = arith.mulf %238, %237 : vector<8x128xf32>
    %240 = vector.broadcast %221 : vector<1x128xf32> to vector<8x128xf32>
    %241 = arith.addf %239, %240 : vector<8x128xf32>
    %cst_78 = arith.constant 0.000000e+00 : f32
    %242 = vector.broadcast %cst_78 : f32 to vector<8x128xf32>
    %243 = arith.cmpf ogt, %241, %242 : vector<8x128xf32>
    %cst_79 = arith.constant 0.00999999977 : f32
    %244 = vector.broadcast %cst_79 : f32 to vector<8x128xf32>
    %245 = arith.mulf %244, %241 : vector<8x128xf32>
    %246 = arith.select %243, %241, %245 : vector<8x128xi1>, vector<8x128xf32>
    %247 = arith.truncf %246 : vector<8x128xf32> to vector<8x128xbf16>
    %c0_80 = arith.constant 0 : index
    %c0_81 = arith.constant 0 : index
    %248 = vector.load %arg10[%c0_80, %c0_81] : memref<128x128xbf16, #tpu.memory_space<vmem>>, vector<128x128xbf16>
    %cst_82 = arith.constant dense<0.000000e+00> : vector<8x128xf32>
    %249 = tpu.matmul %247, %248, %cst_82 {dimension_numbers = #tpu.dot_dimension_numbers<[1], [0], [0], [1], [0, 0, 1, 1], [], []>} : vector<8x128xbf16>, vector<128x128xbf16>, vector<8x128xf32> -> vector<8x128xf32>
    %c0_83 = arith.constant 0 : index
    %c0_84 = arith.constant 0 : index
    %250 = vector.load %arg11[%c0_83, %c0_84] : memref<1x128xf32, #tpu.memory_space<vmem>>, vector<1x128xf32>
    %251 = vector.broadcast %250 : vector<1x128xf32> to vector<8x128xf32>
    %252 = arith.addf %249, %251 : vector<8x128xf32>
    %c0_85 = arith.constant 0 : index
    %c0_86 = arith.constant 0 : index
    %253 = vector.load %arg12[%c0_85, %c0_86] : memref<8x128xf32, #tpu.memory_space<vmem>>, vector<8x128xf32>
    tpu.vector_store %arg12[%c0_85, %c0_86], %252 {strides = array<i32>} : memref<8x128xf32, #tpu.memory_space<vmem>>, vector<8x128xf32>,
    return
  }
}

</mosaic_0001>

<bundles_post_ra>
// kernel: tpu_custom_call.1
= control target key start
LH: loop header
LB: loop body
LE: loop exit
PB: predicated region body
PF: predicated region fallthrough
CT: control target
= control target key end

     0   :  { %17 = vsyncpa [#allocation4], 0  ;;  %s6713_s0 = inlined_call_operand.hbm [shape: f32[64,128], index: 0, kind: input, shape index: {}]   ;;  %s6714_s1 = inlined_call_operand.hbm [shape: bf16[128,1024], index: 1, kind: input, shape index: {}]   ;;  %s6715_s2 = inlined_call_operand.hbm [shape: bf16[256,1024], index: 2, kind: input, shape index: {}]   ;;  %s6716_s3 = inlined_call_operand.vmem [shape: f32[1,1024], index: 3, kind: input, shape index: {}]   ;;  %s6717_s4 = inlined_call_operand.hbm [shape: bf16[256,256], index: 4, kind: input, shape index: {}]   ;;  %s6718_s5 = inlined_call_operand.vmem [shape: f32[1,256], index: 5, kind: input, shape index: {}]   ;;  %s6719_s6 = inlined_call_operand.vmem [shape: f32[1,256], index: 6, kind: input, shape index: {}]   ;;  %s6720_s7 = inlined_call_operand.hbm [shape: bf16[256,128], index: 7, kind: input, shape index: {}]   ;;  %s6721_s8 = inlined_call_operand.vmem [shape: f32[1,128], index: 8, kind: input, shape index: {}]   ;;  %s6722_s9 = inlined_call_operand.vmem [shape: f32[1,128], index: 9, kind: input, shape index: {}]   ;;  %s6723_s10 = inlined_call_operand.hbm [shape: bf16[128,128], index: 10, kind: input, shape index: {}]   ;;  %s6724_s11 = inlined_call_operand.vmem [shape: f32[1,128], index: 11, kind: input, shape index: {}]   ;;  %s6725_s12 = inlined_call_operand.hbm [shape: f32[8,128], index: 12, kind: output, shape index: {}]  }
   0x1   :  { %18 = vsyncpa [#allocation7], 0 }
   0x2   :  { %19 = vsyncpa [#allocation10], 0 }
   0x3   :  { %20 = vsyncpa [#allocation13], 0 }
   0x4   :  { %21 = vsyncpa [#allocation5], 0  ;;  %s4796_s21 = smov [#allocation6]   ;;  %s4632_s25 = scalar_lea.hbm %s6714_s1, 8192 }
   0x5   :  { %s39_s22 = sshll.u32 %s4796_s21, 4  ;;  %p4633_p0 = scmp.ne.s32.totalorder %s6714_s1, %s4632_s25  ;;  %s40_s22 = int_to_ptr.vmem [resolvable:$true] %s39_s22 }
   0x6   :  { %p4636_p1 = scmp.lt.u32.totalorder %s4632_s25, %s6714_s1 }
   0x8   :  { %p4638_p2 = pnand %p4636_p1, %p4633_p0 }
   0xa   :  { %4641 = shalt.err (!%p4638_p2)
}
   0xb   :  { %s4642_s30 = scalar_lea.vmem %s40_s22, 8192  ;;  %p4647_p4 = scmp.lt.s32.totalorder %s40_s22, %s40_s22 }
   0xc   :  { %p4643_p3 = scmp.ne.s32.totalorder %s40_s22, %s4642_s30  ;;  %p4648_p5 = scmp.lt.s32.totalorder %s4642_s30, %s4642_s30 }
   0xe   :  { %p4649_p6 = por %p4648_p5, %p4647_p4 }
  0x10   :  { %p4650_p7 = pnand %p4649_p6, %p4643_p3 }
  0x12   :  { %4653 = shalt.err (!%p4650_p7)
}
  0x13   :  { %s4797_s13 = smov 512   ;;  %s4798_s14 = smov 32  }
  0x14   :  { %45 = dma.hbm_to_vmem [thread:$0]  %s6714_s1, 8192, %s40_s22, [#allocation7], %s4797_s13, %s4797_s13, %s4798_s14  }
  0x15   :  { %s4799_s17 = smov [#allocation9]   ;;  %s4800_s19 = smov [#allocation3]  }
  0x16   :  { %s65_s18 = sshll.u32 %s4799_s17, 4  ;;  %s27_s20 = sshll.u32 %s4800_s19, 4  ;;  %s66_s18 = int_to_ptr.vmem [resolvable:$true] %s65_s18  ;;  %s28_s20 = int_to_ptr.vmem [resolvable:$true] %s27_s20 }
  0x17   :  { %s4654_s24 = scalar_lea.hbm %s6717_s4, 4096 }
  0x18   :  { %p4655_p8 = scmp.ne.s32.totalorder %s6717_s4, %s4654_s24  ;;  %p4658_p9 = scmp.lt.u32.totalorder %s4654_s24, %s6717_s4 }
  0x1a   :  { %p4660_p10 = pnand %p4658_p9, %p4655_p8 }
  0x1c   :  { %4663 = shalt.err (!%p4660_p10)
}
  0x1d   :  { %s4664_s1 = scalar_lea.vmem %s66_s18, 4096  ;;  %p4669_p12 = scmp.lt.s32.totalorder %s66_s18, %s66_s18 }
  0x1e   :  { %p4665_p11 = scmp.ne.s32.totalorder %s66_s18, %s4664_s1  ;;  %p4670_p13 = scmp.lt.s32.totalorder %s4664_s1, %s4664_s1 }
  0x20   :  { %p4671_p0 = por %p4670_p13, %p4669_p12 }
  0x22   :  { %p4672_p1 = pnand %p4671_p0, %p4665_p11 }
  0x24   :  { %4675 = shalt.err (!%p4672_p1)
}
  0x25   :  { %s4801_s22 = smov 128   ;;  %s4802_s29 = smov 8  }
  0x26   :  { %71 = dma.hbm_to_vmem [thread:$0]  %s6717_s4, 4096, %s66_s18, [#allocation10], %s4801_s22, %s4801_s22, %s4802_s29  }
  0x27   :  { %s4676_s19 = scalar_lea.hbm %s6713_s0, 1024 }
  0x28   :  { %p4677_p2 = scmp.ne.s32.totalorder %s6713_s0, %s4676_s19  ;;  %p4680_p3 = scmp.lt.u32.totalorder %s4676_s19, %s6713_s0 }
  0x2a   :  { %p4682_p4 = pnand %p4680_p3, %p4677_p2 }
  0x2c   :  { %4685 = shalt.err (!%p4682_p4)
}
  0x2d   :  { %s4686_s26 = scalar_lea.vmem %s28_s20, 1024  ;;  %p4691_p6 = scmp.lt.s32.totalorder %s28_s20, %s28_s20 }
  0x2e   :  { %p4687_p5 = scmp.ne.s32.totalorder %s28_s20, %s4686_s26  ;;  %p4692_p7 = scmp.lt.s32.totalorder %s4686_s26, %s4686_s26 }
  0x30   :  { %p4693_p8 = por %p4692_p7, %p4691_p6 }
  0x32   :  { %p4694_p9 = pnand %p4693_p8, %p4687_p5 }
  0x34   :  { %4697 = shalt.err (!%p4694_p9)
}
  0x35   :  { %33 = dma.hbm_to_vmem [thread:$0]  %s6713_s0, 1024, %s28_s20, [#allocation4], %s4801_s22, %s4801_s22, %s4802_s29  }
  0x36   :  { %s4803_s27 = smov [#allocation8]   ;;  %s4804_s1 = smov [#allocation11]  }
  0x37   :  { %s51_s28 = sshll.u32 %s4803_s27, 4  ;;  %s81_s30 = sshll.u32 %s4804_s1, 4  ;;  %s52_s28 = int_to_ptr.vmem [resolvable:$true] %s51_s28  ;;  %s82_s30 = int_to_ptr.vmem [resolvable:$true] %s81_s30 }
  0x38   :  { %s4698_s17 = scalar_lea.hbm %s6715_s2, 16384 }
  0x39   :  { %p4699_p10 = scmp.ne.s32.totalorder %s6715_s2, %s4698_s17  ;;  %p4702_p11 = scmp.lt.u32.totalorder %s4698_s17, %s6715_s2 }
  0x3b   :  { %p4704_p12 = pnand %p4702_p11, %p4699_p10 }
  0x3d   :  { %4707 = shalt.err (!%p4704_p12)
}
  0x3e   :  { %s4708_s0 = scalar_lea.vmem %s52_s28, 16384  ;;  %p4713_p0 = scmp.lt.s32.totalorder %s52_s28, %s52_s28 }
  0x3f   :  { %p4709_p13 = scmp.ne.s32.totalorder %s52_s28, %s4708_s0  ;;  %p4714_p1 = scmp.lt.s32.totalorder %s4708_s0, %s4708_s0 }
  0x41   :  { %p4715_p2 = por %p4714_p1, %p4713_p0 }
  0x43   :  { %p4716_p3 = pnand %p4715_p2, %p4709_p13 }
  0x45   :  { %4719 = shalt.err (!%p4716_p3)
}
  0x46   :  { %57 = dma.hbm_to_vmem [thread:$0]  %s6715_s2, 16384, %s52_s28, [#allocation7], %s4797_s13, %s4797_s13, %s4798_s14  }
  0x47   :  { %s4720_s26 = scalar_lea.hbm %s6720_s7, 2048 }
  0x48   :  { %p4721_p4 = scmp.ne.s32.totalorder %s6720_s7, %s4720_s26  ;;  %p4724_p5 = scmp.lt.u32.totalorder %s4720_s26, %s6720_s7 }
  0x4a   :  { %p4726_p6 = pnand %p4724_p5, %p4721_p4 }
  0x4c   :  { %4729 = shalt.err (!%p4726_p6)
}
  0x4d   :  { %s4730_s15 = scalar_lea.vmem %s82_s30, 2048  ;;  %p4735_p8 = scmp.lt.s32.totalorder %s82_s30, %s82_s30 }
  0x4e   :  { %p4731_p7 = scmp.ne.s32.totalorder %s82_s30, %s4730_s15  ;;  %p4736_p9 = scmp.lt.s32.totalorder %s4730_s15, %s4730_s15 }
  0x50   :  { %p4737_p10 = por %p4736_p9, %p4735_p8 }
  0x52   :  { %p4738_p11 = pnand %p4737_p10, %p4731_p7 }
  0x54   :  { %4741 = shalt.err (!%p4738_p11)
}
  0x55   :  { %s4805_s2 = smov 64   ;;  %s4806_s13 = smov 4  }
  0x56   :  { %87 = dma.hbm_to_vmem [thread:$0]  %s6720_s7, 2048, %s82_s30, [#allocation10], %s4805_s2, %s4805_s2, %s4806_s13  }
  0x57   :  { %s4807_s16 = smov [#allocation12]   ;;  %s4742_s23 = scalar_lea.hbm %s6723_s10, 1024 }
  0x58   :  { %s97_s17 = sshll.u32 %s4807_s16, 4  ;;  %p4743_p12 = scmp.ne.s32.totalorder %s6723_s10, %s4742_s23  ;;  %s98_s17 = int_to_ptr.vmem [resolvable:$true] %s97_s17 }
  0x59   :  { %p4746_p13 = scmp.lt.u32.totalorder %s4742_s23, %s6723_s10 }
  0x5b   :  { %p4748_p0 = pnand %p4746_p13, %p4743_p12 }
  0x5d   :  { %4751 = shalt.err (!%p4748_p0)
}
  0x5e   :  { %s4752_s29 = scalar_lea.vmem %s98_s17, 1024  ;;  %p4757_p2 = scmp.lt.s32.totalorder %s98_s17, %s98_s17 }
  0x5f   :  { %p4753_p1 = scmp.ne.s32.totalorder %s98_s17, %s4752_s29  ;;  %p4758_p3 = scmp.lt.s32.totalorder %s4752_s29, %s4752_s29 }
  0x61   :  { %p4759_p4 = por %p4758_p3, %p4757_p2 }
  0x63   :  { %p4760_p5 = pnand %p4759_p4, %p4753_p1 }
  0x65   :  { %4763 = shalt.err (!%p4760_p5)
}
  0x66   :  { %103 = dma.hbm_to_vmem [thread:$0]  %s6723_s10, 1024, %s98_s17, [#allocation13], %s4805_s2, %s4805_s2, %s4806_s13  }
  0x67   :  { %4786 = dma.done.wait [#allocation4], 1024  }
  0x68   :  { %4787 = vsyncadd [#allocation4], 4294966272 }
  0x69   :  { %4788 = dma.done.wait [#allocation7], 24576  }
  0x6a   :  { %4789 = vsyncadd [#allocation7], 4294942720 }
  0x6b   :  { %4790 = dma.done.wait [#allocation10], 6144  }
  0x6c   :  { %4791 = vsyncadd [#allocation10], 4294961152 }
  0x6d   :  { %4792 = dma.done.wait [#allocation13], 1024  }
  0x6e   :  { %4793 = vsyncadd [#allocation13], 4294966272  ;;  %v6726_v0 = vmov 0   ;;  %v266_v1 = vld [vmem:[#allocation6] sm:$0xff]  ;;  %v267_v3 = vld [vmem:[#allocation6 + $0x8] sm:$0xff]  ;;  %vm4810_vm2 = vmmov 0  }
  0x6f   :  { %796 = vmatprep.mubr.bf16.mxu1 %v6726_v0  ;;  %723 = vmatprep.mubr.bf16.mxu0 %v6726_v0  ;;  %v270_v2 = vld [vmem:[#allocation6 + $0x20] sm:$0xff]  ;;  %v271_v5 = vld [vmem:[#allocation6 + $0x28] sm:$0xff]  ;;  %v268_v63 = vld [vmem:[#allocation6 + $0x10] sm:$0xff]  ;;  %s4811_s13 = smov [#allocation14]  }
  0x70   :  { %v4077_v4 = vcombine.high %v266_v1, %v270_v2  ;;  %v4076_v6 = vcombine.low %v266_v1, %v270_v2  ;;  %v274_v7 = vld [vmem:[#allocation6 + $0x40] sm:$0xff]  ;;  %v4079_v9 = vcombine.high %v267_v3, %v271_v5  ;;  %v4078_v10 = vcombine.low %v267_v3, %v271_v5  ;;  %v275_v12 = vld [vmem:[#allocation6 + $0x48] sm:$0xff]  ;;  %v272_v1 = vld [vmem:[#allocation6 + $0x30] sm:$0xff]  ;;  %s4064_s14 = sshll.u32 %s4811_s13, 4  ;;  %s4065_s14 = int_to_ptr.vmem [resolvable:$true] %s4064_s14 }
  0x71   :  { %v278_v8 = vld [vmem:[#allocation6 + $0x60] sm:$0xff]  ;;  %v279_v13 = vld [vmem:[#allocation6 + $0x68] sm:$0xff]  ;;  %v269_v2 = vld [vmem:[#allocation6 + $0x18] sm:$0xff]  ;;  %p4769_p7 = scmp.lt.s32.totalorder %s4065_s14, %s4065_s14 }
  0x72   :  { %v4085_v11 = vcombine.high %v274_v7, %v278_v8  ;;  %v282_v14 = vld [vmem:[#allocation6 + $0x80] sm:$0xff]  ;;  %691 = vmatprep.subr.bf16.mxu0 %v4077_v4  ;;  %v4087_v15 = vcombine.high %v275_v12, %v279_v13  ;;  %v283_v17 = vld [vmem:[#allocation6 + $0x88] sm:$0xff]  ;;  %764 = vmatprep.subr.bf16.mxu1 %v4079_v9  ;;  %v4084_v19 = vcombine.low %v274_v7, %v278_v8  ;;  %v273_v3 = vld [vmem:[#allocation6 + $0x38] sm:$0xff] }
  0x73   :  { %v286_v16 = vld [vmem:[#allocation6 + $0xa0] sm:$0xff]  ;;  %v287_v18 = vld [vmem:[#allocation6 + $0xa8] sm:$0xff]  ;;  %692 = vmatpush1.bf16.msra.mxu0 %v4076_v6  ;;  %765 = vmatpush1.bf16.msra.mxu1 %v4078_v10  ;;  %v4086_v20 = vcombine.low %v275_v12, %v279_v13  ;;  %v4081_v8 = vcombine.high %v268_v63, %v272_v1  ;;  %v4083_v9 = vcombine.high %v269_v2, %v273_v3  ;;  %v276_v10 = vld [vmem:[#allocation6 + $0x50] sm:$0xff] }
  0x74   :  { %693 = vmatprep.subr.bf16.mxu0 %v4085_v11  ;;  %v4093_v21 = vcombine.high %v282_v14, %v286_v16  ;;  %766 = vmatprep.subr.bf16.mxu1 %v4087_v15  ;;  %v4095_v22 = vcombine.high %v283_v17, %v287_v18  ;;  %v290_v23 = vld [vmem:[#allocation6 + $0xc0] sm:$0xff]  ;;  %v291_v25 = vld [vmem:[#allocation6 + $0xc8] sm:$0xff]  ;;  %v4092_v27 = vcombine.low %v282_v14, %v286_v16  ;;  %v280_v11 = vld [vmem:[#allocation6 + $0x70] sm:$0xff] }
  0x75   :  { %v294_v24 = vld [vmem:[#allocation6 + $0xe0] sm:$0xff]  ;;  %v295_v26 = vld [vmem:[#allocation6 + $0xe8] sm:$0xff]  ;;  %v4094_v28 = vcombine.low %v283_v17, %v287_v18  ;;  %v277_v13 = vld [vmem:[#allocation6 + $0x58] sm:$0xff]  ;;  %v4080_v15 = vcombine.low %v268_v63, %v272_v1  ;;  %v4082_v16 = vcombine.low %v269_v2, %v273_v3  ;;  %v4089_v17 = vcombine.high %v276_v10, %v280_v11 }
  0x76   :  { %v4101_v29 = vcombine.high %v290_v23, %v294_v24  ;;  %v4103_v30 = vcombine.high %v291_v25, %v295_v26  ;;  %v298_v31 = vld [vmem:[#allocation6 + $0x100] sm:$0xff]  ;;  %v299_v33 = vld [vmem:[#allocation6 + $0x108] sm:$0xff]  ;;  %v4100_v35 = vcombine.low %v290_v23, %v294_v24  ;;  %v4102_v36 = vcombine.low %v291_v25, %v295_v26  ;;  %v281_v14 = vld [vmem:[#allocation6 + $0x78] sm:$0xff] }
  0x77   :  { %694 = vmatpush1.bf16.msra.mxu0 %v4084_v19  ;;  %767 = vmatpush1.bf16.msra.mxu1 %v4086_v20  ;;  %v302_v32 = vld [vmem:[#allocation6 + $0x120] sm:$0xff]  ;;  %v303_v34 = vld [vmem:[#allocation6 + $0x128] sm:$0xff]  ;;  %v4091_v18 = vcombine.high %v277_v13, %v281_v14  ;;  %v284_v19 = vld [vmem:[#allocation6 + $0x90] sm:$0xff]  ;;  %v4088_v23 = vcombine.low %v276_v10, %v280_v11  ;;  %v4090_v26 = vcombine.low %v277_v13, %v281_v14 }
  0x78   :  { %695 = vmatprep.subr.bf16.mxu0 %v4093_v21  ;;  %768 = vmatprep.subr.bf16.mxu1 %v4095_v22  ;;  %v4109_v37 = vcombine.high %v298_v31, %v302_v32  ;;  %v4111_v38 = vcombine.high %v299_v33, %v303_v34  ;;  %v306_v39 = vld [vmem:[#allocation6 + $0x140] sm:$0xff]  ;;  %v307_v41 = vld [vmem:[#allocation6 + $0x148] sm:$0xff]  ;;  %v4108_v43 = vcombine.low %v298_v31, %v302_v32  ;;  %v288_v20 = vld [vmem:[#allocation6 + $0xb0] sm:$0xff] }
  0x79   :  { %v310_v40 = vld [vmem:[#allocation6 + $0x160] sm:$0xff]  ;;  %v311_v42 = vld [vmem:[#allocation6 + $0x168] sm:$0xff]  ;;  %v4110_v44 = vcombine.low %v299_v33, %v303_v34  ;;  %v285_v21 = vld [vmem:[#allocation6 + $0x98] sm:$0xff]  ;;  %v4096_v34 = vcombine.low %v284_v19, %v288_v20 }
  0x7a   :  { %v4117_v45 = vcombine.high %v306_v39, %v310_v40  ;;  %v4119_v46 = vcombine.high %v307_v41, %v311_v42  ;;  %v314_v47 = vld [vmem:[#allocation6 + $0x180] sm:$0xff]  ;;  %v315_v49 = vld [vmem:[#allocation6 + $0x188] sm:$0xff]  ;;  %v4116_v51 = vcombine.low %v306_v39, %v310_v40  ;;  %v4118_v52 = vcombine.low %v307_v41, %v311_v42  ;;  %v289_v22 = vld [vmem:[#allocation6 + $0xb8] sm:$0xff] }
  0x7b   :  { %696 = vmatpush1.bf16.msra.mxu0 %v4092_v27  ;;  %769 = vmatpush1.bf16.msra.mxu1 %v4094_v28  ;;  %v318_v48 = vld [vmem:[#allocation6 + $0x1a0] sm:$0xff]  ;;  %v319_v50 = vld [vmem:[#allocation6 + $0x1a8] sm:$0xff]  ;;  %v256_v24 = vld [vmem:[#allocation3 + $0x10] sm:$0xff]  ;;  %v4097_v27 = vcombine.high %v284_v19, %v288_v20  ;;  %v4099_v28 = vcombine.high %v285_v21, %v289_v22 }
  0x7c   :  { %697 = vmatprep.subr.bf16.mxu0 %v4101_v29  ;;  %770 = vmatprep.subr.bf16.mxu1 %v4103_v30  ;;  %v4125_v53 = vcombine.high %v314_v47, %v318_v48  ;;  %v4127_v54 = vcombine.high %v315_v49, %v319_v50  ;;  %v322_v55 = vld [vmem:[#allocation6 + $0x1c0] sm:$0xff]  ;;  %v323_v57 = vld [vmem:[#allocation6 + $0x1c8] sm:$0xff]  ;;  %v4124_v59 = vcombine.low %v314_v47, %v318_v48  ;;  %v257_v25 = vld [vmem:[#allocation3 + $0x18] sm:$0xff] }
  0x7d   :  { %v326_v56 = vld [vmem:[#allocation6 + $0x1e0] sm:$0xff]  ;;  %v327_v58 = vld [vmem:[#allocation6 + $0x1e8] sm:$0xff]  ;;  %v4126_v60 = vcombine.low %v315_v49, %v319_v50  ;;  %v292_v29 = vld [vmem:[#allocation6 + $0xd0] sm:$0xff]  ;;  %v4963_v31 = vpack.c.bf16 %v257_v25, %v256_v24 }
  0x7e   :  { %v4133_v61 = vcombine.high %v322_v55, %v326_v56  ;;  %v4135_v62 = vcombine.high %v323_v57, %v327_v58  ;;  %v4132_v4 = vcombine.low %v322_v55, %v326_v56  ;;  %v254_v5 = vld [vmem:[#allocation3] sm:$0xff]  ;;  %v255_v6 = vld [vmem:[#allocation3 + $0x8] sm:$0xff]  ;;  %v4134_v7 = vcombine.low %v323_v57, %v327_v58  ;;  %v296_v30 = vld [vmem:[#allocation6 + $0xf0] sm:$0xff] }
  0x7f   :  { %698 = vmatpush1.bf16.msra.mxu0 %v4100_v35  ;;  %771 = vmatpush1.bf16.msra.mxu1 %v4102_v36  ;;  %v4957_v12 = vpack.c.bf16 %v255_v6, %v254_v5  ;;  %v293_v32 = vld [vmem:[#allocation6 + $0xd8] sm:$0xff]  ;;  %v4098_v35 = vcombine.low %v285_v21, %v289_v22  ;;  %v4105_v36 = vcombine.high %v292_v29, %v296_v30  ;;  %v304_v39 = vld [vmem:[#allocation6 + $0x130] sm:$0xff]  ;;  %v125_v14 = vld [vmem:[#allocation8] sm:$0xff] }
  0x80   :  { %699 = vmatprep.subr.bf16.mxu0 %v4109_v37  ;;  %772 = vmatprep.subr.bf16.mxu1 %v4111_v38  ;;  %v297_v33 = vld [vmem:[#allocation6 + $0xf8] sm:$0xff]  ;;  %v300_v38 = vld [vmem:[#allocation6 + $0x110] sm:$0xff]  ;;  %v4104_v42 = vcombine.low %v292_v29, %v296_v30  ;;  %v133_v22 = vld [vmem:[#allocation8 + $0x40] sm:$0xff] }
  0x81   :  { %v4107_v37 = vcombine.high %v293_v32, %v297_v33  ;;  %v301_v40 = vld [vmem:[#allocation6 + $0x118] sm:$0xff]  ;;  %v308_v48 = vld [vmem:[#allocation6 + $0x150] sm:$0xff]  ;;  %v134_v24 = vld [vmem:[#allocation8 + $0x48] sm:$0xff] }
  0x82   :  { %v305_v41 = vld [vmem:[#allocation6 + $0x138] sm:$0xff]  ;;  %v312_v49 = vld [vmem:[#allocation6 + $0x170] sm:$0xff]  ;;  %v138_v25 = vld [vmem:[#allocation8 + $0x68] sm:$0xff] }
  0x83   :  { %700 = vmatpush1.bf16.msra.mxu0 %v4108_v43  ;;  %773 = vmatpush1.bf16.msra.mxu1 %v4110_v44  ;;  %v258_v43 = vld [vmem:[#allocation3 + $0x20] sm:$0xff]  ;;  %v259_v44 = vld [vmem:[#allocation3 + $0x28] sm:$0xff]  ;;  %v4115_v47 = vcombine.high %v301_v40, %v305_v41  ;;  %v4121_v55 = vcombine.high %v308_v48, %v312_v49  ;;  %v316_v57 = vld [vmem:[#allocation6 + $0x190] sm:$0xff] }
  0x84   :  { %701 = vmatprep.subr.bf16.mxu0 %v4117_v45  ;;  %774 = vmatprep.subr.bf16.mxu1 %v4119_v46  ;;  %v4106_v45 = vcombine.low %v293_v32, %v297_v33  ;;  %v4113_v46 = vcombine.high %v300_v38, %v304_v39  ;;  %v4969_v50 = vpack.c.bf16 %v259_v44, %v258_v43  ;;  %v320_v58 = vld [vmem:[#allocation6 + $0x1b0] sm:$0xff]  ;;  %v261_v63 = vld [vmem:[#allocation3 + $0x38] sm:$0xff]  ;;  %v141_v29 = vld [vmem:[#allocation8 + $0x80] sm:$0xff] }
  0x85   :  { %v4129_v2 = vcombine.high %v316_v57, %v320_v58  ;;  %v328_v5 = vld [vmem:[#allocation6 + $0x1f0] sm:$0xff]  ;;  %v145_v30 = vld [vmem:[#allocation8 + $0xa0] sm:$0xff]  ;;  %v4993_v32 = vcombine.high %v134_v24, %v138_v25  ;;  %v142_v33 = vld [vmem:[#allocation8 + $0x88] sm:$0xff] }
  0x86   :  { %v157_v43 = vld [vmem:[#allocation8 + $0x100] sm:$0xff] }
  0x87   :  { %702 = vmatpush1.bf16.msra.mxu0 %v4116_v51  ;;  %775 = vmatpush1.bf16.msra.mxu1 %v4118_v52  ;;  %v309_v51 = vld [vmem:[#allocation6 + $0x158] sm:$0xff]  ;;  %7002 = vst [vmem:[#allocation25_spill] sm:$0xff] %v4993_v32  ;;  %v161_v44 = vld [vmem:[#allocation8 + $0x120] sm:$0xff] }
  0x88   :  { %703 = vmatprep.subr.bf16.mxu0 %v4125_v53  ;;  %776 = vmatprep.subr.bf16.mxu1 %v4127_v54  ;;  %v313_v52 = vld [vmem:[#allocation6 + $0x178] sm:$0xff]  ;;  %v4112_v53 = vcombine.low %v300_v38, %v304_v39  ;;  %v4114_v54 = vcombine.low %v301_v40, %v305_v41  ;;  %v5002_v38 = vcombine.low %v134_v24, %v138_v25  ;;  %v150_v40 = vld [vmem:[#allocation8 + $0xc8] sm:$0xff] }
  0x89   :  { %v4123_v56 = vcombine.high %v309_v51, %v313_v52  ;;  %v4122_v1 = vcombine.low %v309_v51, %v313_v52  ;;  %v5004_v39 = vcombine.high %v141_v29, %v145_v30  ;;  %v154_v41 = vld [vmem:[#allocation8 + $0xe8] sm:$0xff]  ;;  %v165_v52 = vld [vmem:[#allocation8 + $0x140] sm:$0xff] }
  0x8a   :  { %7004 = vst [vmem:[#allocation27_spill] sm:$0xff] %v5002_v38 }
  0x8b   :  { %704 = vmatpush1.bf16.msra.mxu0 %v4124_v59  ;;  %777 = vmatpush1.bf16.msra.mxu1 %v4126_v60  ;;  %v317_v59 = vld [vmem:[#allocation6 + $0x198] sm:$0xff]  ;;  %7005 = vst [vmem:[#allocation28_spill] sm:$0xff] %v5004_v39 }
  0x8c   :  { %705 = vmatprep.subr.bf16.mxu0 %v4133_v61  ;;  %778 = vmatprep.subr.bf16.mxu1 %v4135_v62  ;;  %v321_v60 = vld [vmem:[#allocation6 + $0x1b8] sm:$0xff]  ;;  %v4120_v61 = vcombine.low %v308_v48, %v312_v49  ;;  %v260_v62 = vld [vmem:[#allocation3 + $0x30] sm:$0xff]  ;;  %v162_v48 = vld [vmem:[#allocation8 + $0x128] sm:$0xff]  ;;  %v5021_v49 = vcombine.high %v150_v40, %v154_v41 }
  0x8d   :  { %v4131_v3 = vcombine.high %v317_v59, %v321_v60  ;;  %v4975_v6 = vpack.c.bf16 %v261_v63, %v260_v62  ;;  %v4130_v10 = vcombine.low %v317_v59, %v321_v60  ;;  %v173_v59 = vld [vmem:[#allocation8 + $0x180] sm:$0xff]  ;;  %v174_v63 = vld [vmem:[#allocation8 + $0x188] sm:$0xff] }
  0x8e   :  { %7010 = vst [vmem:[#allocation33_spill] sm:$0xff] %v5021_v49  ;;  %v177_v60 = vld [vmem:[#allocation8 + $0x1a0] sm:$0xff] }
  0x8f   :  { %706 = vmatpush1.bf16.msra.mxu0 %v4132_v4  ;;  %779 = vmatpush1.bf16.msra.mxu1 %v4134_v7  ;;  %v324_v4 = vld [vmem:[#allocation6 + $0x1d0] sm:$0xff]  ;;  %v325_v7 = vld [vmem:[#allocation6 + $0x1d8] sm:$0xff] }
  0x90   :  { %837 = vmatprep.subr.bf16.mxu0 %v4081_v8  ;;  %910 = vmatprep.subr.bf16.mxu1 %v4083_v9  ;;  %v329_v8 = vld [vmem:[#allocation6 + $0x1f8] sm:$0xff]  ;;  %v4128_v9 = vcombine.low %v316_v57, %v320_v58  ;;  %v4137_v11 = vcombine.high %v324_v4, %v328_v5  ;;  %v170_v57 = vld [vmem:[#allocation8 + $0x168] sm:$0xff] }
  0x91   :  { %v4139_v13 = vcombine.high %v325_v7, %v329_v8  ;;  %v4138_v19 = vcombine.low %v325_v7, %v329_v8  ;;  %v5060_v8 = vcombine.high %v173_v59, %v177_v60 }
  0x92   :  { %724 = vmatmul.mubr.bf16.vlgmr.msra.gmra.mrb[0].mxu0 %v4957_v12  ;;  %797 = vmatmul.mubr.bf16.vlgmr.msra.gmra.mrb[0].mxu1 %v4957_v12 }
  0x93   :  { %838 = vmatpush1.bf16.msra.mxu0 %v4080_v15  ;;  %911 = vmatpush1.bf16.msra.mxu1 %v4082_v16  ;;  %v129_v15 = vld [vmem:[#allocation8 + $0x20] sm:$0xff]  ;;  %v126_v16 = vld [vmem:[#allocation8 + $0x8] sm:$0xff]  ;;  %7021 = vst [vmem:[#allocation44_spill] sm:$0xff] %v5060_v8 }
  0x94   :  { %839 = vmatprep.subr.bf16.mxu0 %v4089_v17  ;;  %912 = vmatprep.subr.bf16.mxu1 %v4091_v18  ;;  %v130_v17 = vld [vmem:[#allocation8 + $0x28] sm:$0xff]  ;;  %v4136_v18 = vcombine.low %v324_v4, %v328_v5  ;;  %v4979_v20 = vcombine.high %v125_v14, %v129_v15  ;;  %v181_v4 = vld [vmem:[#allocation8 + $0x1c0] sm:$0xff] }
  0x95   :  { %806 = vmatprep.mubr.bf16.mxu1 %v6726_v0  ;;  %733 = vmatprep.mubr.bf16.mxu0 %v6726_v0  ;;  %v4982_v21 = vcombine.high %v126_v16, %v130_v17  ;;  %v185_v5 = vld [vmem:[#allocation8 + $0x1e0] sm:$0xff] }
  0x96   :  { %6997 = vst [vmem:[#allocation20_spill] sm:$0xff] %v4979_v20 }
  0x97   :  { %840 = vmatpush1.bf16.msra.mxu0 %v4088_v23  ;;  %913 = vmatpush1.bf16.msra.mxu1 %v4090_v26  ;;  %6998 = vst [vmem:[#allocation21_spill] sm:$0xff] %v4982_v21  ;;  %v137_v23 = vld [vmem:[#allocation8 + $0x60] sm:$0xff]  ;;  %v4985_v26 = vcombine.low %v125_v14, %v129_v15 }
  0x98   :  { %841 = vmatprep.subr.bf16.mxu0 %v4097_v27  ;;  %914 = vmatprep.subr.bf16.mxu1 %v4099_v28  ;;  %v4988_v27 = vcombine.low %v126_v16, %v130_v17  ;;  %v4990_v28 = vcombine.high %v133_v22, %v137_v23  ;;  %v193_v14 = vld [vmem:[#allocation8 + $0x220] sm:$0xff]  ;;  %v5074_v16 = vcombine.high %v181_v4, %v185_v5  ;;  %v190_v17 = vld [vmem:[#allocation8 + $0x208] sm:$0xff] }
  0x99   :  { %6999 = vst [vmem:[#allocation22_spill] sm:$0xff] %v4985_v26 }
  0x9a   :  { %734 = vmatmul.mubr.bf16.gmra.mrb[4].mxu0 %v4963_v31  ;;  %807 = vmatmul.mubr.bf16.gmra.mrb[4].mxu1 %v4963_v31  ;;  %7000 = vst [vmem:[#allocation23_spill] sm:$0xff] %v4988_v27  ;;  %7001 = vst [vmem:[#allocation24_spill] sm:$0xff] %v4990_v28 }
  0x9b   :  { %842 = vmatpush1.bf16.msra.mxu0 %v4096_v34  ;;  %915 = vmatpush1.bf16.msra.mxu1 %v4098_v35  ;;  %v146_v34 = vld [vmem:[#allocation8 + $0xa8] sm:$0xff]  ;;  %v4998_v35 = vcombine.low %v133_v22, %v137_v23  ;;  %7025 = vst [vmem:[#allocation48_spill] sm:$0xff] %v5074_v16  ;;  %v5081_v22 = vcombine.low %v181_v4, %v185_v5 }
  0x9c   :  { %843 = vmatprep.subr.bf16.mxu0 %v4105_v36  ;;  %916 = vmatprep.subr.bf16.mxu1 %v4107_v37  ;;  %v149_v36 = vld [vmem:[#allocation8 + $0xc0] sm:$0xff] }
  0x9d   :  { %816 = vmatprep.mubr.bf16.mxu1 %v6726_v0  ;;  %743 = vmatprep.mubr.bf16.mxu0 %v6726_v0  ;;  %7003 = vst [vmem:[#allocation26_spill] sm:$0xff] %v4998_v35  ;;  %v153_v37 = vld [vmem:[#allocation8 + $0xe0] sm:$0xff]  ;;  %7027 = vst [vmem:[#allocation50_spill] sm:$0xff] %v5081_v22 }
  0x9e   :  { %v5025_v51 = vcombine.low %v149_v36, %v153_v37 }
  0x9f   :  { %844 = vmatpush1.bf16.msra.mxu0 %v4104_v42  ;;  %917 = vmatpush1.bf16.msra.mxu1 %v4106_v45  ;;  %v5007_v42 = vcombine.high %v142_v33, %v146_v34  ;;  %v5016_v45 = vcombine.low %v142_v33, %v146_v34  ;;  %v198_v33 = vld [vmem:[#allocation8 + $0x248] sm:$0xff] }
  0xa0   :  { %845 = vmatprep.subr.bf16.mxu0 %v4113_v46  ;;  %918 = vmatprep.subr.bf16.mxu1 %v4115_v47  ;;  %v5018_v46 = vcombine.high %v149_v36, %v153_v37  ;;  %v158_v47 = vld [vmem:[#allocation8 + $0x108] sm:$0xff]  ;;  %7011 = vst [vmem:[#allocation34_spill] sm:$0xff] %v5025_v51 }
  0xa1   :  { %7006 = vst [vmem:[#allocation29_spill] sm:$0xff] %v5007_v42  ;;  %7008 = vst [vmem:[#allocation31_spill] sm:$0xff] %v5016_v45  ;;  %v5035_v58 = vcombine.high %v158_v47, %v162_v48  ;;  %v202_v34 = vld [vmem:[#allocation8 + $0x268] sm:$0xff] }
  0xa2   :  { %744 = vmatmul.mubr.bf16.gmra.mrb[8].mxu0 %v4969_v50  ;;  %817 = vmatmul.mubr.bf16.gmra.mrb[8].mxu1 %v4969_v50  ;;  %7009 = vst [vmem:[#allocation32_spill] sm:$0xff] %v5018_v46 }
  0xa3   :  { %846 = vmatpush1.bf16.msra.mxu0 %v4112_v53  ;;  %919 = vmatpush1.bf16.msra.mxu1 %v4114_v54  ;;  %v169_v53 = vld [vmem:[#allocation8 + $0x160] sm:$0xff]  ;;  %v5030_v54 = vcombine.low %v150_v40, %v154_v41  ;;  %7014 = vst [vmem:[#allocation37_spill] sm:$0xff] %v5035_v58  ;;  %v5105_v40 = vcombine.high %v198_v33, %v202_v34 }
  0xa4   :  { %847 = vmatprep.subr.bf16.mxu0 %v4121_v55  ;;  %920 = vmatprep.subr.bf16.mxu1 %v4123_v56  ;;  %v5032_v55 = vcombine.high %v157_v43, %v161_v44  ;;  %v166_v56 = vld [vmem:[#allocation8 + $0x148] sm:$0xff]  ;;  %v5046_v62 = vcombine.high %v165_v52, %v169_v53  ;;  %v205_v41 = vld [vmem:[#allocation8 + $0x280] sm:$0xff] }
  0xa5   :  { %826 = vmatprep.mubr.bf16.mxu1 %v6726_v0  ;;  %753 = vmatprep.mubr.bf16.mxu0 %v6726_v0  ;;  %7012 = vst [vmem:[#allocation35_spill] sm:$0xff] %v5030_v54  ;;  %v5058_v7 = vcombine.low %v166_v56, %v170_v57  ;;  %7034 = vst [vmem:[#allocation57_spill] sm:$0xff] %v5105_v40 }
  0xa6   :  { %7013 = vst [vmem:[#allocation36_spill] sm:$0xff] %v5032_v55  ;;  %7017 = vst [vmem:[#allocation40_spill] sm:$0xff] %v5046_v62 }
  0xa7   :  { %848 = vmatpush1.bf16.msra.mxu0 %v4120_v61  ;;  %921 = vmatpush1.bf16.msra.mxu1 %v4122_v1  ;;  %v5044_v61 = vcombine.low %v158_v47, %v162_v48  ;;  %v178_v1 = vld [vmem:[#allocation8 + $0x1a8] sm:$0xff]  ;;  %7020 = vst [vmem:[#allocation43_spill] sm:$0xff] %v5058_v7 }
  0xa8   :  { %849 = vmatprep.subr.bf16.mxu0 %v4129_v2  ;;  %922 = vmatprep.subr.bf16.mxu1 %v4131_v3  ;;  %v5049_v2 = vcombine.high %v166_v56, %v170_v57  ;;  %v5053_v3 = vcombine.low %v165_v52, %v169_v53  ;;  %v5072_v15 = vcombine.low %v174_v63, %v178_v1  ;;  %v210_v47 = vld [vmem:[#allocation8 + $0x2a8] sm:$0xff]  ;;  %v213_v57 = vld [vmem:[#allocation8 + $0x2c0] sm:$0xff] }
  0xa9   :  { %7016 = vst [vmem:[#allocation39_spill] sm:$0xff] %v5044_v61  ;;  %v5112_v52 = vcombine.low %v198_v33, %v202_v34  ;;  %v229_v34 = vld [vmem:[#allocation8 + $0x340] sm:$0xff] }
  0xaa   :  { %754 = vmatmul.mubr.bf16.gmra.mrb[12].mxu0 %v4975_v6  ;;  %827 = vmatmul.mubr.bf16.gmra.mrb[12].mxu1 %v4975_v6  ;;  %7018 = vst [vmem:[#allocation41_spill] sm:$0xff] %v5049_v2  ;;  %7019 = vst [vmem:[#allocation42_spill] sm:$0xff] %v5053_v3 }
  0xab   :  { %850 = vmatpush1.bf16.msra.mxu0 %v4128_v9  ;;  %923 = vmatpush1.bf16.msra.mxu1 %v4130_v10  ;;  %v182_v9 = vld [vmem:[#allocation8 + $0x1c8] sm:$0xff]  ;;  %7024 = vst [vmem:[#allocation47_spill] sm:$0xff] %v5072_v15  ;;  %7036 = vst [vmem:[#allocation59_spill] sm:$0xff] %v5112_v52 }
  0xac   :  { %851 = vmatprep.subr.bf16.mxu0 %v4137_v11  ;;  %924 = vmatprep.subr.bf16.mxu1 %v4139_v13  ;;  %v186_v10 = vld [vmem:[#allocation8 + $0x1e8] sm:$0xff]  ;;  %v5063_v11 = vcombine.high %v174_v63, %v178_v1  ;;  %v189_v13 = vld [vmem:[#allocation8 + $0x200] sm:$0xff] }
  0xad   :  { %942 = vmatprep.mubr.bf16.mxu1 %v6726_v0  ;;  %869 = vmatprep.mubr.bf16.mxu0 %v6726_v0  ;;  %v5086_v23 = vcombine.low %v182_v9, %v186_v10  ;;  %v5088_v24 = vcombine.high %v189_v13, %v193_v14  ;;  %v218_v63 = vld [vmem:[#allocation8 + $0x2e8] sm:$0xff] }
  0xae   :  { %7022 = vst [vmem:[#allocation45_spill] sm:$0xff] %v5063_v11 }
  0xaf   :  { %852 = vmatpush1.bf16.msra.mxu0 %v4136_v18  ;;  %925 = vmatpush1.bf16.msra.mxu1 %v4138_v19  ;;  %v194_v18 = vld [vmem:[#allocation8 + $0x228] sm:$0xff]  ;;  %v5077_v19 = vcombine.high %v182_v9, %v186_v10  ;;  %7028 = vst [vmem:[#allocation51_spill] sm:$0xff] %v5086_v23  ;;  %7029 = vst [vmem:[#allocation52_spill] sm:$0xff] %v5088_v24  ;;  %v221_v10 = vld [vmem:[#allocation8 + $0x300] sm:$0xff] }
  0xb0   :  { %1695 = vmatprep.subr.bf16.mxu0 %v4979_v20  ;;  %1736 = vmatprep.subr.bf16.mxu1 %v4982_v21  ;;  %v5091_v25 = vcombine.high %v190_v17, %v194_v18  ;;  %v5100_v36 = vcombine.low %v190_v17, %v194_v18  ;;  %v226_v17 = vld [vmem:[#allocation8 + $0x328] sm:$0xff] }
  0xb1   :  { %7026 = vst [vmem:[#allocation49_spill] sm:$0xff] %v5077_v19 }
  0xb2   :  { %870 = vmatmul.mubr.bf16.vlgmr.msra.gmra.mrb[16].mxu0 %v4957_v12  ;;  %943 = vmatmul.mubr.bf16.vlgmr.msra.gmra.mrb[16].mxu1 %v4957_v12  ;;  %v5012_v12 = vcombine.low %v141_v29, %v145_v30  ;;  %7030 = vst [vmem:[#allocation53_spill] sm:$0xff] %v5091_v25  ;;  %v197_v29 = vld [vmem:[#allocation8 + $0x240] sm:$0xff]  ;;  %7032 = vst [vmem:[#allocation55_spill] sm:$0xff] %v5100_v36 }
  0xb3   :  { %1696 = vmatpush1.bf16.msra.mxu0 %v4985_v26  ;;  %1737 = vmatpush1.bf16.msra.mxu1 %v4988_v27  ;;  %v201_v30 = vld [vmem:[#allocation8 + $0x260] sm:$0xff] }
  0xb4   :  { %1697 = vmatprep.subr.bf16.mxu0 %v4990_v28  ;;  %1738 = vmatprep.subr.bf16.mxu1 %v4993_v32  ;;  %7007 = vst [vmem:[#allocation30_spill] sm:$0xff] %v5012_v12  ;;  %v5102_v37 = vcombine.high %v197_v29, %v201_v30  ;;  %v5108_v48 = vcombine.low %v197_v29, %v201_v30 }
  0xb5   :  { %952 = vmatprep.mubr.bf16.mxu1 %v6726_v0  ;;  %879 = vmatprep.mubr.bf16.mxu0 %v6726_v0 }
  0xb6   :  { %7033 = vst [vmem:[#allocation56_spill] sm:$0xff] %v5102_v37  ;;  %7035 = vst [vmem:[#allocation58_spill] sm:$0xff] %v5108_v48 }
  0xb7   :  { %1698 = vmatpush1.bf16.msra.mxu0 %v4998_v35  ;;  %1739 = vmatpush1.bf16.msra.mxu1 %v5002_v38 }
  0xb8   :  { %1699 = vmatprep.subr.bf16.mxu0 %v5004_v39  ;;  %1740 = vmatprep.subr.bf16.mxu1 %v5007_v42 }
  0xba   :  { %880 = vmatmul.mubr.bf16.gmra.mrb[20].mxu0 %v4963_v31  ;;  %953 = vmatmul.mubr.bf16.gmra.mrb[20].mxu1 %v4963_v31  ;;  %v5040_v31 = vcombine.low %v157_v43, %v161_v44  ;;  %v209_v43 = vld [vmem:[#allocation8 + $0x2a0] sm:$0xff]  ;;  %v206_v44 = vld [vmem:[#allocation8 + $0x288] sm:$0xff] }
  0xbb   :  { %1700 = vmatpush1.bf16.msra.mxu0 %v5012_v12  ;;  %1741 = vmatpush1.bf16.msra.mxu1 %v5016_v45  ;;  %v5114_v53 = vcombine.high %v205_v41, %v209_v43  ;;  %v5117_v56 = vcombine.high %v206_v44, %v210_v47  ;;  %v5120_v1 = vcombine.low %v205_v41, %v209_v43  ;;  %v233_v41 = vld [vmem:[#allocation8 + $0x360] sm:$0xff]  ;;  %v230_v43 = vld [vmem:[#allocation8 + $0x348] sm:$0xff] }
  0xbc   :  { %1701 = vmatprep.subr.bf16.mxu0 %v5018_v46  ;;  %1742 = vmatprep.subr.bf16.mxu1 %v5021_v49  ;;  %7015 = vst [vmem:[#allocation38_spill] sm:$0xff] %v5040_v31  ;;  %v5124_v4 = vcombine.low %v206_v44, %v210_v47  ;;  %v234_v44 = vld [vmem:[#allocation8 + $0x368] sm:$0xff] }
  0xbd   :  { %962 = vmatprep.mubr.bf16.mxu1 %v6726_v0  ;;  %889 = vmatprep.mubr.bf16.mxu0 %v6726_v0  ;;  %7037 = vst [vmem:[#allocation60_spill] sm:$0xff] %v5114_v53  ;;  %7038 = vst [vmem:[#allocation61_spill] sm:$0xff] %v5117_v56 }
  0xbe   :  { %7039 = vst [vmem:[#allocation62_spill] sm:$0xff] %v5120_v1  ;;  %7040 = vst [vmem:[#allocation63_spill] sm:$0xff] %v5124_v4 }
  0xbf   :  { %1702 = vmatpush1.bf16.msra.mxu0 %v5025_v51  ;;  %1743 = vmatpush1.bf16.msra.mxu1 %v5030_v54 }
  0xc0   :  { %1703 = vmatprep.subr.bf16.mxu0 %v5032_v55  ;;  %1744 = vmatprep.subr.bf16.mxu1 %v5035_v58 }
  0xc2   :  { %890 = vmatmul.mubr.bf16.gmra.mrb[24].mxu0 %v4969_v50  ;;  %963 = vmatmul.mubr.bf16.gmra.mrb[24].mxu1 %v4969_v50  ;;  %v5068_v50 = vcombine.low %v173_v59, %v177_v60  ;;  %v217_v59 = vld [vmem:[#allocation8 + $0x2e0] sm:$0xff]  ;;  %v214_v60 = vld [vmem:[#allocation8 + $0x2c8] sm:$0xff] }
  0xc3   :  { %1704 = vmatpush1.bf16.msra.mxu0 %v5040_v31  ;;  %1745 = vmatpush1.bf16.msra.mxu1 %v5044_v61  ;;  %v5126_v5 = vcombine.high %v213_v57, %v217_v59  ;;  %v5129_v9 = vcombine.high %v214_v60, %v218_v63  ;;  %v5132_v18 = vcombine.low %v213_v57, %v217_v59 }
  0xc4   :  { %1705 = vmatprep.subr.bf16.mxu0 %v5046_v62  ;;  %1746 = vmatprep.subr.bf16.mxu1 %v5049_v2  ;;  %7023 = vst [vmem:[#allocation46_spill] sm:$0xff] %v5068_v50  ;;  %v5136_v29 = vcombine.low %v214_v60, %v218_v63  ;;  %v5150_v59 = vcombine.high %v229_v34, %v233_v41  ;;  %v237_v63 = vld [vmem:[#allocation8 + $0x380] sm:$0xff] }
  0xc5   :  { %972 = vmatprep.mubr.bf16.mxu1 %v6726_v0  ;;  %899 = vmatprep.mubr.bf16.mxu0 %v6726_v0  ;;  %7041 = vst [vmem:[#allocation64_spill] sm:$0xff] %v5126_v5  ;;  %7042 = vst [vmem:[#allocation65_spill] sm:$0xff] %v5129_v9  ;;  %v5153_v60 = vcombine.high %v230_v43, %v234_v44 }
  0xc6   :  { %7043 = vst [vmem:[#allocation66_spill] sm:$0xff] %v5132_v18  ;;  %7044 = vst [vmem:[#allocation67_spill] sm:$0xff] %v5136_v29 }
  0xc7   :  { %1706 = vmatpush1.bf16.msra.mxu0 %v5053_v3  ;;  %1747 = vmatpush1.bf16.msra.mxu1 %v5058_v7  ;;  %7049 = vst [vmem:[#allocation72_spill] sm:$0xff] %v5150_v59  ;;  %7050 = vst [vmem:[#allocation73_spill] sm:$0xff] %v5153_v60 }
  0xc8   :  { %1707 = vmatprep.subr.bf16.mxu0 %v5060_v8  ;;  %1748 = vmatprep.subr.bf16.mxu1 %v5063_v11 }
  0xca   :  { %900 = vmatmul.mubr.bf16.gmra.mrb[28].mxu0 %v4975_v6  ;;  %973 = vmatmul.mubr.bf16.gmra.mrb[28].mxu1 %v4975_v6  ;;  %v5096_v6 = vcombine.low %v189_v13, %v193_v14  ;;  %v225_v13 = vld [vmem:[#allocation8 + $0x320] sm:$0xff]  ;;  %v222_v14 = vld [vmem:[#allocation8 + $0x308] sm:$0xff] }
  0xcb   :  { %1708 = vmatpush1.bf16.msra.mxu0 %v5068_v50  ;;  %1749 = vmatpush1.bf16.msra.mxu1 %v5072_v15  ;;  %v5138_v30 = vcombine.high %v221_v10, %v225_v13  ;;  %v5141_v33 = vcombine.high %v222_v14, %v226_v17  ;;  %v5144_v47 = vcombine.low %v221_v10, %v225_v13 }
  0xcc   :  { %1709 = vmatprep.subr.bf16.mxu0 %v5074_v16  ;;  %1750 = vmatprep.subr.bf16.mxu1 %v5077_v19  ;;  %7031 = vst [vmem:[#allocation54_spill] sm:$0xff] %v5096_v6  ;;  %v5148_v57 = vcombine.low %v222_v14, %v226_v17  ;;  %v5156_v10 = vcombine.low %v229_v34, %v233_v41 }
  0xcd   :  { %1727 = vmatprep.mubr.bf16.mxu0 %v6726_v0  ;;  %1768 = vmatprep.mubr.bf16.mxu1 %v6726_v0  ;;  %7045 = vst [vmem:[#allocation68_spill] sm:$0xff] %v5138_v30  ;;  %7046 = vst [vmem:[#allocation69_spill] sm:$0xff] %v5141_v33  ;;  %v241_v0 = vld [vmem:[#allocation8 + $0x3a0] sm:$0xff]  ;;  %v5160_v13 = vcombine.low %v230_v43, %v234_v44 }
  0xce   :  { %7047 = vst [vmem:[#allocation70_spill] sm:$0xff] %v5144_v47  ;;  %7048 = vst [vmem:[#allocation71_spill] sm:$0xff] %v5148_v57  ;;  %v5162_v14 = vcombine.high %v237_v63, %v241_v0  ;;  %v5168_v34 = vcombine.low %v237_v63, %v241_v0 }
  0xcf   :  { %1710 = vmatpush1.bf16.msra.mxu0 %v5081_v22  ;;  %1751 = vmatpush1.bf16.msra.mxu1 %v5086_v23  ;;  %7051 = vst [vmem:[#allocation74_spill] sm:$0xff] %v5156_v10  ;;  %7052 = vst [vmem:[#allocation75_spill] sm:$0xff] %v5160_v13 }
  0xd0   :  { %1711 = vmatprep.subr.bf16.mxu0 %v5088_v24  ;;  %1752 = vmatprep.subr.bf16.mxu1 %v5091_v25  ;;  %7053 = vst [vmem:[#allocation76_spill] sm:$0xff] %v5162_v14  ;;  %7055 = vst [vmem:[#allocation78_spill] sm:$0xff] %v5168_v34 }
  0xd3   :  { %1712 = vmatpush1.bf16.msra.mxu0 %v5096_v6  ;;  %1753 = vmatpush1.bf16.msra.mxu1 %v5100_v36 }
  0xd4   :  { %1713 = vmatprep.subr.bf16.mxu0 %v5102_v37  ;;  %1754 = vmatprep.subr.bf16.mxu1 %v5105_v40 }
  0xd7   :  { %1714 = vmatpush1.bf16.msra.mxu0 %v5108_v48  ;;  %1755 = vmatpush1.bf16.msra.mxu1 %v5112_v52 }
  0xd8   :  { %1715 = vmatprep.subr.bf16.mxu0 %v5114_v53  ;;  %1756 = vmatprep.subr.bf16.mxu1 %v5117_v56 }
  0xdb   :  { %1716 = vmatpush1.bf16.msra.mxu0 %v5120_v1  ;;  %1757 = vmatpush1.bf16.msra.mxu1 %v5124_v4  ;;  %v164_v4 = vld [vmem:[#allocation8 + $0x138] sm:$0xff] }
  0xdc   :  { %1717 = vmatprep.subr.bf16.mxu0 %v5126_v5  ;;  %1758 = vmatprep.subr.bf16.mxu1 %v5129_v9  ;;  %v238_v9 = vld [vmem:[#allocation8 + $0x388] sm:$0xff] }
  0xdd   :  { %v242_v5 = vld [vmem:[#allocation8 + $0x3a8] sm:$0xff] }
  0xde   :  { %v5165_v17 = vcombine.high %v238_v9, %v242_v5  ;;  %v5172_v41 = vcombine.low %v238_v9, %v242_v5 }
  0xdf   :  { %1718 = vmatpush1.bf16.msra.mxu0 %v5132_v18  ;;  %1759 = vmatpush1.bf16.msra.mxu1 %v5136_v29  ;;  %v246_v29 = vld [vmem:[#allocation8 + $0x3c8] sm:$0xff] }
  0xe0   :  { %1719 = vmatprep.subr.bf16.mxu0 %v5138_v30  ;;  %1760 = vmatprep.subr.bf16.mxu1 %v5141_v33  ;;  %7054 = vst [vmem:[#allocation77_spill] sm:$0xff] %v5165_v17  ;;  %v245_v33 = vld [vmem:[#allocation8 + $0x3c0] sm:$0xff]  ;;  %v250_v18 = vld [vmem:[#allocation8 + $0x3e8] sm:$0xff]  ;;  %7056 = vst [vmem:[#allocation79_spill] sm:$0xff] %v5172_v41 }
  0xe1   :  { %v249_v30 = vld [vmem:[#allocation8 + $0x3e0] sm:$0xff]  ;;  %v5177_v44 = vcombine.high %v246_v29, %v250_v18  ;;  %v5184_v5 = vcombine.low %v246_v29, %v250_v18 }
  0xe2   :  { %v5174_v43 = vcombine.high %v245_v33, %v249_v30  ;;  %v5180_v0 = vcombine.low %v245_v33, %v249_v30 }
  0xe3   :  { %1720 = vmatpush1.bf16.msra.mxu0 %v5144_v47  ;;  %1761 = vmatpush1.bf16.msra.mxu1 %v5148_v57  ;;  %7058 = vst [vmem:[#allocation81_spill] sm:$0xff] %v5177_v44  ;;  %v128_v57 = vld [vmem:[#allocation8 + $0x18] sm:$0xff]  ;;  %7060 = vst [vmem:[#allocation83_spill] sm:$0xff] %v5184_v5 }
  0xe4   :  { %1721 = vmatprep.subr.bf16.mxu0 %v5150_v59  ;;  %1762 = vmatprep.subr.bf16.mxu1 %v5153_v60  ;;  %7057 = vst [vmem:[#allocation80_spill] sm:$0xff] %v5174_v43  ;;  %v127_v60 = vld [vmem:[#allocation8 + $0x10] sm:$0xff]  ;;  %v132_v47 = vld [vmem:[#allocation8 + $0x38] sm:$0xff]  ;;  %7059 = vst [vmem:[#allocation82_spill] sm:$0xff] %v5180_v0 }
  0xe5   :  { %v131_v59 = vld [vmem:[#allocation8 + $0x30] sm:$0xff]  ;;  %v5189_v63 = vcombine.high %v128_v57, %v132_v47  ;;  %v5196_v18 = vcombine.low %v128_v57, %v132_v47 }
  0xe6   :  { %v5186_v9 = vcombine.high %v127_v60, %v131_v59  ;;  %v5192_v30 = vcombine.low %v127_v60, %v131_v59 }
  0xe7   :  { %1722 = vmatpush1.bf16.msra.mxu0 %v5156_v10  ;;  %1763 = vmatpush1.bf16.msra.mxu1 %v5160_v13  ;;  %7062 = vst [vmem:[#allocation85_spill] sm:$0xff] %v5189_v63  ;;  %v136_v13 = vld [vmem:[#allocation8 + $0x58] sm:$0xff]  ;;  %7064 = vst [vmem:[#allocation87_spill] sm:$0xff] %v5196_v18 }
  0xe8   :  { %1723 = vmatprep.subr.bf16.mxu0 %v5162_v14  ;;  %1764 = vmatprep.subr.bf16.mxu1 %v5165_v17  ;;  %7061 = vst [vmem:[#allocation84_spill] sm:$0xff] %v5186_v9  ;;  %v135_v17 = vld [vmem:[#allocation8 + $0x50] sm:$0xff]  ;;  %v140_v10 = vld [vmem:[#allocation8 + $0x78] sm:$0xff]  ;;  %7063 = vst [vmem:[#allocation86_spill] sm:$0xff] %v5192_v30 }
  0xe9   :  { %v139_v14 = vld [vmem:[#allocation8 + $0x70] sm:$0xff]  ;;  %v5201_v33 = vcombine.high %v136_v13, %v140_v10  ;;  %v5210_v47 = vcombine.low %v136_v13, %v140_v10 }
  0xea   :  { %v5198_v29 = vcombine.high %v135_v17, %v139_v14  ;;  %v5206_v59 = vcombine.low %v135_v17, %v139_v14 }
  0xeb   :  { %1724 = vmatpush1.bf16.msra.mxu0 %v5168_v34  ;;  %1765 = vmatpush1.bf16.msra.mxu1 %v5172_v41  ;;  %7066 = vst [vmem:[#allocation89_spill] sm:$0xff] %v5201_v33  ;;  %v7067_v41 = vmov 0   ;;  %v144_v34 = vld [vmem:[#allocation8 + $0x98] sm:$0xff]  ;;  %7069 = vst [vmem:[#allocation91_spill] sm:$0xff] %v5210_v47 }
  0xec   :  { %1725 = vmatprep.subr.bf16.mxu0 %v5174_v43  ;;  %1766 = vmatprep.subr.bf16.mxu1 %v5177_v44  ;;  %7065 = vst [vmem:[#allocation88_spill] sm:$0xff] %v5198_v29  ;;  %v143_v44 = vld [vmem:[#allocation8 + $0x90] sm:$0xff]  ;;  %7068 = vst [vmem:[#allocation90_spill] sm:$0xff] %v5206_v59 }
  0xed   :  { %v147_v43 = vld [vmem:[#allocation8 + $0xb0] sm:$0xff] }
  0xee   :  { %v5212_v57 = vcombine.high %v143_v44, %v147_v43  ;;  %v5220_v14 = vcombine.low %v143_v44, %v147_v43 }
  0xef   :  { %1726 = vmatpush1.bf16.msra.mxu0 %v5180_v0  ;;  %1767 = vmatpush1.bf16.msra.mxu1 %v5184_v5  ;;  %v148_v0 = vld [vmem:[#allocation8 + $0xb8] sm:$0xff] }
  0xf0   :  { %1777 = vmatprep.subr.bf16.mxu0 %v5186_v9  ;;  %1818 = vmatprep.subr.bf16.mxu1 %v5189_v63  ;;  %7070 = vst [vmem:[#allocation92_spill] sm:$0xff] %v5212_v57  ;;  %v5215_v60 = vcombine.high %v144_v34, %v148_v0  ;;  %v151_v63 = vld [vmem:[#allocation8 + $0xd0] sm:$0xff]  ;;  %v152_v5 = vld [vmem:[#allocation8 + $0xd8] sm:$0xff]  ;;  %7072 = vst [vmem:[#allocation94_spill] sm:$0xff] %v5220_v14  ;;  %v5224_v10 = vcombine.low %v144_v34, %v148_v0 }
  0xf1   :  { %v155_v9 = vld [vmem:[#allocation8 + $0xf0] sm:$0xff] }
  0xf2   :  { %1728 = vmatmul.mubr.bf16.vlgmr.msra.gmra.mrb[32].mxu0 %v7067_v41  ;;  %1769 = vmatmul.mubr.bf16.vlgmr.msra.gmra.mrb[32].mxu1 %v7067_v41  ;;  %7071 = vst [vmem:[#allocation93_spill] sm:$0xff] %v5215_v60  ;;  %7073 = vst [vmem:[#allocation95_spill] sm:$0xff] %v5224_v10  ;;  %v5226_v13 = vcombine.high %v151_v63, %v155_v9  ;;  %v5232_v43 = vcombine.low %v151_v63, %v155_v9 }
  0xf3   :  { %1778 = vmatpush1.bf16.msra.mxu0 %v5192_v30  ;;  %1819 = vmatpush1.bf16.msra.mxu1 %v5196_v18  ;;  %v156_v30 = vld [vmem:[#allocation8 + $0xf8] sm:$0xff] }
  0xf4   :  { %1779 = vmatprep.subr.bf16.mxu0 %v5198_v29  ;;  %1820 = vmatprep.subr.bf16.mxu1 %v5201_v33  ;;  %7074 = vst [vmem:[#allocation96_spill] sm:$0xff] %v5226_v13  ;;  %v5229_v17 = vcombine.high %v152_v5, %v156_v30  ;;  %v159_v33 = vld [vmem:[#allocation8 + $0x110] sm:$0xff]  ;;  %v160_v18 = vld [vmem:[#allocation8 + $0x118] sm:$0xff]  ;;  %7076 = vst [vmem:[#allocation98_spill] sm:$0xff] %v5232_v43  ;;  %v5236_v34 = vcombine.low %v152_v5, %v156_v30 }
  0xf5   :  { %1809 = vmatprep.mubr.bf16.mxu0 %v7067_v41  ;;  %1850 = vmatprep.mubr.bf16.mxu1 %v7067_v41  ;;  %v163_v29 = vld [vmem:[#allocation8 + $0x130] sm:$0xff]  ;;  %v5241_v0 = vcombine.high %v160_v18, %v164_v4  ;;  %v5248_v5 = vcombine.low %v160_v18, %v164_v4 }
  0xf6   :  { %7075 = vst [vmem:[#allocation97_spill] sm:$0xff] %v5229_v17  ;;  %7077 = vst [vmem:[#allocation99_spill] sm:$0xff] %v5236_v34  ;;  %v5238_v44 = vcombine.high %v159_v33, %v163_v29  ;;  %v5244_v9 = vcombine.low %v159_v33, %v163_v29 }
  0xf7   :  { %1780 = vmatpush1.bf16.msra.mxu0 %v5206_v59  ;;  %1821 = vmatpush1.bf16.msra.mxu1 %v5210_v47  ;;  %7079 = vst [vmem:[#allocation101_spill] sm:$0xff] %v5241_v0  ;;  %v168_v47 = vld [vmem:[#allocation8 + $0x158] sm:$0xff]  ;;  %7081 = vst [vmem:[#allocation103_spill] sm:$0xff] %v5248_v5 }
  0xf8   :  { %1781 = vmatprep.subr.bf16.mxu0 %v5212_v57  ;;  %1822 = vmatprep.subr.bf16.mxu1 %v5215_v60  ;;  %7078 = vst [vmem:[#allocation100_spill] sm:$0xff] %v5238_v44  ;;  %v167_v60 = vld [vmem:[#allocation8 + $0x150] sm:$0xff]  ;;  %v172_v59 = vld [vmem:[#allocation8 + $0x178] sm:$0xff]  ;;  %7080 = vst [vmem:[#allocation102_spill] sm:$0xff] %v5244_v9 }
  0xf9   :  { %v171_v57 = vld [vmem:[#allocation8 + $0x170] sm:$0xff]  ;;  %v5253_v30 = vcombine.high %v168_v47, %v172_v59  ;;  %v5260_v4 = vcombine.low %v168_v47, %v172_v59 }
  0xfa   :  { %v5250_v63 = vcombine.high %v167_v60, %v171_v57  ;;  %v5256_v29 = vcombine.low %v167_v60, %v171_v57 }
  0xfb   :  { %1782 = vmatpush1.bf16.msra.mxu0 %v5220_v14  ;;  %1823 = vmatpush1.bf16.msra.mxu1 %v5224_v10  ;;  %7083 = vst [vmem:[#allocation105_spill] sm:$0xff] %v5253_v30  ;;  %v176_v10 = vld [vmem:[#allocation8 + $0x198] sm:$0xff]  ;;  %7085 = vst [vmem:[#allocation107_spill] sm:$0xff] %v5260_v4 }
  0xfc   :  { %1783 = vmatprep.subr.bf16.mxu0 %v5226_v13  ;;  %1824 = vmatprep.subr.bf16.mxu1 %v5229_v17  ;;  %7082 = vst [vmem:[#allocation104_spill] sm:$0xff] %v5250_v63  ;;  %v175_v17 = vld [vmem:[#allocation8 + $0x190] sm:$0xff]  ;;  %v180_v14 = vld [vmem:[#allocation8 + $0x1b8] sm:$0xff]  ;;  %7084 = vst [vmem:[#allocation106_spill] sm:$0xff] %v5256_v29 }
  0xfd   :  { %v179_v13 = vld [vmem:[#allocation8 + $0x1b0] sm:$0xff]  ;;  %v5265_v33 = vcombine.high %v176_v10, %v180_v14  ;;  %v5272_v59 = vcombine.low %v176_v10, %v180_v14 }
  0xfe   :  { %v5262_v18 = vcombine.high %v175_v17, %v179_v13  ;;  %v5268_v57 = vcombine.low %v175_v17, %v179_v13 }
  0xff   :  { %1784 = vmatpush1.bf16.msra.mxu0 %v5232_v43  ;;  %1825 = vmatpush1.bf16.msra.mxu1 %v5236_v34  ;;  %7087 = vst [vmem:[#allocation109_spill] sm:$0xff] %v5265_v33  ;;  %v184_v34 = vld [vmem:[#allocation8 + $0x1d8] sm:$0xff]  ;;  %7089 = vst [vmem:[#allocation111_spill] sm:$0xff] %v5272_v59 }
 0x100   :  { %1785 = vmatprep.subr.bf16.mxu0 %v5238_v44  ;;  %1826 = vmatprep.subr.bf16.mxu1 %v5241_v0  ;;  %7086 = vst [vmem:[#allocation108_spill] sm:$0xff] %v5262_v18  ;;  %v183_v0 = vld [vmem:[#allocation8 + $0x1d0] sm:$0xff]  ;;  %v188_v43 = vld [vmem:[#allocation8 + $0x1f8] sm:$0xff]  ;;  %7088 = vst [vmem:[#allocation110_spill] sm:$0xff] %v5268_v57 }
 0x101   :  { %v187_v44 = vld [vmem:[#allocation8 + $0x1f0] sm:$0xff]  ;;  %v5277_v60 = vcombine.high %v184_v34, %v188_v43  ;;  %v5284_v14 = vcombine.low %v184_v34, %v188_v43 }
 0x102   :  { %v5274_v47 = vcombine.high %v183_v0, %v187_v44  ;;  %v5280_v13 = vcombine.low %v183_v0, %v187_v44 }
 0x103   :  { %1786 = vmatpush1.bf16.msra.mxu0 %v5244_v9  ;;  %1827 = vmatpush1.bf16.msra.mxu1 %v5248_v5  ;;  %7091 = vst [vmem:[#allocation113_spill] sm:$0xff] %v5277_v60  ;;  %v192_v5 = vld [vmem:[#allocation8 + $0x218] sm:$0xff]  ;;  %7093 = vst [vmem:[#allocation115_spill] sm:$0xff] %v5284_v14 }
 0x104   :  { %1787 = vmatprep.subr.bf16.mxu0 %v5250_v63  ;;  %1828 = vmatprep.subr.bf16.mxu1 %v5253_v30  ;;  %7090 = vst [vmem:[#allocation112_spill] sm:$0xff] %v5274_v47  ;;  %v191_v30 = vld [vmem:[#allocation8 + $0x210] sm:$0xff]  ;;  %v196_v9 = vld [vmem:[#allocation8 + $0x238] sm:$0xff]  ;;  %7092 = vst [vmem:[#allocation114_spill] sm:$0xff] %v5280_v13 }
 0x105   :  { %v195_v63 = vld [vmem:[#allocation8 + $0x230] sm:$0xff]  ;;  %v5289_v17 = vcombine.high %v192_v5, %v196_v9  ;;  %v5296_v43 = vcombine.low %v192_v5, %v196_v9 }
 0x106   :  { %v5286_v10 = vcombine.high %v191_v30, %v195_v63  ;;  %v5292_v44 = vcombine.low %v191_v30, %v195_v63 }
 0x107   :  { %1788 = vmatpush1.bf16.msra.mxu0 %v5256_v29  ;;  %1829 = vmatpush1.bf16.msra.mxu1 %v5260_v4  ;;  %7095 = vst [vmem:[#allocation117_spill] sm:$0xff] %v5289_v17  ;;  %v200_v4 = vld [vmem:[#allocation8 + $0x258] sm:$0xff]  ;;  %7097 = vst [vmem:[#allocation119_spill] sm:$0xff] %v5296_v43 }
 0x108   :  { %1789 = vmatprep.subr.bf16.mxu0 %v5262_v18  ;;  %1830 = vmatprep.subr.bf16.mxu1 %v5265_v33  ;;  %7094 = vst [vmem:[#allocation116_spill] sm:$0xff] %v5286_v10  ;;  %v199_v33 = vld [vmem:[#allocation8 + $0x250] sm:$0xff]  ;;  %v204_v29 = vld [vmem:[#allocation8 + $0x278] sm:$0xff]  ;;  %7096 = vst [vmem:[#allocation118_spill] sm:$0xff] %v5292_v44 }
 0x109   :  { %v203_v18 = vld [vmem:[#allocation8 + $0x270] sm:$0xff]  ;;  %v5301_v0 = vcombine.high %v200_v4, %v204_v29  ;;  %v5308_v9 = vcombine.low %v200_v4, %v204_v29 }
 0x10a   :  { %v5298_v34 = vcombine.high %v199_v33, %v203_v18  ;;  %v5304_v63 = vcombine.low %v199_v33, %v203_v18 }
 0x10b   :  { %1790 = vmatpush1.bf16.msra.mxu0 %v5268_v57  ;;  %1831 = vmatpush1.bf16.msra.mxu1 %v5272_v59  ;;  %7099 = vst [vmem:[#allocation121_spill] sm:$0xff] %v5301_v0  ;;  %v208_v59 = vld [vmem:[#allocation8 + $0x298] sm:$0xff]  ;;  %7101 = vst [vmem:[#allocation123_spill] sm:$0xff] %v5308_v9 }
 0x10c   :  { %1791 = vmatprep.subr.bf16.mxu0 %v5274_v47  ;;  %1832 = vmatprep.subr.bf16.mxu1 %v5277_v60  ;;  %7098 = vst [vmem:[#allocation120_spill] sm:$0xff] %v5298_v34  ;;  %v207_v60 = vld [vmem:[#allocation8 + $0x290] sm:$0xff]  ;;  %v212_v57 = vld [vmem:[#allocation8 + $0x2b8] sm:$0xff]  ;;  %7100 = vst [vmem:[#allocation122_spill] sm:$0xff] %v5304_v63 }
 0x10d   :  { %v211_v47 = vld [vmem:[#allocation8 + $0x2b0] sm:$0xff]  ;;  %v5313_v30 = vcombine.high %v208_v59, %v212_v57  ;;  %v5320_v29 = vcombine.low %v208_v59, %v212_v57 }
 0x10e   :  { %v5310_v5 = vcombine.high %v207_v60, %v211_v47  ;;  %v5316_v18 = vcombine.low %v207_v60, %v211_v47 }
 0x10f   :  { %1792 = vmatpush1.bf16.msra.mxu0 %v5280_v13  ;;  %1833 = vmatpush1.bf16.msra.mxu1 %v5284_v14  ;;  %7103 = vst [vmem:[#allocation125_spill] sm:$0xff] %v5313_v30  ;;  %v216_v14 = vld [vmem:[#allocation8 + $0x2d8] sm:$0xff]  ;;  %7105 = vst [vmem:[#allocation127_spill] sm:$0xff] %v5320_v29 }
 0x110   :  { %1793 = vmatprep.subr.bf16.mxu0 %v5286_v10  ;;  %1834 = vmatprep.subr.bf16.mxu1 %v5289_v17  ;;  %7102 = vst [vmem:[#allocation124_spill] sm:$0xff] %v5310_v5  ;;  %v215_v17 = vld [vmem:[#allocation8 + $0x2d0] sm:$0xff]  ;;  %v220_v13 = vld [vmem:[#allocation8 + $0x2f8] sm:$0xff]  ;;  %7104 = vst [vmem:[#allocation126_spill] sm:$0xff] %v5316_v18 }
 0x111   :  { %v219_v10 = vld [vmem:[#allocation8 + $0x2f0] sm:$0xff]  ;;  %v5325_v33 = vcombine.high %v216_v14, %v220_v13  ;;  %v5332_v57 = vcombine.low %v216_v14, %v220_v13 }
 0x112   :  { %v5322_v4 = vcombine.high %v215_v17, %v219_v10  ;;  %v5328_v47 = vcombine.low %v215_v17, %v219_v10 }
 0x113   :  { %1794 = vmatpush1.bf16.msra.mxu0 %v5292_v44  ;;  %1835 = vmatpush1.bf16.msra.mxu1 %v5296_v43  ;;  %7107 = vst [vmem:[#allocation129_spill] sm:$0xff] %v5325_v33  ;;  %v224_v43 = vld [vmem:[#allocation8 + $0x318] sm:$0xff]  ;;  %7109 = vst [vmem:[#allocation131_spill] sm:$0xff] %v5332_v57 }
 0x114   :  { %1795 = vmatprep.subr.bf16.mxu0 %v5298_v34  ;;  %1836 = vmatprep.subr.bf16.mxu1 %v5301_v0  ;;  %7106 = vst [vmem:[#allocation128_spill] sm:$0xff] %v5322_v4  ;;  %v223_v0 = vld [vmem:[#allocation8 + $0x310] sm:$0xff]  ;;  %v228_v44 = vld [vmem:[#allocation8 + $0x338] sm:$0xff]  ;;  %7108 = vst [vmem:[#allocation130_spill] sm:$0xff] %v5328_v47 }
 0x115   :  { %v227_v34 = vld [vmem:[#allocation8 + $0x330] sm:$0xff]  ;;  %v5337_v60 = vcombine.high %v224_v43, %v228_v44  ;;  %v5344_v13 = vcombine.low %v224_v43, %v228_v44 }
 0x116   :  { %v5334_v59 = vcombine.high %v223_v0, %v227_v34  ;;  %v5340_v10 = vcombine.low %v223_v0, %v227_v34 }
 0x117   :  { %1796 = vmatpush1.bf16.msra.mxu0 %v5304_v63  ;;  %1837 = vmatpush1.bf16.msra.mxu1 %v5308_v9  ;;  %7111 = vst [vmem:[#allocation133_spill] sm:$0xff] %v5337_v60  ;;  %v232_v9 = vld [vmem:[#allocation8 + $0x358] sm:$0xff]  ;;  %7113 = vst [vmem:[#allocation135_spill] sm:$0xff] %v5344_v13 }
 0x118   :  { %1797 = vmatprep.subr.bf16.mxu0 %v5310_v5  ;;  %1838 = vmatprep.subr.bf16.mxu1 %v5313_v30  ;;  %7110 = vst [vmem:[#allocation132_spill] sm:$0xff] %v5334_v59  ;;  %v231_v30 = vld [vmem:[#allocation8 + $0x350] sm:$0xff]  ;;  %v236_v63 = vld [vmem:[#allocation8 + $0x378] sm:$0xff]  ;;  %7112 = vst [vmem:[#allocation134_spill] sm:$0xff] %v5340_v10 }
 0x119   :  { %v235_v5 = vld [vmem:[#allocation8 + $0x370] sm:$0xff]  ;;  %v5349_v17 = vcombine.high %v232_v9, %v236_v63  ;;  %v5356_v44 = vcombine.low %v232_v9, %v236_v63 }
 0x11a   :  { %v5346_v14 = vcombine.high %v231_v30, %v235_v5  ;;  %v5352_v34 = vcombine.low %v231_v30, %v235_v5 }
 0x11b   :  { %1798 = vmatpush1.bf16.msra.mxu0 %v5316_v18  ;;  %1839 = vmatpush1.bf16.msra.mxu1 %v5320_v29  ;;  %7115 = vst [vmem:[#allocation137_spill] sm:$0xff] %v5349_v17  ;;  %v240_v29 = vld [vmem:[#allocation8 + $0x398] sm:$0xff]  ;;  %7117 = vst [vmem:[#allocation139_spill] sm:$0xff] %v5356_v44 }
 0x11c   :  { %1799 = vmatprep.subr.bf16.mxu0 %v5322_v4  ;;  %1840 = vmatprep.subr.bf16.mxu1 %v5325_v33  ;;  %7114 = vst [vmem:[#allocation136_spill] sm:$0xff] %v5346_v14  ;;  %v239_v33 = vld [vmem:[#allocation8 + $0x390] sm:$0xff]  ;;  %v244_v18 = vld [vmem:[#allocation8 + $0x3b8] sm:$0xff]  ;;  %7116 = vst [vmem:[#allocation138_spill] sm:$0xff] %v5352_v34 }
 0x11d   :  { %v243_v4 = vld [vmem:[#allocation8 + $0x3b0] sm:$0xff]  ;;  %v5361_v0 = vcombine.high %v240_v29, %v244_v18  ;;  %v5368_v63 = vcombine.low %v240_v29, %v244_v18  ;;  %v7126_v18 = vld [vmem:[#allocation63_spill] sm:$0xff]  ;;  %v7127_v29 = vld [vmem:[#allocation64_spill] sm:$0xff] }
 0x11e   :  { %v5358_v43 = vcombine.high %v239_v33, %v243_v4  ;;  %v5364_v5 = vcombine.low %v239_v33, %v243_v4 }
 0x11f   :  { %1800 = vmatpush1.bf16.msra.mxu0 %v5328_v47  ;;  %1841 = vmatpush1.bf16.msra.mxu1 %v5332_v57  ;;  %7119 = vst [vmem:[#allocation141_spill] sm:$0xff] %v5361_v0  ;;  %v248_v57 = vld [vmem:[#allocation8 + $0x3d8] sm:$0xff]  ;;  %7121 = vst [vmem:[#allocation143_spill] sm:$0xff] %v5368_v63 }
 0x120   :  { %1801 = vmatprep.subr.bf16.mxu0 %v5334_v59  ;;  %1842 = vmatprep.subr.bf16.mxu1 %v5337_v60  ;;  %7118 = vst [vmem:[#allocation140_spill] sm:$0xff] %v5358_v43  ;;  %v247_v60 = vld [vmem:[#allocation8 + $0x3d0] sm:$0xff]  ;;  %v252_v47 = vld [vmem:[#allocation8 + $0x3f8] sm:$0xff]  ;;  %7120 = vst [vmem:[#allocation142_spill] sm:$0xff] %v5364_v5 }
 0x121   :  { %v251_v59 = vld [vmem:[#allocation8 + $0x3f0] sm:$0xff]  ;;  %v5373_v30 = vcombine.high %v248_v57, %v252_v47  ;;  %v5380_v4 = vcombine.low %v248_v57, %v252_v47  ;;  %v7129_v57 = vld [vmem:[#allocation66_spill] sm:$0xff] }
 0x122   :  { %v5370_v9 = vcombine.high %v247_v60, %v251_v59  ;;  %v7128_v47 = vld [vmem:[#allocation65_spill] sm:$0xff] }
 0x123   :  { %1802 = vmatpush1.bf16.msra.mxu0 %v5340_v10  ;;  %1843 = vmatpush1.bf16.msra.mxu1 %v5344_v13  ;;  %7123 = vst [vmem:[#allocation145_spill] sm:$0xff] %v5373_v30  ;;  %7125 = vst [vmem:[#allocation147_spill] sm:$0xff] %v5380_v4 }
 0x124   :  { %1803 = vmatprep.subr.bf16.mxu0 %v5346_v14  ;;  %1844 = vmatprep.subr.bf16.mxu1 %v5349_v17  ;;  %7122 = vst [vmem:[#allocation144_spill] sm:$0xff] %v5370_v9  ;;  %v5376_v17 = vcombine.low %v247_v60, %v251_v59  ;;  %v7131_v60 = vld [vmem:[#allocation67_spill] sm:$0xff] }
 0x126   :  { %7124 = vst [vmem:[#allocation146_spill] sm:$0xff] %v5376_v17 }
 0x127   :  { %1804 = vmatpush1.bf16.msra.mxu0 %v5352_v34  ;;  %1845 = vmatpush1.bf16.msra.mxu1 %v5356_v44 }
 0x128   :  { %1805 = vmatprep.subr.bf16.mxu0 %v5358_v43  ;;  %1846 = vmatprep.subr.bf16.mxu1 %v5361_v0 }
 0x12b   :  { %1806 = vmatpush1.bf16.msra.mxu0 %v5364_v5  ;;  %1847 = vmatpush1.bf16.msra.mxu1 %v5368_v63 }
 0x12c   :  { %1807 = vmatprep.subr.bf16.mxu0 %v5370_v9  ;;  %1848 = vmatprep.subr.bf16.mxu1 %v5373_v30 }
 0x12f   :  { %1808 = vmatpush1.bf16.msra.mxu0 %v5376_v17  ;;  %1849 = vmatpush1.bf16.msra.mxu1 %v5380_v4 }
 0x130   :  { %1913 = vmatprep.subr.bf16.mxu0 %v4979_v20  ;;  %1954 = vmatprep.subr.bf16.mxu1 %v4982_v21 }
 0x132   :  { %1810 = vmatmul.mubr.bf16.vlgmr.msra.gmra.mrb[36].mxu0 %v7067_v41  ;;  %1851 = vmatmul.mubr.bf16.vlgmr.msra.gmra.mrb[36].mxu1 %v7067_v41  ;;  %v331_v41 = vlaneseq }
 0x133   :  { %1914 = vmatpush1.bf16.msra.mxu0 %v4985_v26  ;;  %1955 = vmatpush1.bf16.msra.mxu1 %v4988_v27 }
 0x134   :  { %1915 = vmatprep.subr.bf16.mxu0 %v4990_v28  ;;  %1956 = vmatprep.subr.bf16.mxu1 %v4993_v32  ;;  %v5432_v33 = vshrl.u32 %v331_v41, 7  ;;  %v5449_v41 = vld [vmem:[%s6716_s3] sm:$0xff] }
 0x136   :  { %v5437_v59 = vsub.s32 0, %v5432_v33 }
 0x137   :  { %1916 = vmatpush1.bf16.msra.mxu0 %v4998_v35  ;;  %1957 = vmatpush1.bf16.msra.mxu1 %v5002_v38 }
 0x138   :  { %1917 = vmatprep.subr.bf16.mxu0 %v5004_v39  ;;  %1958 = vmatprep.subr.bf16.mxu1 %v5007_v42  ;;  %7130 = vst [vmem:[#allocation148_spill] sm:$0xff] %v5437_v59 }
 0x13b   :  { %1918 = vmatpush1.bf16.msra.mxu0 %v5012_v12  ;;  %1959 = vmatpush1.bf16.msra.mxu1 %v5016_v45 }
 0x13c   :  { %1919 = vmatprep.subr.bf16.mxu0 %v5018_v46  ;;  %1960 = vmatprep.subr.bf16.mxu1 %v5021_v49 }
 0x13f   :  { %1920 = vmatpush1.bf16.msra.mxu0 %v5025_v51  ;;  %1961 = vmatpush1.bf16.msra.mxu1 %v5030_v54 }
 0x140   :  { %1921 = vmatprep.subr.bf16.mxu0 %v5032_v55  ;;  %1962 = vmatprep.subr.bf16.mxu1 %v5035_v58 }
 0x143   :  { %1922 = vmatpush1.bf16.msra.mxu0 %v5040_v31  ;;  %1963 = vmatpush1.bf16.msra.mxu1 %v5044_v61 }
 0x144   :  { %1923 = vmatprep.subr.bf16.mxu0 %v5046_v62  ;;  %1964 = vmatprep.subr.bf16.mxu1 %v5049_v2 }
 0x147   :  { %1924 = vmatpush1.bf16.msra.mxu0 %v5053_v3  ;;  %1965 = vmatpush1.bf16.msra.mxu1 %v5058_v7 }
 0x148   :  { %1925 = vmatprep.subr.bf16.mxu0 %v5060_v8  ;;  %1966 = vmatprep.subr.bf16.mxu1 %v5063_v11 }
 0x14b   :  { %1926 = vmatpush1.bf16.msra.mxu0 %v5068_v50  ;;  %1967 = vmatpush1.bf16.msra.mxu1 %v5072_v15 }
 0x14c   :  { %1927 = vmatprep.subr.bf16.mxu0 %v5074_v16  ;;  %1968 = vmatprep.subr.bf16.mxu1 %v5077_v19  ;;  %v7147_v19 = vld [vmem:[#allocation78_spill] sm:$0xff]  ;;  %v7158_v16 = vld [vmem:[#allocation84_spill] sm:$0xff] }
 0x14f   :  { %1928 = vmatpush1.bf16.msra.mxu0 %v5081_v22  ;;  %1969 = vmatpush1.bf16.msra.mxu1 %v5086_v23 }
 0x150   :  { %1929 = vmatprep.subr.bf16.mxu0 %v5088_v24  ;;  %1970 = vmatprep.subr.bf16.mxu1 %v5091_v25  ;;  %v7141_v25 = vld [vmem:[#allocation75_spill] sm:$0xff] }
 0x153   :  { %1930 = vmatpush1.bf16.msra.mxu0 %v5096_v6  ;;  %1971 = vmatpush1.bf16.msra.mxu1 %v5100_v36  ;;  %v7139_v36 = vld [vmem:[#allocation74_spill] sm:$0xff] }
 0x154   :  { %1931 = vmatprep.subr.bf16.mxu0 %v5102_v37  ;;  %1972 = vmatprep.subr.bf16.mxu1 %v5105_v40 }
 0x157   :  { %1932 = vmatpush1.bf16.msra.mxu0 %v5108_v48  ;;  %1973 = vmatpush1.bf16.msra.mxu1 %v5112_v52 }
 0x158   :  { %1933 = vmatprep.subr.bf16.mxu0 %v5114_v53  ;;  %1974 = vmatprep.subr.bf16.mxu1 %v5117_v56  ;;  %v7132_v53 = vld [vmem:[#allocation68_spill] sm:$0xff]  ;;  %v341_v56 = vsub.s32 2, %v5432_v33 }
 0x15a   :  { %v5460_v52 = vrot.slane %v5449_v41, %v341_v56 }
 0x15b   :  { %1934 = vmatpush1.bf16.msra.mxu0 %v5120_v1  ;;  %1975 = vmatpush1.bf16.msra.mxu1 %v7126_v18  ;;  %v5443_v1 = vsub.s32 1, %v5432_v33  ;;  %v7134_v18 = vld [vmem:[#allocation69_spill] sm:$0xff] }
 0x15c   :  { %1935 = vmatprep.subr.bf16.mxu0 %v7127_v29  ;;  %1976 = vmatprep.subr.bf16.mxu1 %v7128_v47  ;;  %v345_v47 = vsub.s32 3, %v5432_v33  ;;  %v7137_v29 = vld [vmem:[#allocation72_spill] sm:$0xff] }
 0x15d   :  { %7133 = vst [vmem:[#allocation149_spill] sm:$0xff] %v5443_v1  ;;  %v5466_v48 = vrot.slane %v5449_v41, %v5443_v1 }
 0x15e   :  { %v5477_v56 = vrot.slane %v5449_v41, %v345_v47 }
 0x15f   :  { %1936 = vmatpush1.bf16.msra.mxu0 %v7129_v57  ;;  %1977 = vmatpush1.bf16.msra.mxu1 %v7131_v60  ;;  %v7135_v57 = vld [vmem:[#allocation70_spill] sm:$0xff]  ;;  %v5455_v60 = vrot.slane %v5449_v41, %v5437_v59 }
 0x160   :  { %1937 = vmatprep.subr.bf16.mxu0 %v7132_v53  ;;  %1978 = vmatprep.subr.bf16.mxu1 %v7134_v18  ;;  %v7136_v53 = vld [vmem:[#allocation71_spill] sm:$0xff] }
 0x163   :  { %1938 = vmatpush1.bf16.msra.mxu0 %v7135_v57  ;;  %1979 = vmatpush1.bf16.msra.mxu1 %v7136_v53  ;;  %v7138_v57 = vld [vmem:[#allocation73_spill] sm:$0xff] }
 0x164   :  { %1939 = vmatprep.subr.bf16.mxu0 %v7137_v29  ;;  %1980 = vmatprep.subr.bf16.mxu1 %v7138_v57  ;;  %v7142_v57 = vld [vmem:[#allocation76_spill] sm:$0xff] }
 0x165   :  { %v5462_v18 = vpop.f32.mrb[0].mxu0  ;;  %v5469_v40 = vpop.f32.mrb[0].mxu1 }
 0x166   :  { %v5471_v37 = vpop.f32.mrb[1].mxu0  ;;  %v5473_v59 = vpop.f32.mrb[1].mxu1 }
 0x167   :  { %v729_v53 = vpop.f32.mrb[2].mxu0  ;;  %1940 = vmatpush1.bf16.msra.mxu0 %v7139_v36  ;;  %v802_v29 = vpop.f32.mrb[2].mxu1  ;;  %1981 = vmatpush1.bf16.msra.mxu1 %v7141_v25  ;;  %v7145_v36 = vld [vmem:[#allocation77_spill] sm:$0xff] }
 0x168   :  { %v5480_v6 = vadd.f32 %v729_v53, %v5455_v60  ;;  %v731_v1 = vpop.f32.mrb[3].mxu0  ;;  %1941 = vmatprep.subr.bf16.mxu0 %v7142_v57  ;;  %v5485_v24 = vadd.f32 %v802_v29, %v5460_v52  ;;  %v804_v23 = vpop.f32.mrb[3].mxu1  ;;  %1982 = vmatprep.subr.bf16.mxu1 %v7145_v36  ;;  %v7148_v53 = vld [vmem:[#allocation79_spill] sm:$0xff]  ;;  %v7150_v57 = vld [vmem:[#allocation81_spill] sm:$0xff] }
 0x169   :  { %v5488_v22 = vadd.f32 %v731_v1, %v5466_v48  ;;  %v5492_v47 = vadd.f32 %v804_v23, %v5477_v56 }
 0x16a   :  { %7140 = vst [vmem:[#allocation150_spill] sm:$0xff] %v5480_v6  ;;  %7143 = vst [vmem:[#allocation151_spill] sm:$0xff] %v5485_v24  ;;  %v7149_v6 = vld [vmem:[#allocation80_spill] sm:$0xff] }
 0x16b   :  { %7144 = vst [vmem:[#allocation152_spill] sm:$0xff] %v5488_v22  ;;  %7146 = vst [vmem:[#allocation153_spill] sm:$0xff] %v5492_v47  ;;  %1942 = vmatpush1.bf16.msra.mxu0 %v7147_v19  ;;  %1983 = vmatpush1.bf16.msra.mxu1 %v7148_v53  ;;  %v7154_v19 = vld [vmem:[#allocation82_spill] sm:$0xff] }
 0x16c   :  { %1943 = vmatprep.subr.bf16.mxu0 %v7149_v6  ;;  %1984 = vmatprep.subr.bf16.mxu1 %v7150_v57 }
 0x16d   :  { %v735_v25 = vpop.f32.mrb[4].mxu0  ;;  %v808_v29 = vpop.f32.mrb[4].mxu1 }
 0x16e   :  { %v5499_v24 = vadd.f32 %v735_v25, %v5455_v60  ;;  %v737_v1 = vpop.f32.mrb[5].mxu0  ;;  %v5502_v22 = vadd.f32 %v808_v29, %v5460_v52  ;;  %v810_v36 = vpop.f32.mrb[5].mxu1 }
 0x16f   :  { %v5505_v23 = vadd.f32 %v737_v1, %v5466_v48  ;;  %v739_v47 = vpop.f32.mrb[6].mxu0  ;;  %1944 = vmatpush1.bf16.msra.mxu0 %v7154_v19  ;;  %v5509_v6 = vadd.f32 %v810_v36, %v5477_v56  ;;  %v812_v53 = vpop.f32.mrb[6].mxu1 }
 0x170   :  { %7151 = vst [vmem:[#allocation154_spill] sm:$0xff] %v5499_v24  ;;  %7152 = vst [vmem:[#allocation155_spill] sm:$0xff] %v5502_v22  ;;  %v5512_v57 = vadd.f32 %v739_v47, %v5455_v60  ;;  %v741_v25 = vpop.f32.mrb[7].mxu0  ;;  %v7157_v24 = vld [vmem:[#allocation83_spill] sm:$0xff]  ;;  %1995 = vmatprep.subr.bf16.mxu0 %v7158_v16  ;;  %v5517_v29 = vadd.f32 %v812_v53, %v5460_v52  ;;  %v814_v1 = vpop.f32.mrb[7].mxu1  ;;  %v7161_v22 = vld [vmem:[#allocation85_spill] sm:$0xff] }
 0x171   :  { %7153 = vst [vmem:[#allocation156_spill] sm:$0xff] %v5505_v23  ;;  %7155 = vst [vmem:[#allocation157_spill] sm:$0xff] %v5509_v6  ;;  %1985 = vmatpush1.bf16.msra.mxu1 %v7157_v24  ;;  %v5520_v23 = vadd.f32 %v741_v25, %v5466_v48  ;;  %v5524_v36 = vadd.f32 %v814_v1, %v5477_v56 }
 0x172   :  { %7156 = vst [vmem:[#allocation158_spill] sm:$0xff] %v5512_v57  ;;  %7159 = vst [vmem:[#allocation159_spill] sm:$0xff] %v5517_v29  ;;  %2036 = vmatprep.subr.bf16.mxu1 %v7161_v22 }
 0x173   :  { %7160 = vst [vmem:[#allocation160_spill] sm:$0xff] %v5520_v23  ;;  %7162 = vst [vmem:[#allocation161_spill] sm:$0xff] %v5524_v36 }
 0x175   :  { %v745_v6 = vpop.f32.mrb[8].mxu0  ;;  %v818_v47 = vpop.f32.mrb[8].mxu1 }
 0x176   :  { %v5527_v57 = vadd.f32 %v745_v6, %v5455_v60  ;;  %v747_v24 = vpop.f32.mrb[9].mxu0  ;;  %v5530_v16 = vadd.f32 %v818_v47, %v5460_v52  ;;  %v820_v53 = vpop.f32.mrb[9].mxu1 }
 0x177   :  { %v5533_v29 = vadd.f32 %v747_v24, %v5466_v48  ;;  %v749_v25 = vpop.f32.mrb[10].mxu0  ;;  %v5536_v23 = vadd.f32 %v820_v53, %v5477_v56  ;;  %v822_v22 = vpop.f32.mrb[10].mxu1 }
 0x178   :  { %7163 = vst [vmem:[#allocation162_spill] sm:$0xff] %v5527_v57  ;;  %7164 = vst [vmem:[#allocation163_spill] sm:$0xff] %v5530_v16  ;;  %v5539_v1 = vadd.f32 %v749_v25, %v5455_v60  ;;  %v751_v36 = vpop.f32.mrb[11].mxu0  ;;  %v5542_v6 = vadd.f32 %v822_v22, %v5460_v52  ;;  %v824_v57 = vpop.f32.mrb[11].mxu1 }
 0x179   :  { %7165 = vst [vmem:[#allocation164_spill] sm:$0xff] %v5533_v29  ;;  %7166 = vst [vmem:[#allocation165_spill] sm:$0xff] %v5536_v23  ;;  %v5545_v47 = vadd.f32 %v751_v36, %v5466_v48  ;;  %v5548_v16 = vadd.f32 %v824_v57, %v5477_v56 }
 0x17a   :  { %7167 = vst [vmem:[#allocation166_spill] sm:$0xff] %v5539_v1  ;;  %7168 = vst [vmem:[#allocation167_spill] sm:$0xff] %v5542_v6 }
 0x17b   :  { %7169 = vst [vmem:[#allocation168_spill] sm:$0xff] %v5545_v47  ;;  %7170 = vst [vmem:[#allocation169_spill] sm:$0xff] %v5548_v16 }
 0x17d   :  { %v755_v24 = vpop.f32.mrb[12].mxu0  ;;  %v828_v29 = vpop.f32.mrb[12].mxu1 }
 0x17e   :  { %v5551_v53 = vadd.f32 %v755_v24, %v5455_v60  ;;  %v757_v23 = vpop.f32.mrb[13].mxu0  ;;  %v5554_v25 = vadd.f32 %v828_v29, %v5460_v52  ;;  %v830_v1 = vpop.f32.mrb[13].mxu1  ;;  %v349_v24 = vsub.s32 4, %v5432_v33 }
 0x17f   :  { %v5557_v22 = vadd.f32 %v757_v23, %v5466_v48  ;;  %v759_v6 = vpop.f32.mrb[14].mxu0  ;;  %v5560_v36 = vadd.f32 %v830_v1, %v5477_v56  ;;  %v832_v47 = vpop.f32.mrb[14].mxu1 }
 0x180   :  { %7171 = vst [vmem:[#allocation170_spill] sm:$0xff] %v5551_v53  ;;  %7172 = vst [vmem:[#allocation171_spill] sm:$0xff] %v5554_v25  ;;  %v5563_v57 = vadd.f32 %v759_v6, %v5455_v60  ;;  %v761_v16 = vpop.f32.mrb[15].mxu0  ;;  %v5567_v53 = vadd.f32 %v832_v47, %v5460_v52  ;;  %v834_v29 = vpop.f32.mrb[15].mxu1  ;;  %v357_v25 = vsub.s32 6, %v5432_v33  ;;  %v361_v6 = vsub.s32 7, %v5432_v33 }
 0x181   :  { %7173 = vst [vmem:[#allocation172_spill] sm:$0xff] %v5557_v22  ;;  %7174 = vst [vmem:[#allocation173_spill] sm:$0xff] %v5560_v36  ;;  %v5571_v23 = vadd.f32 %v761_v16, %v5466_v48  ;;  %v353_v22 = vsub.s32 5, %v5432_v33  ;;  %v5575_v1 = vadd.f32 %v834_v29, %v5477_v56 }
 0x182   :  { %7175 = vst [vmem:[#allocation174_spill] sm:$0xff] %v5563_v57  ;;  %7176 = vst [vmem:[#allocation175_spill] sm:$0xff] %v5567_v53  ;;  %v5579_v57 = vrot.slane %v5449_v41, %v349_v24  ;;  %v5582_v36 = vrot.slane %v5449_v41, %v357_v25  ;;  %v5596_v33 = vrot.slane %v5449_v41, %v361_v6 }
 0x183   :  { %7177 = vst [vmem:[#allocation176_spill] sm:$0xff] %v5571_v23  ;;  %7178 = vst [vmem:[#allocation177_spill] sm:$0xff] %v5575_v1  ;;  %v5587_v53 = vrot.slane %v5449_v41, %v353_v22 }
 0x185   :  { %v5584_v47 = vpop.f32.mrb[16].mxu0  ;;  %v5589_v16 = vpop.f32.mrb[16].mxu1 }
 0x186   :  { %v5591_v23 = vpop.f32.mrb[17].mxu0  ;;  %v5593_v19 = vpop.f32.mrb[17].mxu1 }
 0x187   :  { %v875_v29 = vpop.f32.mrb[18].mxu0  ;;  %v948_v24 = vpop.f32.mrb[18].mxu1 }
 0x188   :  { %v5599_v1 = vadd.f32 %v875_v29, %v5579_v57  ;;  %v877_v25 = vpop.f32.mrb[19].mxu0  ;;  %v5602_v15 = vadd.f32 %v948_v24, %v5582_v36  ;;  %v950_v22 = vpop.f32.mrb[19].mxu1 }
 0x189   :  { %v5605_v50 = vadd.f32 %v877_v25, %v5587_v53  ;;  %v5608_v11 = vadd.f32 %v950_v22, %v5596_v33 }
 0x18a   :  { %7179 = vst [vmem:[#allocation178_spill] sm:$0xff] %v5599_v1  ;;  %7180 = vst [vmem:[#allocation179_spill] sm:$0xff] %v5602_v15 }
 0x18b   :  { %7181 = vst [vmem:[#allocation180_spill] sm:$0xff] %v5605_v50  ;;  %7182 = vst [vmem:[#allocation181_spill] sm:$0xff] %v5608_v11 }
 0x18d   :  { %v881_v8 = vpop.f32.mrb[20].mxu0  ;;  %v954_v7 = vpop.f32.mrb[20].mxu1 }
 0x18e   :  { %v5611_v41 = vadd.f32 %v881_v8, %v5579_v57  ;;  %v883_v6 = vpop.f32.mrb[21].mxu0  ;;  %v5614_v29 = vadd.f32 %v954_v7, %v5582_v36  ;;  %v956_v1 = vpop.f32.mrb[21].mxu1 }
 0x18f   :  { %v5617_v24 = vadd.f32 %v883_v6, %v5587_v53  ;;  %v885_v15 = vpop.f32.mrb[22].mxu0  ;;  %v5620_v25 = vadd.f32 %v956_v1, %v5596_v33  ;;  %v958_v50 = vpop.f32.mrb[22].mxu1 }
 0x190   :  { %7183 = vst [vmem:[#allocation182_spill] sm:$0xff] %v5611_v41  ;;  %7184 = vst [vmem:[#allocation183_spill] sm:$0xff] %v5614_v29  ;;  %v5623_v22 = vadd.f32 %v885_v15, %v5579_v57  ;;  %v887_v11 = vpop.f32.mrb[23].mxu0  ;;  %v5626_v8 = vadd.f32 %v958_v50, %v5582_v36  ;;  %v960_v41 = vpop.f32.mrb[23].mxu1 }
 0x191   :  { %7185 = vst [vmem:[#allocation184_spill] sm:$0xff] %v5617_v24  ;;  %7186 = vst [vmem:[#allocation185_spill] sm:$0xff] %v5620_v25  ;;  %v5629_v7 = vadd.f32 %v887_v11, %v5587_v53  ;;  %v5632_v29 = vadd.f32 %v960_v41, %v5596_v33 }
 0x192   :  { %7187 = vst [vmem:[#allocation186_spill] sm:$0xff] %v5623_v22  ;;  %7188 = vst [vmem:[#allocation187_spill] sm:$0xff] %v5626_v8 }
 0x193   :  { %7189 = vst [vmem:[#allocation188_spill] sm:$0xff] %v5629_v7  ;;  %7190 = vst [vmem:[#allocation189_spill] sm:$0xff] %v5632_v29 }
 0x195   :  { %v891_v6 = vpop.f32.mrb[24].mxu0  ;;  %v964_v24 = vpop.f32.mrb[24].mxu1 }
 0x196   :  { %v5635_v1 = vadd.f32 %v891_v6, %v5579_v57  ;;  %v893_v25 = vpop.f32.mrb[25].mxu0  ;;  %v5638_v15 = vadd.f32 %v964_v24, %v5582_v36  ;;  %v966_v22 = vpop.f32.mrb[25].mxu1 }
 0x197   :  { %v5641_v50 = vadd.f32 %v893_v25, %v5587_v53  ;;  %v895_v8 = vpop.f32.mrb[26].mxu0  ;;  %v5644_v11 = vadd.f32 %v966_v22, %v5596_v33  ;;  %v968_v7 = vpop.f32.mrb[26].mxu1 }
 0x198   :  { %7191 = vst [vmem:[#allocation190_spill] sm:$0xff] %v5635_v1  ;;  %7192 = vst [vmem:[#allocation191_spill] sm:$0xff] %v5638_v15  ;;  %v5647_v41 = vadd.f32 %v895_v8, %v5579_v57  ;;  %v897_v29 = vpop.f32.mrb[27].mxu0  ;;  %v5650_v6 = vadd.f32 %v968_v7, %v5582_v36  ;;  %v970_v1 = vpop.f32.mrb[27].mxu1 }
 0x199   :  { %7193 = vst [vmem:[#allocation192_spill] sm:$0xff] %v5641_v50  ;;  %7194 = vst [vmem:[#allocation193_spill] sm:$0xff] %v5644_v11  ;;  %v5653_v24 = vadd.f32 %v897_v29, %v5587_v53  ;;  %v5656_v15 = vadd.f32 %v970_v1, %v5596_v33 }
 0x19a   :  { %7195 = vst [vmem:[#allocation194_spill] sm:$0xff] %v5647_v41  ;;  %7196 = vst [vmem:[#allocation195_spill] sm:$0xff] %v5650_v6 }
 0x19b   :  { %7197 = vst [vmem:[#allocation196_spill] sm:$0xff] %v5653_v24  ;;  %7198 = vst [vmem:[#allocation197_spill] sm:$0xff] %v5656_v15 }
 0x19d   :  { %v901_v25 = vpop.f32.mrb[28].mxu0  ;;  %v974_v50 = vpop.f32.mrb[28].mxu1 }
 0x19e   :  { %v5659_v22 = vadd.f32 %v901_v25, %v5579_v57  ;;  %v903_v11 = vpop.f32.mrb[29].mxu0  ;;  %v5662_v8 = vadd.f32 %v974_v50, %v5582_v36  ;;  %v976_v41 = vpop.f32.mrb[29].mxu1 }
 0x19f   :  { %v5665_v7 = vadd.f32 %v903_v11, %v5587_v53  ;;  %v905_v6 = vpop.f32.mrb[30].mxu0  ;;  %v5668_v29 = vadd.f32 %v976_v41, %v5596_v33  ;;  %v978_v24 = vpop.f32.mrb[30].mxu1  ;;  %v726_v11 = vadd.f32 %v5462_v18, %v5455_v60  ;;  %v799_v41 = vadd.f32 %v5469_v40, %v5460_v52 }
 0x1a0   :  { %7199 = vst [vmem:[#allocation198_spill] sm:$0xff] %v5659_v22  ;;  %7200 = vst [vmem:[#allocation199_spill] sm:$0xff] %v5662_v8  ;;  %v5671_v1 = vadd.f32 %v905_v6, %v5579_v57  ;;  %v907_v15 = vpop.f32.mrb[31].mxu0  ;;  %v5674_v25 = vadd.f32 %v978_v24, %v5582_v36  ;;  %v980_v22 = vpop.f32.mrb[31].mxu1  ;;  %v728_v6 = vadd.f32 %v5471_v37, %v5466_v48 }
 0x1a1   :  { %7201 = vst [vmem:[#allocation200_spill] sm:$0xff] %v5665_v7  ;;  %7202 = vst [vmem:[#allocation201_spill] sm:$0xff] %v5668_v29  ;;  %v5677_v50 = vadd.f32 %v907_v15, %v5587_v53  ;;  %v5680_v8 = vadd.f32 %v980_v22, %v5596_v33  ;;  %v801_v24 = vadd.f32 %v5473_v59, %v5477_v56 }
 0x1a2   :  { %7203 = vst [vmem:[#allocation202_spill] sm:$0xff] %v5671_v1  ;;  %7204 = vst [vmem:[#allocation203_spill] sm:$0xff] %v5674_v25  ;;  %v872_v48 = vadd.f32 %v5584_v47, %v5579_v57  ;;  %v945_v59 = vadd.f32 %v5589_v16, %v5582_v36  ;;  %v874_v56 = vadd.f32 %v5591_v23, %v5587_v53 }
 0x1a3   :  { %7205 = vst [vmem:[#allocation204_spill] sm:$0xff] %v5677_v50  ;;  %7206 = vst [vmem:[#allocation205_spill] sm:$0xff] %v5680_v8 }
 0x1c5   :  { %v1729_v1 = vpop.f32.mrb[32].mxu0  ;;  %v1770_v29 = vpop.f32.mrb[32].mxu1 }
 0x1c6   :  { %v1859_v25 = vadd.f32 %v1729_v1, %v726_v11  ;;  %v1731_v15 = vpop.f32.mrb[33].mxu0  ;;  %v1861_v50 = vadd.f32 %v1770_v29, %v799_v41  ;;  %v1772_v22 = vpop.f32.mrb[33].mxu1 }
 0x1c7   :  { %v1860_v7 = vadd.f32 %v1731_v15, %v728_v6  ;;  %v1733_v8 = vpop.f32.mrb[34].mxu0  ;;  %v1862_v3 = vadd.f32 %v1772_v22, %v801_v24  ;;  %v1774_v2 = vpop.f32.mrb[34].mxu1 }
 0x1c8   :  { %v1734_v18 = vpop.f32.mrb[35].mxu0  ;;  %v1775_v60 = vpop.f32.mrb[35].mxu1  ;;  %v1869_v62 = vmul.f32 0.5, %v1861_v50  ;;  %v1867_v40 = vmul.f32 0.5, %v1859_v25  ;;  %v947_v8 = vadd.f32 %v5593_v19, %v5596_v33 }
 0x1c9   :  { %v1870_v52 = vmul.f32 0.5, %v1862_v3  ;;  %v1868_v37 = vmul.f32 0.5, %v1860_v7 }
 0x1ca   :  { %4466 = vtanh.f32 %v1869_v62 }
 0x1cb   :  { %4468 = vtanh.f32 %v1867_v40 }
 0x1cc   :  { %4470 = vtanh.f32 %v1870_v52 }
 0x1cd   :  { %4472 = vtanh.f32 %v1868_v37 }
 0x1d4   :  { %v4467_v41 = vpop.eup %4466 }
 0x1d5   :  { %v4469_v16 = vpop.eup %4468  ;;  %v1881_v53 = vadd.f32 1.0, %v4467_v41 }
 0x1d6   :  { %v4471_v6 = vpop.eup %4470  ;;  %v1879_v24 = vadd.f32 1.0, %v4469_v16 }
 0x1d7   :  { %v4473_v23 = vpop.eup %4472  ;;  %v1882_v33 = vadd.f32 1.0, %v4471_v6  ;;  %v1887_v22 = vmul.f32 0.5, %v1881_v53  ;;  %v7207_v53 = vld [vmem:[#allocation86_spill] sm:$0xff] }
 0x1d8   :  { %v1880_v18 = vadd.f32 1.0, %v4473_v23  ;;  %v1885_v60 = vmul.f32 0.5, %v1879_v24  ;;  %v7208_v23 = vld [vmem:[#allocation87_spill] sm:$0xff]  ;;  %v7209_v24 = vld [vmem:[#allocation88_spill] sm:$0xff] }
 0x1d9   :  { %v1888_v52 = vmul.f32 0.5, %v1882_v33  ;;  %v1893_v37 = vmul.f32 0.0, %v1887_v22  ;;  %v7211_v33 = vld [vmem:[#allocation90_spill] sm:$0xff]  ;;  %v7213_v22 = vld [vmem:[#allocation92_spill] sm:$0xff] }
 0x205   :  { %v1811_v2 = vpop.f32.mrb[36].mxu0  ;;  %v1852_v3 = vpop.f32.mrb[36].mxu1 }
 0x206   :  { %v1863_v29 = vadd.f32 %v1811_v2, %v872_v48  ;;  %v1813_v62 = vpop.f32.mrb[37].mxu0  ;;  %v1865_v7 = vadd.f32 %v1852_v3, %v945_v59  ;;  %v1854_v25 = vpop.f32.mrb[37].mxu1  ;;  %v1886_v59 = vmul.f32 0.5, %v1880_v18  ;;  %v7214_v18 = vld [vmem:[#allocation93_spill] sm:$0xff] }
 0x207   :  { %v1864_v1 = vadd.f32 %v1813_v62, %v874_v56  ;;  %v1815_v50 = vpop.f32.mrb[38].mxu0  ;;  %v1866_v11 = vadd.f32 %v1854_v25, %v947_v8  ;;  %v1856_v57 = vpop.f32.mrb[38].mxu1  ;;  %v1894_v8 = vmul.f32 0.0, %v1888_v52  ;;  %v7217_v52 = vld [vmem:[#allocation96_spill] sm:$0xff] }
 0x208   :  { %v1816_v47 = vpop.f32.mrb[39].mxu0  ;;  %4474 = vtanh.f32 %v1865_v7  ;;  %v1857_v36 = vpop.f32.mrb[39].mxu1  ;;  %v1871_v19 = vmul.f32 0.5, %v1863_v29 }
 0x209   :  { %4476 = vtanh.f32 %v1866_v11  ;;  %v1872_v15 = vmul.f32 0.5, %v1864_v1 }
 0x20a   :  { %4478 = vtanh.f32 %v1871_v19  ;;  %v7210_v19 = vld [vmem:[#allocation89_spill] sm:$0xff] }
 0x20b   :  { %4480 = vtanh.f32 %v1872_v15  ;;  %v7212_v15 = vld [vmem:[#allocation91_spill] sm:$0xff] }
 0x212   :  { %v4475_v40 = vpop.eup %4474 }
 0x213   :  { %v1895_v48 = vmul.f32 %v4475_v40, %v1885_v60  ;;  %v4477_v56 = vpop.eup %4476  ;;  %v7215_v60 = vld [vmem:[#allocation94_spill] sm:$0xff]  ;;  %v7216_v40 = vld [vmem:[#allocation95_spill] sm:$0xff] }
 0x214   :  { %v1896_v3 = vmul.f32 %v4477_v56, %v1886_v59  ;;  %v4479_v62 = vpop.eup %4478  ;;  %v7220_v59 = vld [vmem:[#allocation99_spill] sm:$0xff]  ;;  %v7221_v56 = vld [vmem:[#allocation100_spill] sm:$0xff] }
 0x215   :  { %v5698_v2 = vadd.f32 %v1895_v48, %v1893_v37  ;;  %v4481_v7 = vpop.eup %4480  ;;  %v1883_v1 = vadd.f32 1.0, %v4479_v62  ;;  %v7218_v37 = vld [vmem:[#allocation97_spill] sm:$0xff]  ;;  %v7219_v48 = vld [vmem:[#allocation98_spill] sm:$0xff]  ;;  %v7224_v62 = vld [vmem:[#allocation103_spill] sm:$0xff] }
 0x216   :  { %v5701_v29 = vadd.f32 %v1896_v3, %v1894_v8  ;;  %v1884_v25 = vadd.f32 1.0, %v4481_v7  ;;  %v7222_v8 = vld [vmem:[#allocation101_spill] sm:$0xff]  ;;  %v7223_v3 = vld [vmem:[#allocation102_spill] sm:$0xff]  ;;  %v7225_v7 = vld [vmem:[#allocation104_spill] sm:$0xff] }
 0x217   :  { %4482 = vtanh.f32 %v5698_v2  ;;  %v1889_v11 = vmul.f32 0.5, %v1883_v1  ;;  %v7226_v1 = vld [vmem:[#allocation105_spill] sm:$0xff] }
 0x218   :  { %4484 = vtanh.f32 %v5701_v29  ;;  %v1890_v57 = vmul.f32 0.5, %v1884_v25  ;;  %v7227_v25 = vld [vmem:[#allocation106_spill] sm:$0xff] }
 0x221   :  { %v4483_v50 = vpop.eup %4482 }
 0x222   :  { %v4485_v47 = vpop.eup %4484  ;;  %v1901_v41 = vmul.f32 %v4483_v50, %v1889_v11  ;;  %v7228_v50 = vld [vmem:[#allocation107_spill] sm:$0xff]  ;;  %v7229_v11 = vld [vmem:[#allocation108_spill] sm:$0xff] }
 0x223   :  { %v1902_v36 = vmul.f32 %v4485_v47, %v1890_v57  ;;  %v7230_v57 = vld [vmem:[#allocation109_spill] sm:$0xff]  ;;  %v7231_v47 = vld [vmem:[#allocation110_spill] sm:$0xff] }
 0x224   :  { %v5704_v6 = vpack.c.bf16 %v1901_v41, %v1901_v41  ;;  %v7232_v41 = vld [vmem:[#allocation111_spill] sm:$0xff] }
 0x225   :  { %v1912_v16 = vpack.c.bf16 %v1902_v36, %v1902_v36  ;;  %v7233_v36 = vld [vmem:[#allocation112_spill] sm:$0xff] }
 0x227   :  { %1945 = vmatprep.mubr.bf16.mxu0 %v1912_v16  ;;  %1986 = vmatprep.mubr.bf16.mxu1 %v1912_v16 }
 0x228   :  { %1946 = vmatmul.mubr.bf16.vlgmr.msra.gmra.mrb[40].mxu0 %v5704_v6  ;;  %1987 = vmatmul.mubr.bf16.vlgmr.msra.gmra.mrb[40].mxu1 %v5704_v6 }
 0x229   :  { %1996 = vmatpush1.bf16.msra.mxu0 %v7207_v53  ;;  %2037 = vmatpush1.bf16.msra.mxu1 %v7208_v23 }
 0x22a   :  { %2027 = vmatprep.mubr.bf16.mxu0 %v1912_v16  ;;  %2068 = vmatprep.mubr.bf16.mxu1 %v1912_v16  ;;  %v7234_v16 = vld [vmem:[#allocation113_spill] sm:$0xff] }
 0x22b   :  { %1997 = vmatprep.subr.bf16.mxu0 %v7209_v24  ;;  %2038 = vmatprep.subr.bf16.mxu1 %v7210_v19 }
 0x22d   :  { %1998 = vmatpush1.bf16.msra.mxu0 %v7211_v33  ;;  %2039 = vmatpush1.bf16.msra.mxu1 %v7212_v15 }
 0x22e   :  { %1999 = vmatprep.subr.bf16.mxu0 %v7213_v22  ;;  %2040 = vmatprep.subr.bf16.mxu1 %v7214_v18 }
 0x231   :  { %2000 = vmatpush1.bf16.msra.mxu0 %v7215_v60  ;;  %2041 = vmatpush1.bf16.msra.mxu1 %v7216_v40 }
 0x232   :  { %2001 = vmatprep.subr.bf16.mxu0 %v7217_v52  ;;  %2042 = vmatprep.subr.bf16.mxu1 %v7218_v37 }
 0x235   :  { %2002 = vmatpush1.bf16.msra.mxu0 %v7219_v48  ;;  %2043 = vmatpush1.bf16.msra.mxu1 %v7220_v59 }
 0x236   :  { %2003 = vmatprep.subr.bf16.mxu0 %v7221_v56  ;;  %2044 = vmatprep.subr.bf16.mxu1 %v7222_v8 }
 0x239   :  { %2004 = vmatpush1.bf16.msra.mxu0 %v7223_v3  ;;  %2045 = vmatpush1.bf16.msra.mxu1 %v7224_v62  ;;  %v7235_v62 = vld [vmem:[#allocation114_spill] sm:$0xff] }
 0x23a   :  { %2005 = vmatprep.subr.bf16.mxu0 %v7225_v7  ;;  %2046 = vmatprep.subr.bf16.mxu1 %v7226_v1  ;;  %v7236_v7 = vld [vmem:[#allocation115_spill] sm:$0xff]  ;;  %v7237_v1 = vld [vmem:[#allocation116_spill] sm:$0xff] }
 0x23d   :  { %2006 = vmatpush1.bf16.msra.mxu0 %v7227_v25  ;;  %2047 = vmatpush1.bf16.msra.mxu1 %v7228_v50  ;;  %v7238_v25 = vld [vmem:[#allocation117_spill] sm:$0xff]  ;;  %v7239_v50 = vld [vmem:[#allocation118_spill] sm:$0xff] }
 0x23e   :  { %2007 = vmatprep.subr.bf16.mxu0 %v7229_v11  ;;  %2048 = vmatprep.subr.bf16.mxu1 %v7230_v57  ;;  %v7240_v11 = vld [vmem:[#allocation119_spill] sm:$0xff]  ;;  %v7241_v57 = vld [vmem:[#allocation120_spill] sm:$0xff] }
 0x241   :  { %2008 = vmatpush1.bf16.msra.mxu0 %v7231_v47  ;;  %2049 = vmatpush1.bf16.msra.mxu1 %v7232_v41  ;;  %v7242_v47 = vld [vmem:[#allocation121_spill] sm:$0xff]  ;;  %v7243_v41 = vld [vmem:[#allocation122_spill] sm:$0xff] }
 0x242   :  { %2009 = vmatprep.subr.bf16.mxu0 %v7233_v36  ;;  %2050 = vmatprep.subr.bf16.mxu1 %v7234_v16  ;;  %v7244_v36 = vld [vmem:[#allocation123_spill] sm:$0xff]  ;;  %v7245_v16 = vld [vmem:[#allocation124_spill] sm:$0xff] }
 0x245   :  { %2010 = vmatpush1.bf16.msra.mxu0 %v7235_v62  ;;  %2051 = vmatpush1.bf16.msra.mxu1 %v7236_v7  ;;  %v7246_v62 = vld [vmem:[#allocation125_spill] sm:$0xff]  ;;  %v7247_v7 = vld [vmem:[#allocation126_spill] sm:$0xff] }
 0x246   :  { %2011 = vmatprep.subr.bf16.mxu0 %v7237_v1  ;;  %2052 = vmatprep.subr.bf16.mxu1 %v7238_v25  ;;  %v7248_v1 = vld [vmem:[#allocation127_spill] sm:$0xff]  ;;  %v7249_v25 = vld [vmem:[#allocation128_spill] sm:$0xff] }
 0x249   :  { %2012 = vmatpush1.bf16.msra.mxu0 %v7239_v50  ;;  %2053 = vmatpush1.bf16.msra.mxu1 %v7240_v11  ;;  %v7250_v50 = vld [vmem:[#allocation129_spill] sm:$0xff]  ;;  %v7251_v11 = vld [vmem:[#allocation130_spill] sm:$0xff] }
 0x24a   :  { %2013 = vmatprep.subr.bf16.mxu0 %v7241_v57  ;;  %2054 = vmatprep.subr.bf16.mxu1 %v7242_v47  ;;  %v7252_v57 = vld [vmem:[#allocation131_spill] sm:$0xff]  ;;  %v7253_v47 = vld [vmem:[#allocation132_spill] sm:$0xff] }
 0x24d   :  { %2014 = vmatpush1.bf16.msra.mxu0 %v7243_v41  ;;  %2055 = vmatpush1.bf16.msra.mxu1 %v7244_v36  ;;  %v7254_v41 = vld [vmem:[#allocation133_spill] sm:$0xff] }
 0x24e   :  { %2015 = vmatprep.subr.bf16.mxu0 %v7245_v16  ;;  %2056 = vmatprep.subr.bf16.mxu1 %v7246_v62 }
 0x251   :  { %2016 = vmatpush1.bf16.msra.mxu0 %v7247_v7  ;;  %2057 = vmatpush1.bf16.msra.mxu1 %v7248_v1  ;;  %v7255_v7 = vld [vmem:[#allocation137_spill] sm:$0xff] }
 0x252   :  { %2017 = vmatprep.subr.bf16.mxu0 %v7249_v25  ;;  %2058 = vmatprep.subr.bf16.mxu1 %v7250_v50 }
 0x255   :  { %2018 = vmatpush1.bf16.msra.mxu0 %v7251_v11  ;;  %2059 = vmatpush1.bf16.msra.mxu1 %v7252_v57 }
 0x256   :  { %2019 = vmatprep.subr.bf16.mxu0 %v7253_v47  ;;  %2060 = vmatprep.subr.bf16.mxu1 %v7254_v41 }
 0x259   :  { %2020 = vmatpush1.bf16.msra.mxu0 %v5340_v10  ;;  %2061 = vmatpush1.bf16.msra.mxu1 %v5344_v13 }
 0x25a   :  { %2021 = vmatprep.subr.bf16.mxu0 %v5346_v14  ;;  %2062 = vmatprep.subr.bf16.mxu1 %v7255_v7 }
 0x25d   :  { %2022 = vmatpush1.bf16.msra.mxu0 %v5352_v34  ;;  %2063 = vmatpush1.bf16.msra.mxu1 %v5356_v44 }
 0x25e   :  { %2023 = vmatprep.subr.bf16.mxu0 %v5358_v43  ;;  %2064 = vmatprep.subr.bf16.mxu1 %v5361_v0 }
 0x261   :  { %2024 = vmatpush1.bf16.msra.mxu0 %v5364_v5  ;;  %2065 = vmatpush1.bf16.msra.mxu1 %v5368_v63 }
 0x262   :  { %2025 = vmatprep.subr.bf16.mxu0 %v5370_v9  ;;  %2066 = vmatprep.subr.bf16.mxu1 %v5373_v30 }
 0x265   :  { %2026 = vmatpush1.bf16.msra.mxu0 %v5376_v17  ;;  %2067 = vmatpush1.bf16.msra.mxu1 %v5380_v4 }
 0x266   :  { %2131 = vmatprep.subr.bf16.mxu0 %v4979_v20  ;;  %2172 = vmatprep.subr.bf16.mxu1 %v4982_v21  ;;  %v7307_v20 = vld [vmem:[#allocation179_spill] sm:$0xff] }
 0x268   :  { %2028 = vmatmul.mubr.bf16.vlgmr.msra.gmra.mrb[44].mxu0 %v5704_v6  ;;  %2069 = vmatmul.mubr.bf16.vlgmr.msra.gmra.mrb[44].mxu1 %v5704_v6  ;;  %v7256_v6 = vld [vmem:[#allocation40_spill] sm:$0xff] }
 0x269   :  { %2132 = vmatpush1.bf16.msra.mxu0 %v4985_v26  ;;  %2173 = vmatpush1.bf16.msra.mxu1 %v4988_v27 }
 0x26a   :  { %2133 = vmatprep.subr.bf16.mxu0 %v4990_v28  ;;  %2174 = vmatprep.subr.bf16.mxu1 %v4993_v32  ;;  %v7305_v32 = vld [vmem:[#allocation153_spill] sm:$0xff] }
 0x26d   :  { %2134 = vmatpush1.bf16.msra.mxu0 %v4998_v35  ;;  %2175 = vmatpush1.bf16.msra.mxu1 %v5002_v38  ;;  %v7304_v35 = vld [vmem:[#allocation152_spill] sm:$0xff] }
 0x26e   :  { %2135 = vmatprep.subr.bf16.mxu0 %v5004_v39  ;;  %2176 = vmatprep.subr.bf16.mxu1 %v5007_v42  ;;  %v7302_v42 = vld [vmem:[#allocation150_spill] sm:$0xff]  ;;  %v7303_v39 = vld [vmem:[#allocation151_spill] sm:$0xff] }
 0x271   :  { %2136 = vmatpush1.bf16.msra.mxu0 %v5012_v12  ;;  %2177 = vmatpush1.bf16.msra.mxu1 %v5016_v45  ;;  %v7257_v12 = vld [vmem:[#allocation41_spill] sm:$0xff]  ;;  %v7258_v45 = vld [vmem:[#allocation42_spill] sm:$0xff] }
 0x272   :  { %2137 = vmatprep.subr.bf16.mxu0 %v5018_v46  ;;  %2178 = vmatprep.subr.bf16.mxu1 %v5021_v49  ;;  %v7259_v46 = vld [vmem:[#allocation43_spill] sm:$0xff]  ;;  %v7260_v49 = vld [vmem:[#allocation44_spill] sm:$0xff] }
 0x275   :  { %2138 = vmatpush1.bf16.msra.mxu0 %v5025_v51  ;;  %2179 = vmatpush1.bf16.msra.mxu1 %v5030_v54  ;;  %v7261_v51 = vld [vmem:[#allocation45_spill] sm:$0xff]  ;;  %v7262_v54 = vld [vmem:[#allocation46_spill] sm:$0xff] }
 0x276   :  { %2139 = vmatprep.subr.bf16.mxu0 %v5032_v55  ;;  %2180 = vmatprep.subr.bf16.mxu1 %v5035_v58  ;;  %v7263_v55 = vld [vmem:[#allocation47_spill] sm:$0xff]  ;;  %v7264_v58 = vld [vmem:[#allocation48_spill] sm:$0xff] }
 0x279   :  { %2140 = vmatpush1.bf16.msra.mxu0 %v5040_v31  ;;  %2181 = vmatpush1.bf16.msra.mxu1 %v5044_v61  ;;  %v7265_v31 = vld [vmem:[#allocation49_spill] sm:$0xff]  ;;  %v7266_v61 = vld [vmem:[#allocation50_spill] sm:$0xff] }
 0x27a   :  { %2141 = vmatprep.subr.bf16.mxu0 %v7256_v6  ;;  %2182 = vmatprep.subr.bf16.mxu1 %v7257_v12  ;;  %v7267_v6 = vld [vmem:[#allocation51_spill] sm:$0xff]  ;;  %v7268_v12 = vld [vmem:[#allocation52_spill] sm:$0xff] }
 0x27d   :  { %2142 = vmatpush1.bf16.msra.mxu0 %v7258_v45  ;;  %2183 = vmatpush1.bf16.msra.mxu1 %v7259_v46  ;;  %v7269_v45 = vld [vmem:[#allocation53_spill] sm:$0xff]  ;;  %v7270_v46 = vld [vmem:[#allocation54_spill] sm:$0xff] }
 0x27e   :  { %2143 = vmatprep.subr.bf16.mxu0 %v7260_v49  ;;  %2184 = vmatprep.subr.bf16.mxu1 %v7261_v51  ;;  %v7271_v49 = vld [vmem:[#allocation55_spill] sm:$0xff]  ;;  %v7272_v51 = vld [vmem:[#allocation56_spill] sm:$0xff] }
 0x281   :  { %2144 = vmatpush1.bf16.msra.mxu0 %v7262_v54  ;;  %2185 = vmatpush1.bf16.msra.mxu1 %v7263_v55  ;;  %v7273_v54 = vld [vmem:[#allocation57_spill] sm:$0xff]  ;;  %v7274_v55 = vld [vmem:[#allocation58_spill] sm:$0xff] }
 0x282   :  { %2145 = vmatprep.subr.bf16.mxu0 %v7264_v58  ;;  %2186 = vmatprep.subr.bf16.mxu1 %v7265_v31  ;;  %v7275_v58 = vld [vmem:[#allocation59_spill] sm:$0xff]  ;;  %v7276_v31 = vld [vmem:[#allocation60_spill] sm:$0xff] }
 0x285   :  { %2146 = vmatpush1.bf16.msra.mxu0 %v7266_v61  ;;  %2187 = vmatpush1.bf16.msra.mxu1 %v7267_v6  ;;  %v7277_v61 = vld [vmem:[#allocation61_spill] sm:$0xff]  ;;  %v7278_v6 = vld [vmem:[#allocation62_spill] sm:$0xff] }
 0x286   :  { %2147 = vmatprep.subr.bf16.mxu0 %v7268_v12  ;;  %2188 = vmatprep.subr.bf16.mxu1 %v7269_v45  ;;  %v7279_v12 = vld [vmem:[#allocation63_spill] sm:$0xff]  ;;  %v7280_v45 = vld [vmem:[#allocation64_spill] sm:$0xff] }
 0x289   :  { %2148 = vmatpush1.bf16.msra.mxu0 %v7270_v46  ;;  %2189 = vmatpush1.bf16.msra.mxu1 %v7271_v49  ;;  %v7281_v46 = vld [vmem:[#allocation65_spill] sm:$0xff]  ;;  %v7282_v49 = vld [vmem:[#allocation66_spill] sm:$0xff] }
 0x28a   :  { %2149 = vmatprep.subr.bf16.mxu0 %v7272_v51  ;;  %2190 = vmatprep.subr.bf16.mxu1 %v7273_v54  ;;  %v7283_v51 = vld [vmem:[#allocation67_spill] sm:$0xff]  ;;  %v7284_v54 = vld [vmem:[#allocation68_spill] sm:$0xff] }
 0x28d   :  { %2150 = vmatpush1.bf16.msra.mxu0 %v7274_v55  ;;  %2191 = vmatpush1.bf16.msra.mxu1 %v7275_v58  ;;  %v7285_v55 = vld [vmem:[#allocation69_spill] sm:$0xff]  ;;  %v7286_v58 = vld [vmem:[#allocation70_spill] sm:$0xff] }
 0x28e   :  { %2151 = vmatprep.subr.bf16.mxu0 %v7276_v31  ;;  %2192 = vmatprep.subr.bf16.mxu1 %v7277_v61  ;;  %v7287_v31 = vld [vmem:[#allocation71_spill] sm:$0xff]  ;;  %v7288_v61 = vld [vmem:[#allocation72_spill] sm:$0xff] }
 0x291   :  { %2152 = vmatpush1.bf16.msra.mxu0 %v7278_v6  ;;  %2193 = vmatpush1.bf16.msra.mxu1 %v7279_v12  ;;  %v7289_v6 = vld [vmem:[#allocation73_spill] sm:$0xff]  ;;  %v7290_v12 = vld [vmem:[#allocation74_spill] sm:$0xff] }
 0x292   :  { %2153 = vmatprep.subr.bf16.mxu0 %v7280_v45  ;;  %2194 = vmatprep.subr.bf16.mxu1 %v7281_v46  ;;  %v7291_v45 = vld [vmem:[#allocation75_spill] sm:$0xff]  ;;  %v7292_v46 = vld [vmem:[#allocation76_spill] sm:$0xff] }
 0x295   :  { %2154 = vmatpush1.bf16.msra.mxu0 %v7282_v49  ;;  %2195 = vmatpush1.bf16.msra.mxu1 %v7283_v51  ;;  %v7293_v49 = vld [vmem:[#allocation77_spill] sm:$0xff]  ;;  %v7294_v51 = vld [vmem:[#allocation78_spill] sm:$0xff] }
 0x296   :  { %2155 = vmatprep.subr.bf16.mxu0 %v7284_v54  ;;  %2196 = vmatprep.subr.bf16.mxu1 %v7285_v55  ;;  %v7295_v54 = vld [vmem:[#allocation79_spill] sm:$0xff]  ;;  %v7296_v55 = vld [vmem:[#allocation80_spill] sm:$0xff] }
 0x299   :  { %2156 = vmatpush1.bf16.msra.mxu0 %v7286_v58  ;;  %2197 = vmatpush1.bf16.msra.mxu1 %v7287_v31  ;;  %v7297_v58 = vld [vmem:[#allocation81_spill] sm:$0xff]  ;;  %v7298_v31 = vld [vmem:[#allocation82_spill] sm:$0xff] }
 0x29a   :  { %2157 = vmatprep.subr.bf16.mxu0 %v7288_v61  ;;  %2198 = vmatprep.subr.bf16.mxu1 %v7289_v6  ;;  %v7299_v61 = vld [vmem:[#allocation83_spill] sm:$0xff]  ;;  %v7300_v6 = vld [vmem:[#allocation84_spill] sm:$0xff] }
 0x29d   :  { %2158 = vmatpush1.bf16.msra.mxu0 %v7290_v12  ;;  %2199 = vmatpush1.bf16.msra.mxu1 %v7291_v45  ;;  %v7301_v12 = vld [vmem:[#allocation85_spill] sm:$0xff] }
 0x29e   :  { %2159 = vmatprep.subr.bf16.mxu0 %v7292_v46  ;;  %2200 = vmatprep.subr.bf16.mxu1 %v7293_v49 }
 0x2a1   :  { %2160 = vmatpush1.bf16.msra.mxu0 %v7294_v51  ;;  %2201 = vmatpush1.bf16.msra.mxu1 %v7295_v54 }
 0x2a2   :  { %2161 = vmatprep.subr.bf16.mxu0 %v7296_v55  ;;  %2202 = vmatprep.subr.bf16.mxu1 %v7297_v58 }
 0x2a5   :  { %2162 = vmatpush1.bf16.msra.mxu0 %v7298_v31  ;;  %2203 = vmatpush1.bf16.msra.mxu1 %v7299_v61 }
 0x2a6   :  { %2213 = vmatprep.subr.bf16.mxu0 %v7300_v6  ;;  %2254 = vmatprep.subr.bf16.mxu1 %v7301_v12 }
 0x2fb   :  { %v1947_v45 = vpop.f32.mrb[40].mxu0  ;;  %v1988_v46 = vpop.f32.mrb[40].mxu1 }
 0x2fc   :  { %v2077_v49 = vadd.f32 %v1947_v45, %v7302_v42  ;;  %v2079_v51 = vadd.f32 %v1988_v46, %v7303_v39  ;;  %v1949_v38 = vpop.f32.mrb[41].mxu0  ;;  %v1990_v54 = vpop.f32.mrb[41].mxu1  ;;  %v7306_v45 = vld [vmem:[#allocation178_spill] sm:$0xff] }
 0x2fd   :  { %v2078_v55 = vadd.f32 %v1949_v38, %v7304_v35  ;;  %v2080_v58 = vadd.f32 %v1990_v54, %v7305_v32  ;;  %v1951_v28 = vpop.f32.mrb[42].mxu0  ;;  %v1992_v31 = vpop.f32.mrb[42].mxu1 }
 0x2fe   :  { %v1952_v27 = vpop.f32.mrb[43].mxu0  ;;  %v1993_v61 = vpop.f32.mrb[43].mxu1  ;;  %v2087_v26 = vmul.f32 0.5, %v2079_v51  ;;  %v2085_v21 = vmul.f32 0.5, %v2077_v49  ;;  %v7308_v28 = vld [vmem:[#allocation180_spill] sm:$0xff] }
 0x2ff   :  { %v2088_v6 = vmul.f32 0.5, %v2080_v58  ;;  %v2086_v12 = vmul.f32 0.5, %v2078_v55  ;;  %v7309_v27 = vld [vmem:[#allocation181_spill] sm:$0xff] }
 0x300   :  { %4486 = vtanh.f32 %v2087_v26 }
 0x301   :  { %4488 = vtanh.f32 %v2088_v6 }
 0x302   :  { %4490 = vtanh.f32 %v2085_v21 }
 0x303   :  { %4492 = vtanh.f32 %v2086_v12 }
 0x30a   :  { %v4487_v49 = vpop.eup %4486 }
 0x30b   :  { %v4489_v21 = vpop.eup %4488  ;;  %v2099_v6 = vadd.f32 1.0, %v4487_v49 }
 0x30c   :  { %v4491_v12 = vpop.eup %4490 }
 0x30d   :  { %v4493_v61 = vpop.eup %4492  ;;  %v2105_v17 = vmul.f32 0.5, %v2099_v6 }
 0x30e   :  { %v2098_v4 = vadd.f32 1.0, %v4493_v61 }
 0x33b   :  { %v2029_v42 = vpop.f32.mrb[44].mxu0  ;;  %v2070_v39 = vpop.f32.mrb[44].mxu1 }
 0x33c   :  { %v2081_v46 = vadd.f32 %v2029_v42, %v7306_v45  ;;  %v2083_v35 = vadd.f32 %v2070_v39, %v7307_v20  ;;  %v2031_v38 = vpop.f32.mrb[45].mxu0  ;;  %v2072_v32 = vpop.f32.mrb[45].mxu1  ;;  %v2100_v45 = vadd.f32 1.0, %v4489_v21  ;;  %v2097_v39 = vadd.f32 1.0, %v4491_v12 }
 0x33d   :  { %v2082_v54 = vadd.f32 %v2031_v38, %v7308_v28  ;;  %v2084_v31 = vadd.f32 %v2072_v32, %v7309_v27  ;;  %v2033_v51 = vpop.f32.mrb[46].mxu0  ;;  %v2074_v58 = vpop.f32.mrb[46].mxu1  ;;  %v2104_v27 = vmul.f32 0.5, %v2098_v4 }
 0x33e   :  { %4494 = vtanh.f32 %v2083_v35  ;;  %v2034_v26 = vpop.f32.mrb[47].mxu0  ;;  %v2075_v55 = vpop.f32.mrb[47].mxu1  ;;  %v2089_v42 = vmul.f32 0.5, %v2081_v46  ;;  %v2106_v38 = vmul.f32 0.5, %v2100_v45  ;;  %v2103_v32 = vmul.f32 0.5, %v2097_v39  ;;  %v7311_v39 = vld [vmem:[#allocation104_spill] sm:$0xff] }
 0x33f   :  { %4496 = vtanh.f32 %v2084_v31  ;;  %v2090_v20 = vmul.f32 0.5, %v2082_v54  ;;  %v2111_v51 = vmul.f32 %v2105_v17, %v5698_v2 }
 0x340   :  { %4498 = vtanh.f32 %v2089_v42  ;;  %v2112_v31 = vmul.f32 %v2106_v38, %v5701_v29  ;;  %v7312_v38 = vld [vmem:[#allocation105_spill] sm:$0xff] }
 0x341   :  { %4500 = vtanh.f32 %v2090_v20  ;;  %v7310_v20 = vld [vmem:[#allocation103_spill] sm:$0xff] }
 0x348   :  { %v4495_v28 = vpop.eup %4494 }
 0x349   :  { %v4497_v35 = vpop.eup %4496  ;;  %v2113_v58 = vmul.f32 %v4495_v28, %v2103_v32  ;;  %v7313_v32 = vld [vmem:[#allocation106_spill] sm:$0xff]  ;;  %v7314_v28 = vld [vmem:[#allocation107_spill] sm:$0xff] }
 0x34a   :  { %v2114_v26 = vmul.f32 %v4497_v35, %v2104_v27  ;;  %v4499_v54 = vpop.eup %4498  ;;  %v7315_v27 = vld [vmem:[#allocation108_spill] sm:$0xff]  ;;  %v7316_v35 = vld [vmem:[#allocation109_spill] sm:$0xff] }
 0x34b   :  { %v5848_v49 = vadd.f32 %v2113_v58, %v2111_v51  ;;  %v4501_v55 = vpop.eup %4500  ;;  %v2101_v21 = vadd.f32 1.0, %v4499_v54  ;;  %v7317_v51 = vld [vmem:[#allocation110_spill] sm:$0xff]  ;;  %v7318_v58 = vld [vmem:[#allocation111_spill] sm:$0xff] }
 0x34c   :  { %v5850_v46 = vadd.f32 %v2114_v26, %v2112_v31  ;;  %v2102_v12 = vadd.f32 1.0, %v4501_v55  ;;  %v7319_v31 = vld [vmem:[#allocation112_spill] sm:$0xff]  ;;  %v7320_v26 = vld [vmem:[#allocation113_spill] sm:$0xff]  ;;  %v7321_v54 = vld [vmem:[#allocation114_spill] sm:$0xff] }
 0x34d   :  { %4502 = vtanh.f32 %v5848_v49  ;;  %v2107_v4 = vmul.f32 0.5, %v2101_v21  ;;  %v7322_v55 = vld [vmem:[#allocation115_spill] sm:$0xff]  ;;  %v7323_v21 = vld [vmem:[#allocation116_spill] sm:$0xff] }
 0x34e   :  { %4504 = vtanh.f32 %v5850_v46  ;;  %v2108_v6 = vmul.f32 0.5, %v2102_v12  ;;  %v7324_v12 = vld [vmem:[#allocation117_spill] sm:$0xff] }
 0x357   :  { %v4503_v61 = vpop.eup %4502 }
 0x358   :  { %v4505_v17 = vpop.eup %4504  ;;  %v2119_v2 = vmul.f32 %v4503_v61, %v2107_v4  ;;  %v7325_v4 = vld [vmem:[#allocation118_spill] sm:$0xff]  ;;  %v7326_v61 = vld [vmem:[#allocation119_spill] sm:$0xff] }
 0x359   :  { %v2120_v42 = vmul.f32 %v4505_v17, %v2108_v6  ;;  %v7327_v6 = vld [vmem:[#allocation120_spill] sm:$0xff]  ;;  %v7328_v17 = vld [vmem:[#allocation121_spill] sm:$0xff] }
 0x35a   :  { %v5854_v45 = vpack.c.bf16 %v2119_v2, %v2119_v2  ;;  %v7329_v2 = vld [vmem:[#allocation122_spill] sm:$0xff] }
 0x35b   :  { %v2130_v29 = vpack.c.bf16 %v2120_v42, %v2120_v42  ;;  %v7330_v42 = vld [vmem:[#allocation126_spill] sm:$0xff] }
 0x35d   :  { %2163 = vmatprep.mubr.bf16.mxu0 %v2130_v29  ;;  %2204 = vmatprep.mubr.bf16.mxu1 %v2130_v29 }
 0x35e   :  { %2164 = vmatmul.mubr.bf16.vlgmr.msra.gmra.mrb[48].mxu0 %v5854_v45  ;;  %2205 = vmatmul.mubr.bf16.vlgmr.msra.gmra.mrb[48].mxu1 %v5854_v45 }
 0x35f   :  { %2214 = vmatpush1.bf16.msra.mxu0 %v7207_v53  ;;  %2255 = vmatpush1.bf16.msra.mxu1 %v7208_v23 }
 0x360   :  { %2245 = vmatprep.mubr.bf16.mxu0 %v2130_v29  ;;  %2286 = vmatprep.mubr.bf16.mxu1 %v2130_v29  ;;  %v7331_v29 = vld [vmem:[#allocation146_spill] sm:$0xff] }
 0x361   :  { %2215 = vmatprep.subr.bf16.mxu0 %v7209_v24  ;;  %2256 = vmatprep.subr.bf16.mxu1 %v7210_v19 }
 0x363   :  { %2216 = vmatpush1.bf16.msra.mxu0 %v7211_v33  ;;  %2257 = vmatpush1.bf16.msra.mxu1 %v7212_v15 }
 0x364   :  { %2217 = vmatprep.subr.bf16.mxu0 %v7213_v22  ;;  %2258 = vmatprep.subr.bf16.mxu1 %v7214_v18 }
 0x367   :  { %2218 = vmatpush1.bf16.msra.mxu0 %v7215_v60  ;;  %2259 = vmatpush1.bf16.msra.mxu1 %v7216_v40 }
 0x368   :  { %2219 = vmatprep.subr.bf16.mxu0 %v7217_v52  ;;  %2260 = vmatprep.subr.bf16.mxu1 %v7218_v37 }
 0x36b   :  { %2220 = vmatpush1.bf16.msra.mxu0 %v7219_v48  ;;  %2261 = vmatpush1.bf16.msra.mxu1 %v7220_v59 }
 0x36c   :  { %2221 = vmatprep.subr.bf16.mxu0 %v7221_v56  ;;  %2262 = vmatprep.subr.bf16.mxu1 %v7222_v8 }
 0x36f   :  { %2222 = vmatpush1.bf16.msra.mxu0 %v7223_v3  ;;  %2263 = vmatpush1.bf16.msra.mxu1 %v7310_v20 }
 0x370   :  { %2223 = vmatprep.subr.bf16.mxu0 %v7311_v39  ;;  %2264 = vmatprep.subr.bf16.mxu1 %v7312_v38 }
 0x373   :  { %2224 = vmatpush1.bf16.msra.mxu0 %v7313_v32  ;;  %2265 = vmatpush1.bf16.msra.mxu1 %v7314_v28 }
 0x374   :  { %2225 = vmatprep.subr.bf16.mxu0 %v7315_v27  ;;  %2266 = vmatprep.subr.bf16.mxu1 %v7316_v35 }
 0x377   :  { %2226 = vmatpush1.bf16.msra.mxu0 %v7317_v51  ;;  %2267 = vmatpush1.bf16.msra.mxu1 %v7318_v58 }
 0x378   :  { %2227 = vmatprep.subr.bf16.mxu0 %v7319_v31  ;;  %2268 = vmatprep.subr.bf16.mxu1 %v7320_v26 }
 0x37b   :  { %2228 = vmatpush1.bf16.msra.mxu0 %v7321_v54  ;;  %2269 = vmatpush1.bf16.msra.mxu1 %v7322_v55 }
 0x37c   :  { %2229 = vmatprep.subr.bf16.mxu0 %v7323_v21  ;;  %2270 = vmatprep.subr.bf16.mxu1 %v7324_v12 }
 0x37f   :  { %2230 = vmatpush1.bf16.msra.mxu0 %v7325_v4  ;;  %2271 = vmatpush1.bf16.msra.mxu1 %v7326_v61 }
 0x380   :  { %2231 = vmatprep.subr.bf16.mxu0 %v7327_v6  ;;  %2272 = vmatprep.subr.bf16.mxu1 %v7328_v17 }
 0x383   :  { %2232 = vmatpush1.bf16.msra.mxu0 %v7329_v2  ;;  %2273 = vmatpush1.bf16.msra.mxu1 %v7244_v36 }
 0x384   :  { %2233 = vmatprep.subr.bf16.mxu0 %v7245_v16  ;;  %2274 = vmatprep.subr.bf16.mxu1 %v7246_v62 }
 0x387   :  { %2234 = vmatpush1.bf16.msra.mxu0 %v7330_v42  ;;  %2275 = vmatpush1.bf16.msra.mxu1 %v7248_v1  ;;  %v7404_v1 = vld [vmem:[#allocation183_spill] sm:$0xff] }
 0x388   :  { %2235 = vmatprep.subr.bf16.mxu0 %v7249_v25  ;;  %2276 = vmatprep.subr.bf16.mxu1 %v7250_v50 }
 0x38b   :  { %2236 = vmatpush1.bf16.msra.mxu0 %v7251_v11  ;;  %2277 = vmatpush1.bf16.msra.mxu1 %v7252_v57 }
 0x38c   :  { %2237 = vmatprep.subr.bf16.mxu0 %v7253_v47  ;;  %2278 = vmatprep.subr.bf16.mxu1 %v7254_v41  ;;  %v7401_v41 = vld [vmem:[#allocation156_spill] sm:$0xff]  ;;  %v7402_v47 = vld [vmem:[#allocation157_spill] sm:$0xff] }
 0x38f   :  { %2238 = vmatpush1.bf16.msra.mxu0 %v5340_v10  ;;  %2279 = vmatpush1.bf16.msra.mxu1 %v5344_v13  ;;  %v7400_v13 = vld [vmem:[#allocation155_spill] sm:$0xff] }
 0x390   :  { %2239 = vmatprep.subr.bf16.mxu0 %v5346_v14  ;;  %2280 = vmatprep.subr.bf16.mxu1 %v7255_v7  ;;  %v7332_v14 = vld [vmem:[#allocation147_spill] sm:$0xff]  ;;  %v7333_v7 = vld [vmem:[#allocation20_spill] sm:$0xff] }
 0x393   :  { %2240 = vmatpush1.bf16.msra.mxu0 %v5352_v34  ;;  %2281 = vmatpush1.bf16.msra.mxu1 %v5356_v44  ;;  %v7334_v34 = vld [vmem:[#allocation21_spill] sm:$0xff]  ;;  %v7399_v44 = vld [vmem:[#allocation154_spill] sm:$0xff] }
 0x394   :  { %2241 = vmatprep.subr.bf16.mxu0 %v5358_v43  ;;  %2282 = vmatprep.subr.bf16.mxu1 %v5361_v0  ;;  %v7335_v0 = vld [vmem:[#allocation22_spill] sm:$0xff]  ;;  %v7344_v43 = vld [vmem:[#allocation31_spill] sm:$0xff] }
 0x397   :  { %2242 = vmatpush1.bf16.msra.mxu0 %v5364_v5  ;;  %2283 = vmatpush1.bf16.msra.mxu1 %v5368_v63  ;;  %v7336_v5 = vld [vmem:[#allocation23_spill] sm:$0xff]  ;;  %v7337_v63 = vld [vmem:[#allocation24_spill] sm:$0xff] }
 0x398   :  { %2243 = vmatprep.subr.bf16.mxu0 %v5370_v9  ;;  %2284 = vmatprep.subr.bf16.mxu1 %v5373_v30  ;;  %v7338_v9 = vld [vmem:[#allocation25_spill] sm:$0xff]  ;;  %v7339_v30 = vld [vmem:[#allocation26_spill] sm:$0xff] }
 0x39b   :  { %2244 = vmatpush1.bf16.msra.mxu0 %v7331_v29  ;;  %2285 = vmatpush1.bf16.msra.mxu1 %v7332_v14  ;;  %v7340_v29 = vld [vmem:[#allocation27_spill] sm:$0xff]  ;;  %v7341_v14 = vld [vmem:[#allocation28_spill] sm:$0xff] }
 0x39c   :  { %2349 = vmatprep.subr.bf16.mxu0 %v7333_v7  ;;  %2390 = vmatprep.subr.bf16.mxu1 %v7334_v34  ;;  %v7342_v7 = vld [vmem:[#allocation29_spill] sm:$0xff]  ;;  %v7343_v34 = vld [vmem:[#allocation30_spill] sm:$0xff] }
 0x39e   :  { %2246 = vmatmul.mubr.bf16.vlgmr.msra.gmra.mrb[52].mxu0 %v5854_v45  ;;  %2287 = vmatmul.mubr.bf16.vlgmr.msra.gmra.mrb[52].mxu1 %v5854_v45  ;;  %v7345_v45 = vld [vmem:[#allocation32_spill] sm:$0xff] }
 0x39f   :  { %2350 = vmatpush1.bf16.msra.mxu0 %v7335_v0  ;;  %2391 = vmatpush1.bf16.msra.mxu1 %v7336_v5  ;;  %v7346_v0 = vld [vmem:[#allocation33_spill] sm:$0xff]  ;;  %v7347_v5 = vld [vmem:[#allocation34_spill] sm:$0xff] }
 0x3a0   :  { %2351 = vmatprep.subr.bf16.mxu0 %v7337_v63  ;;  %2392 = vmatprep.subr.bf16.mxu1 %v7338_v9  ;;  %v7348_v63 = vld [vmem:[#allocation35_spill] sm:$0xff]  ;;  %v7349_v9 = vld [vmem:[#allocation36_spill] sm:$0xff] }
 0x3a3   :  { %2352 = vmatpush1.bf16.msra.mxu0 %v7339_v30  ;;  %2393 = vmatpush1.bf16.msra.mxu1 %v7340_v29  ;;  %v7350_v30 = vld [vmem:[#allocation37_spill] sm:$0xff]  ;;  %v7351_v29 = vld [vmem:[#allocation38_spill] sm:$0xff] }
 0x3a4   :  { %2353 = vmatprep.subr.bf16.mxu0 %v7341_v14  ;;  %2394 = vmatprep.subr.bf16.mxu1 %v7342_v7  ;;  %v7352_v14 = vld [vmem:[#allocation39_spill] sm:$0xff]  ;;  %v7353_v7 = vld [vmem:[#allocation40_spill] sm:$0xff] }
 0x3a7   :  { %2354 = vmatpush1.bf16.msra.mxu0 %v7343_v34  ;;  %2395 = vmatpush1.bf16.msra.mxu1 %v7344_v43  ;;  %v7354_v34 = vld [vmem:[#allocation41_spill] sm:$0xff]  ;;  %v7355_v43 = vld [vmem:[#allocation42_spill] sm:$0xff] }
 0x3a8   :  { %2355 = vmatprep.subr.bf16.mxu0 %v7345_v45  ;;  %2396 = vmatprep.subr.bf16.mxu1 %v7346_v0  ;;  %v7356_v45 = vld [vmem:[#allocation43_spill] sm:$0xff]  ;;  %v7357_v0 = vld [vmem:[#allocation44_spill] sm:$0xff] }
 0x3ab   :  { %2356 = vmatpush1.bf16.msra.mxu0 %v7347_v5  ;;  %2397 = vmatpush1.bf16.msra.mxu1 %v7348_v63  ;;  %v7358_v5 = vld [vmem:[#allocation45_spill] sm:$0xff]  ;;  %v7359_v63 = vld [vmem:[#allocation46_spill] sm:$0xff] }
 0x3ac   :  { %2357 = vmatprep.subr.bf16.mxu0 %v7349_v9  ;;  %2398 = vmatprep.subr.bf16.mxu1 %v7350_v30  ;;  %v7360_v9 = vld [vmem:[#allocation47_spill] sm:$0xff]  ;;  %v7361_v30 = vld [vmem:[#allocation48_spill] sm:$0xff] }
 0x3af   :  { %2358 = vmatpush1.bf16.msra.mxu0 %v7351_v29  ;;  %2399 = vmatpush1.bf16.msra.mxu1 %v7352_v14  ;;  %v7362_v29 = vld [vmem:[#allocation49_spill] sm:$0xff]  ;;  %v7363_v14 = vld [vmem:[#allocation50_spill] sm:$0xff] }
 0x3b0   :  { %2359 = vmatprep.subr.bf16.mxu0 %v7353_v7  ;;  %2400 = vmatprep.subr.bf16.mxu1 %v7354_v34  ;;  %v7364_v7 = vld [vmem:[#allocation51_spill] sm:$0xff]  ;;  %v7365_v34 = vld [vmem:[#allocation52_spill] sm:$0xff] }
 0x3b3   :  { %2360 = vmatpush1.bf16.msra.mxu0 %v7355_v43  ;;  %2401 = vmatpush1.bf16.msra.mxu1 %v7356_v45  ;;  %v7366_v43 = vld [vmem:[#allocation53_spill] sm:$0xff]  ;;  %v7367_v45 = vld [vmem:[#allocation54_spill] sm:$0xff] }
 0x3b4   :  { %2361 = vmatprep.subr.bf16.mxu0 %v7357_v0  ;;  %2402 = vmatprep.subr.bf16.mxu1 %v7358_v5  ;;  %v7368_v0 = vld [vmem:[#allocation55_spill] sm:$0xff]  ;;  %v7369_v5 = vld [vmem:[#allocation56_spill] sm:$0xff] }
 0x3b7   :  { %2362 = vmatpush1.bf16.msra.mxu0 %v7359_v63  ;;  %2403 = vmatpush1.bf16.msra.mxu1 %v7360_v9  ;;  %v7370_v63 = vld [vmem:[#allocation57_spill] sm:$0xff]  ;;  %v7371_v9 = vld [vmem:[#allocation58_spill] sm:$0xff] }
 0x3b8   :  { %2363 = vmatprep.subr.bf16.mxu0 %v7361_v30  ;;  %2404 = vmatprep.subr.bf16.mxu1 %v7362_v29  ;;  %v7372_v30 = vld [vmem:[#allocation59_spill] sm:$0xff]  ;;  %v7373_v29 = vld [vmem:[#allocation60_spill] sm:$0xff] }
 0x3bb   :  { %2364 = vmatpush1.bf16.msra.mxu0 %v7363_v14  ;;  %2405 = vmatpush1.bf16.msra.mxu1 %v7364_v7  ;;  %v7374_v14 = vld [vmem:[#allocation61_spill] sm:$0xff]  ;;  %v7375_v7 = vld [vmem:[#allocation62_spill] sm:$0xff] }
 0x3bc   :  { %2365 = vmatprep.subr.bf16.mxu0 %v7365_v34  ;;  %2406 = vmatprep.subr.bf16.mxu1 %v7366_v43  ;;  %v7376_v34 = vld [vmem:[#allocation63_spill] sm:$0xff]  ;;  %v7377_v43 = vld [vmem:[#allocation64_spill] sm:$0xff] }
 0x3bf   :  { %2366 = vmatpush1.bf16.msra.mxu0 %v7367_v45  ;;  %2407 = vmatpush1.bf16.msra.mxu1 %v7368_v0  ;;  %v7378_v45 = vld [vmem:[#allocation65_spill] sm:$0xff]  ;;  %v7379_v0 = vld [vmem:[#allocation66_spill] sm:$0xff] }
 0x3c0   :  { %2367 = vmatprep.subr.bf16.mxu0 %v7369_v5  ;;  %2408 = vmatprep.subr.bf16.mxu1 %v7370_v63  ;;  %v7380_v5 = vld [vmem:[#allocation67_spill] sm:$0xff]  ;;  %v7381_v63 = vld [vmem:[#allocation68_spill] sm:$0xff] }
 0x3c3   :  { %2368 = vmatpush1.bf16.msra.mxu0 %v7371_v9  ;;  %2409 = vmatpush1.bf16.msra.mxu1 %v7372_v30  ;;  %v7382_v9 = vld [vmem:[#allocation69_spill] sm:$0xff]  ;;  %v7383_v30 = vld [vmem:[#allocation70_spill] sm:$0xff] }
 0x3c4   :  { %2369 = vmatprep.subr.bf16.mxu0 %v7373_v29  ;;  %2410 = vmatprep.subr.bf16.mxu1 %v7374_v14  ;;  %v7384_v29 = vld [vmem:[#allocation71_spill] sm:$0xff]  ;;  %v7385_v14 = vld [vmem:[#allocation72_spill] sm:$0xff] }
 0x3c7   :  { %2370 = vmatpush1.bf16.msra.mxu0 %v7375_v7  ;;  %2411 = vmatpush1.bf16.msra.mxu1 %v7376_v34  ;;  %v7386_v7 = vld [vmem:[#allocation73_spill] sm:$0xff]  ;;  %v7387_v34 = vld [vmem:[#allocation74_spill] sm:$0xff] }
 0x3c8   :  { %2371 = vmatprep.subr.bf16.mxu0 %v7377_v43  ;;  %2412 = vmatprep.subr.bf16.mxu1 %v7378_v45  ;;  %v7388_v43 = vld [vmem:[#allocation75_spill] sm:$0xff]  ;;  %v7389_v45 = vld [vmem:[#allocation76_spill] sm:$0xff] }
 0x3cb   :  { %2372 = vmatpush1.bf16.msra.mxu0 %v7379_v0  ;;  %2413 = vmatpush1.bf16.msra.mxu1 %v7380_v5  ;;  %v7390_v0 = vld [vmem:[#allocation77_spill] sm:$0xff]  ;;  %v7391_v5 = vld [vmem:[#allocation78_spill] sm:$0xff] }
 0x3cc   :  { %2373 = vmatprep.subr.bf16.mxu0 %v7381_v63  ;;  %2414 = vmatprep.subr.bf16.mxu1 %v7382_v9  ;;  %v7392_v63 = vld [vmem:[#allocation79_spill] sm:$0xff]  ;;  %v7393_v9 = vld [vmem:[#allocation80_spill] sm:$0xff] }
 0x3cf   :  { %2374 = vmatpush1.bf16.msra.mxu0 %v7383_v30  ;;  %2415 = vmatpush1.bf16.msra.mxu1 %v7384_v29  ;;  %v7394_v30 = vld [vmem:[#allocation81_spill] sm:$0xff]  ;;  %v7395_v29 = vld [vmem:[#allocation82_spill] sm:$0xff] }
 0x3d0   :  { %2375 = vmatprep.subr.bf16.mxu0 %v7385_v14  ;;  %2416 = vmatprep.subr.bf16.mxu1 %v7386_v7  ;;  %v7396_v14 = vld [vmem:[#allocation83_spill] sm:$0xff]  ;;  %v7397_v7 = vld [vmem:[#allocation84_spill] sm:$0xff] }
 0x3d3   :  { %2376 = vmatpush1.bf16.msra.mxu0 %v7387_v34  ;;  %2417 = vmatpush1.bf16.msra.mxu1 %v7388_v43  ;;  %v7398_v34 = vld [vmem:[#allocation85_spill] sm:$0xff] }
 0x3d4   :  { %2377 = vmatprep.subr.bf16.mxu0 %v7389_v45  ;;  %2418 = vmatprep.subr.bf16.mxu1 %v7390_v0 }
 0x3d7   :  { %2378 = vmatpush1.bf16.msra.mxu0 %v7391_v5  ;;  %2419 = vmatpush1.bf16.msra.mxu1 %v7392_v63 }
 0x3d8   :  { %2379 = vmatprep.subr.bf16.mxu0 %v7393_v9  ;;  %2420 = vmatprep.subr.bf16.mxu1 %v7394_v30 }
 0x3db   :  { %2380 = vmatpush1.bf16.msra.mxu0 %v7395_v29  ;;  %2421 = vmatpush1.bf16.msra.mxu1 %v7396_v14 }
 0x3dc   :  { %2431 = vmatprep.subr.bf16.mxu0 %v7397_v7  ;;  %2472 = vmatprep.subr.bf16.mxu1 %v7398_v34 }
 0x431   :  { %v2165_v43 = vpop.f32.mrb[48].mxu0  ;;  %v2206_v45 = vpop.f32.mrb[48].mxu1 }
 0x432   :  { %v2295_v0 = vadd.f32 %v2165_v43, %v7399_v44  ;;  %v2297_v5 = vadd.f32 %v2206_v45, %v7400_v13  ;;  %v2167_v10 = vpop.f32.mrb[49].mxu0  ;;  %v2208_v63 = vpop.f32.mrb[49].mxu1  ;;  %v7403_v43 = vld [vmem:[#allocation182_spill] sm:$0xff] }
 0x433   :  { %v2296_v9 = vadd.f32 %v2167_v10, %v7401_v41  ;;  %v2298_v30 = vadd.f32 %v2208_v63, %v7402_v47  ;;  %v2169_v57 = vpop.f32.mrb[50].mxu0  ;;  %v2210_v29 = vpop.f32.mrb[50].mxu1 }
 0x434   :  { %v2170_v11 = vpop.f32.mrb[51].mxu0  ;;  %v2211_v14 = vpop.f32.mrb[51].mxu1  ;;  %v2305_v50 = vmul.f32 0.5, %v2297_v5  ;;  %v2303_v25 = vmul.f32 0.5, %v2295_v0  ;;  %v7405_v57 = vld [vmem:[#allocation184_spill] sm:$0xff] }
 0x435   :  { %v2306_v7 = vmul.f32 0.5, %v2298_v30  ;;  %v2304_v34 = vmul.f32 0.5, %v2296_v9  ;;  %v7406_v11 = vld [vmem:[#allocation185_spill] sm:$0xff] }
 0x436   :  { %4506 = vtanh.f32 %v2305_v50 }
 0x437   :  { %4508 = vtanh.f32 %v2306_v7 }
 0x438   :  { %4510 = vtanh.f32 %v2303_v25 }
 0x439   :  { %4512 = vtanh.f32 %v2304_v34 }
 0x440   :  { %v4507_v0 = vpop.eup %4506 }
 0x441   :  { %v4509_v25 = vpop.eup %4508  ;;  %v2317_v29 = vadd.f32 1.0, %v4507_v0 }
 0x442   :  { %v4511_v34 = vpop.eup %4510 }
 0x443   :  { %v4513_v50 = vpop.eup %4512  ;;  %v2323_v62 = vmul.f32 0.5, %v2317_v29 }
 0x444   :  { %v2316_v42 = vadd.f32 1.0, %v4513_v50 }
 0x471   :  { %v2247_v44 = vpop.f32.mrb[52].mxu0  ;;  %v2288_v13 = vpop.f32.mrb[52].mxu1 }
 0x472   :  { %v2299_v45 = vadd.f32 %v2247_v44, %v7403_v43  ;;  %v2301_v10 = vadd.f32 %v2288_v13, %v7404_v1  ;;  %v2249_v41 = vpop.f32.mrb[53].mxu0  ;;  %v2290_v63 = vpop.f32.mrb[53].mxu1  ;;  %v2318_v43 = vadd.f32 1.0, %v4509_v25  ;;  %v2315_v13 = vadd.f32 1.0, %v4511_v34 }
 0x473   :  { %v2300_v47 = vadd.f32 %v2249_v41, %v7405_v57  ;;  %v2302_v14 = vadd.f32 %v2290_v63, %v7406_v11  ;;  %v2251_v5 = vpop.f32.mrb[54].mxu0  ;;  %v2292_v30 = vpop.f32.mrb[54].mxu1  ;;  %v2322_v11 = vmul.f32 0.5, %v2316_v42 }
 0x474   :  { %4514 = vtanh.f32 %v2301_v10  ;;  %v2252_v9 = vpop.f32.mrb[55].mxu0  ;;  %v2293_v7 = vpop.f32.mrb[55].mxu1  ;;  %v2307_v44 = vmul.f32 0.5, %v2299_v45  ;;  %v2324_v41 = vmul.f32 0.5, %v2318_v43  ;;  %v2321_v63 = vmul.f32 0.5, %v2315_v13  ;;  %v7408_v13 = vld [vmem:[#allocation126_spill] sm:$0xff] }
 0x475   :  { %4516 = vtanh.f32 %v2302_v14  ;;  %v2308_v1 = vmul.f32 0.5, %v2300_v47  ;;  %v2329_v5 = vmul.f32 %v2323_v62, %v5848_v49 }
 0x476   :  { %4518 = vtanh.f32 %v2307_v44  ;;  %v2330_v14 = vmul.f32 %v2324_v41, %v5850_v46  ;;  %v7409_v41 = vld [vmem:[#allocation127_spill] sm:$0xff] }
 0x477   :  { %4520 = vtanh.f32 %v2308_v1  ;;  %v7407_v1 = vld [vmem:[#allocation125_spill] sm:$0xff] }
 0x47e   :  { %v4515_v57 = vpop.eup %4514 }
 0x47f   :  { %v4517_v10 = vpop.eup %4516  ;;  %v2331_v30 = vmul.f32 %v4515_v57, %v2321_v63  ;;  %v7410_v63 = vld [vmem:[#allocation128_spill] sm:$0xff]  ;;  %v7411_v57 = vld [vmem:[#allocation129_spill] sm:$0xff] }
 0x480   :  { %v2332_v9 = vmul.f32 %v4517_v10, %v2322_v11  ;;  %v4519_v47 = vpop.eup %4518  ;;  %v7412_v11 = vld [vmem:[#allocation130_spill] sm:$0xff]  ;;  %v7413_v10 = vld [vmem:[#allocation131_spill] sm:$0xff] }
 0x481   :  { %v5998_v0 = vadd.f32 %v2331_v30, %v2329_v5  ;;  %v4521_v7 = vpop.eup %4520  ;;  %v2319_v25 = vadd.f32 1.0, %v4519_v47  ;;  %v7414_v5 = vld [vmem:[#allocation132_spill] sm:$0xff]  ;;  %v7415_v30 = vld [vmem:[#allocation133_spill] sm:$0xff] }
 0x482   :  { %v6000_v45 = vadd.f32 %v2332_v9, %v2330_v14  ;;  %v2320_v34 = vadd.f32 1.0, %v4521_v7  ;;  %v7416_v14 = vld [vmem:[#allocation134_spill] sm:$0xff]  ;;  %v7417_v9 = vld [vmem:[#allocation135_spill] sm:$0xff]  ;;  %v7418_v47 = vld [vmem:[#allocation136_spill] sm:$0xff] }
 0x483   :  { %4522 = vtanh.f32 %v5998_v0  ;;  %v2325_v42 = vmul.f32 0.5, %v2319_v25  ;;  %v7419_v7 = vld [vmem:[#allocation137_spill] sm:$0xff]  ;;  %v7420_v25 = vld [vmem:[#allocation138_spill] sm:$0xff] }
 0x484   :  { %4524 = vtanh.f32 %v6000_v45  ;;  %v2326_v29 = vmul.f32 0.5, %v2320_v34  ;;  %v7421_v34 = vld [vmem:[#allocation139_spill] sm:$0xff] }
 0x48d   :  { %v4523_v50 = vpop.eup %4522 }
 0x48e   :  { %v4525_v62 = vpop.eup %4524  ;;  %v2337_v49 = vmul.f32 %v4523_v50, %v2325_v42  ;;  %v7422_v42 = vld [vmem:[#allocation140_spill] sm:$0xff]  ;;  %v7423_v50 = vld [vmem:[#allocation141_spill] sm:$0xff] }
 0x48f   :  { %v2338_v44 = vmul.f32 %v4525_v62, %v2326_v29  ;;  %v7424_v29 = vld [vmem:[#allocation142_spill] sm:$0xff]  ;;  %v7425_v62 = vld [vmem:[#allocation143_spill] sm:$0xff] }
 0x490   :  { %v6004_v43 = vpack.c.bf16 %v2337_v49, %v2337_v49  ;;  %v7426_v49 = vld [vmem:[#allocation144_spill] sm:$0xff] }
 0x491   :  { %v2348_v46 = vpack.c.bf16 %v2338_v44, %v2338_v44  ;;  %v7427_v44 = vld [vmem:[#allocation145_spill] sm:$0xff] }
 0x493   :  { %2381 = vmatprep.mubr.bf16.mxu0 %v2348_v46  ;;  %2422 = vmatprep.mubr.bf16.mxu1 %v2348_v46 }
 0x494   :  { %2382 = vmatmul.mubr.bf16.vlgmr.msra.gmra.mrb[56].mxu0 %v6004_v43  ;;  %2423 = vmatmul.mubr.bf16.vlgmr.msra.gmra.mrb[56].mxu1 %v6004_v43 }
 0x495   :  { %2432 = vmatpush1.bf16.msra.mxu0 %v7207_v53  ;;  %2473 = vmatpush1.bf16.msra.mxu1 %v7208_v23 }
 0x496   :  { %2463 = vmatprep.mubr.bf16.mxu0 %v2348_v46  ;;  %2504 = vmatprep.mubr.bf16.mxu1 %v2348_v46  ;;  %v7428_v46 = vld [vmem:[#allocation146_spill] sm:$0xff] }
 0x497   :  { %2433 = vmatprep.subr.bf16.mxu0 %v7209_v24  ;;  %2474 = vmatprep.subr.bf16.mxu1 %v7210_v19 }
 0x499   :  { %2434 = vmatpush1.bf16.msra.mxu0 %v7211_v33  ;;  %2475 = vmatpush1.bf16.msra.mxu1 %v7212_v15 }
 0x49a   :  { %2435 = vmatprep.subr.bf16.mxu0 %v7213_v22  ;;  %2476 = vmatprep.subr.bf16.mxu1 %v7214_v18 }
 0x49d   :  { %2436 = vmatpush1.bf16.msra.mxu0 %v7215_v60  ;;  %2477 = vmatpush1.bf16.msra.mxu1 %v7216_v40 }
 0x49e   :  { %2437 = vmatprep.subr.bf16.mxu0 %v7217_v52  ;;  %2478 = vmatprep.subr.bf16.mxu1 %v7218_v37 }
 0x4a1   :  { %2438 = vmatpush1.bf16.msra.mxu0 %v7219_v48  ;;  %2479 = vmatpush1.bf16.msra.mxu1 %v7220_v59 }
 0x4a2   :  { %2439 = vmatprep.subr.bf16.mxu0 %v7221_v56  ;;  %2480 = vmatprep.subr.bf16.mxu1 %v7222_v8 }
 0x4a5   :  { %2440 = vmatpush1.bf16.msra.mxu0 %v7223_v3  ;;  %2481 = vmatpush1.bf16.msra.mxu1 %v7310_v20 }
 0x4a6   :  { %2441 = vmatprep.subr.bf16.mxu0 %v7311_v39  ;;  %2482 = vmatprep.subr.bf16.mxu1 %v7312_v38 }
 0x4a9   :  { %2442 = vmatpush1.bf16.msra.mxu0 %v7313_v32  ;;  %2483 = vmatpush1.bf16.msra.mxu1 %v7314_v28 }
 0x4aa   :  { %2443 = vmatprep.subr.bf16.mxu0 %v7315_v27  ;;  %2484 = vmatprep.subr.bf16.mxu1 %v7316_v35 }
 0x4ad   :  { %2444 = vmatpush1.bf16.msra.mxu0 %v7317_v51  ;;  %2485 = vmatpush1.bf16.msra.mxu1 %v7318_v58 }
 0x4ae   :  { %2445 = vmatprep.subr.bf16.mxu0 %v7319_v31  ;;  %2486 = vmatprep.subr.bf16.mxu1 %v7320_v26 }
 0x4b1   :  { %2446 = vmatpush1.bf16.msra.mxu0 %v7321_v54  ;;  %2487 = vmatpush1.bf16.msra.mxu1 %v7322_v55 }
 0x4b2   :  { %2447 = vmatprep.subr.bf16.mxu0 %v7323_v21  ;;  %2488 = vmatprep.subr.bf16.mxu1 %v7324_v12 }
 0x4b5   :  { %2448 = vmatpush1.bf16.msra.mxu0 %v7325_v4  ;;  %2489 = vmatpush1.bf16.msra.mxu1 %v7326_v61 }
 0x4b6   :  { %2449 = vmatprep.subr.bf16.mxu0 %v7327_v6  ;;  %2490 = vmatprep.subr.bf16.mxu1 %v7328_v17 }
 0x4b9   :  { %2450 = vmatpush1.bf16.msra.mxu0 %v7329_v2  ;;  %2491 = vmatpush1.bf16.msra.mxu1 %v7244_v36 }
 0x4ba   :  { %2451 = vmatprep.subr.bf16.mxu0 %v7245_v16  ;;  %2492 = vmatprep.subr.bf16.mxu1 %v7407_v1 }
 0x4bd   :  { %2452 = vmatpush1.bf16.msra.mxu0 %v7408_v13  ;;  %2493 = vmatpush1.bf16.msra.mxu1 %v7409_v41  ;;  %v7501_v41 = vld [vmem:[#allocation187_spill] sm:$0xff] }
 0x4be   :  { %2453 = vmatprep.subr.bf16.mxu0 %v7410_v63  ;;  %2494 = vmatprep.subr.bf16.mxu1 %v7411_v57 }
 0x4c1   :  { %2454 = vmatpush1.bf16.msra.mxu0 %v7412_v11  ;;  %2495 = vmatpush1.bf16.msra.mxu1 %v7413_v10 }
 0x4c2   :  { %2455 = vmatprep.subr.bf16.mxu0 %v7414_v5  ;;  %2496 = vmatprep.subr.bf16.mxu1 %v7415_v30  ;;  %v7498_v30 = vld [vmem:[#allocation160_spill] sm:$0xff]  ;;  %v7499_v5 = vld [vmem:[#allocation161_spill] sm:$0xff] }
 0x4c5   :  { %2456 = vmatpush1.bf16.msra.mxu0 %v7416_v14  ;;  %2497 = vmatpush1.bf16.msra.mxu1 %v7417_v9  ;;  %v7497_v9 = vld [vmem:[#allocation159_spill] sm:$0xff] }
 0x4c6   :  { %2457 = vmatprep.subr.bf16.mxu0 %v7418_v47  ;;  %2498 = vmatprep.subr.bf16.mxu1 %v7419_v7  ;;  %v7429_v47 = vld [vmem:[#allocation147_spill] sm:$0xff]  ;;  %v7430_v7 = vld [vmem:[#allocation20_spill] sm:$0xff] }
 0x4c9   :  { %2458 = vmatpush1.bf16.msra.mxu0 %v7420_v25  ;;  %2499 = vmatpush1.bf16.msra.mxu1 %v7421_v34  ;;  %v7431_v25 = vld [vmem:[#allocation21_spill] sm:$0xff]  ;;  %v7496_v34 = vld [vmem:[#allocation158_spill] sm:$0xff] }
 0x4ca   :  { %2459 = vmatprep.subr.bf16.mxu0 %v7422_v42  ;;  %2500 = vmatprep.subr.bf16.mxu1 %v7423_v50  ;;  %v7432_v50 = vld [vmem:[#allocation22_spill] sm:$0xff]  ;;  %v7441_v42 = vld [vmem:[#allocation31_spill] sm:$0xff] }
 0x4cd   :  { %2460 = vmatpush1.bf16.msra.mxu0 %v7424_v29  ;;  %2501 = vmatpush1.bf16.msra.mxu1 %v7425_v62  ;;  %v7433_v29 = vld [vmem:[#allocation23_spill] sm:$0xff]  ;;  %v7434_v62 = vld [vmem:[#allocation24_spill] sm:$0xff] }
 0x4ce   :  { %2461 = vmatprep.subr.bf16.mxu0 %v7426_v49  ;;  %2502 = vmatprep.subr.bf16.mxu1 %v7427_v44  ;;  %v7435_v49 = vld [vmem:[#allocation25_spill] sm:$0xff]  ;;  %v7436_v44 = vld [vmem:[#allocation26_spill] sm:$0xff] }
 0x4d1   :  { %2462 = vmatpush1.bf16.msra.mxu0 %v7428_v46  ;;  %2503 = vmatpush1.bf16.msra.mxu1 %v7429_v47  ;;  %v7437_v46 = vld [vmem:[#allocation27_spill] sm:$0xff]  ;;  %v7438_v47 = vld [vmem:[#allocation28_spill] sm:$0xff] }
 0x4d2   :  { %2567 = vmatprep.subr.bf16.mxu0 %v7430_v7  ;;  %2608 = vmatprep.subr.bf16.mxu1 %v7431_v25  ;;  %v7439_v7 = vld [vmem:[#allocation29_spill] sm:$0xff]  ;;  %v7440_v25 = vld [vmem:[#allocation30_spill] sm:$0xff] }
 0x4d4   :  { %2464 = vmatmul.mubr.bf16.vlgmr.msra.gmra.mrb[60].mxu0 %v6004_v43  ;;  %2505 = vmatmul.mubr.bf16.vlgmr.msra.gmra.mrb[60].mxu1 %v6004_v43  ;;  %v7442_v43 = vld [vmem:[#allocation32_spill] sm:$0xff] }
 0x4d5   :  { %2568 = vmatpush1.bf16.msra.mxu0 %v7432_v50  ;;  %2609 = vmatpush1.bf16.msra.mxu1 %v7433_v29  ;;  %v7443_v50 = vld [vmem:[#allocation33_spill] sm:$0xff]  ;;  %v7444_v29 = vld [vmem:[#allocation34_spill] sm:$0xff] }
 0x4d6   :  { %2569 = vmatprep.subr.bf16.mxu0 %v7434_v62  ;;  %2610 = vmatprep.subr.bf16.mxu1 %v7435_v49  ;;  %v7445_v62 = vld [vmem:[#allocation35_spill] sm:$0xff]  ;;  %v7446_v49 = vld [vmem:[#allocation36_spill] sm:$0xff] }
 0x4d9   :  { %2570 = vmatpush1.bf16.msra.mxu0 %v7436_v44  ;;  %2611 = vmatpush1.bf16.msra.mxu1 %v7437_v46  ;;  %v7447_v44 = vld [vmem:[#allocation37_spill] sm:$0xff]  ;;  %v7448_v46 = vld [vmem:[#allocation38_spill] sm:$0xff] }
 0x4da   :  { %2571 = vmatprep.subr.bf16.mxu0 %v7438_v47  ;;  %2612 = vmatprep.subr.bf16.mxu1 %v7439_v7  ;;  %v7449_v47 = vld [vmem:[#allocation39_spill] sm:$0xff]  ;;  %v7450_v7 = vld [vmem:[#allocation40_spill] sm:$0xff] }
 0x4dd   :  { %2572 = vmatpush1.bf16.msra.mxu0 %v7440_v25  ;;  %2613 = vmatpush1.bf16.msra.mxu1 %v7441_v42  ;;  %v7451_v25 = vld [vmem:[#allocation41_spill] sm:$0xff]  ;;  %v7452_v42 = vld [vmem:[#allocation42_spill] sm:$0xff] }
 0x4de   :  { %2573 = vmatprep.subr.bf16.mxu0 %v7442_v43  ;;  %2614 = vmatprep.subr.bf16.mxu1 %v7443_v50  ;;  %v7453_v43 = vld [vmem:[#allocation43_spill] sm:$0xff]  ;;  %v7454_v50 = vld [vmem:[#allocation44_spill] sm:$0xff] }
 0x4e1   :  { %2574 = vmatpush1.bf16.msra.mxu0 %v7444_v29  ;;  %2615 = vmatpush1.bf16.msra.mxu1 %v7445_v62  ;;  %v7455_v29 = vld [vmem:[#allocation45_spill] sm:$0xff]  ;;  %v7456_v62 = vld [vmem:[#allocation46_spill] sm:$0xff] }
 0x4e2   :  { %2575 = vmatprep.subr.bf16.mxu0 %v7446_v49  ;;  %2616 = vmatprep.subr.bf16.mxu1 %v7447_v44  ;;  %v7457_v49 = vld [vmem:[#allocation47_spill] sm:$0xff]  ;;  %v7458_v44 = vld [vmem:[#allocation48_spill] sm:$0xff] }
 0x4e5   :  { %2576 = vmatpush1.bf16.msra.mxu0 %v7448_v46  ;;  %2617 = vmatpush1.bf16.msra.mxu1 %v7449_v47  ;;  %v7459_v46 = vld [vmem:[#allocation49_spill] sm:$0xff]  ;;  %v7460_v47 = vld [vmem:[#allocation50_spill] sm:$0xff] }
 0x4e6   :  { %2577 = vmatprep.subr.bf16.mxu0 %v7450_v7  ;;  %2618 = vmatprep.subr.bf16.mxu1 %v7451_v25  ;;  %v7461_v7 = vld [vmem:[#allocation51_spill] sm:$0xff]  ;;  %v7462_v25 = vld [vmem:[#allocation52_spill] sm:$0xff] }
 0x4e9   :  { %2578 = vmatpush1.bf16.msra.mxu0 %v7452_v42  ;;  %2619 = vmatpush1.bf16.msra.mxu1 %v7453_v43  ;;  %v7463_v42 = vld [vmem:[#allocation53_spill] sm:$0xff]  ;;  %v7464_v43 = vld [vmem:[#allocation54_spill] sm:$0xff] }
 0x4ea   :  { %2579 = vmatprep.subr.bf16.mxu0 %v7454_v50  ;;  %2620 = vmatprep.subr.bf16.mxu1 %v7455_v29  ;;  %v7465_v50 = vld [vmem:[#allocation55_spill] sm:$0xff]  ;;  %v7466_v29 = vld [vmem:[#allocation56_spill] sm:$0xff] }
 0x4ed   :  { %2580 = vmatpush1.bf16.msra.mxu0 %v7456_v62  ;;  %2621 = vmatpush1.bf16.msra.mxu1 %v7457_v49  ;;  %v7467_v62 = vld [vmem:[#allocation57_spill] sm:$0xff]  ;;  %v7468_v49 = vld [vmem:[#allocation58_spill] sm:$0xff] }
 0x4ee   :  { %2581 = vmatprep.subr.bf16.mxu0 %v7458_v44  ;;  %2622 = vmatprep.subr.bf16.mxu1 %v7459_v46  ;;  %v7469_v44 = vld [vmem:[#allocation59_spill] sm:$0xff]  ;;  %v7470_v46 = vld [vmem:[#allocation60_spill] sm:$0xff] }
 0x4f1   :  { %2582 = vmatpush1.bf16.msra.mxu0 %v7460_v47  ;;  %2623 = vmatpush1.bf16.msra.mxu1 %v7461_v7  ;;  %v7471_v47 = vld [vmem:[#allocation61_spill] sm:$0xff]  ;;  %v7472_v7 = vld [vmem:[#allocation62_spill] sm:$0xff] }
 0x4f2   :  { %2583 = vmatprep.subr.bf16.mxu0 %v7462_v25  ;;  %2624 = vmatprep.subr.bf16.mxu1 %v7463_v42  ;;  %v7473_v25 = vld [vmem:[#allocation63_spill] sm:$0xff]  ;;  %v7474_v42 = vld [vmem:[#allocation64_spill] sm:$0xff] }
 0x4f5   :  { %2584 = vmatpush1.bf16.msra.mxu0 %v7464_v43  ;;  %2625 = vmatpush1.bf16.msra.mxu1 %v7465_v50  ;;  %v7475_v43 = vld [vmem:[#allocation65_spill] sm:$0xff]  ;;  %v7476_v50 = vld [vmem:[#allocation66_spill] sm:$0xff] }
 0x4f6   :  { %2585 = vmatprep.subr.bf16.mxu0 %v7466_v29  ;;  %2626 = vmatprep.subr.bf16.mxu1 %v7467_v62  ;;  %v7477_v29 = vld [vmem:[#allocation67_spill] sm:$0xff]  ;;  %v7478_v62 = vld [vmem:[#allocation68_spill] sm:$0xff] }
 0x4f9   :  { %2586 = vmatpush1.bf16.msra.mxu0 %v7468_v49  ;;  %2627 = vmatpush1.bf16.msra.mxu1 %v7469_v44  ;;  %v7479_v49 = vld [vmem:[#allocation69_spill] sm:$0xff]  ;;  %v7480_v44 = vld [vmem:[#allocation70_spill] sm:$0xff] }
 0x4fa   :  { %2587 = vmatprep.subr.bf16.mxu0 %v7470_v46  ;;  %2628 = vmatprep.subr.bf16.mxu1 %v7471_v47  ;;  %v7481_v46 = vld [vmem:[#allocation71_spill] sm:$0xff]  ;;  %v7482_v47 = vld [vmem:[#allocation72_spill] sm:$0xff] }
 0x4fd   :  { %2588 = vmatpush1.bf16.msra.mxu0 %v7472_v7  ;;  %2629 = vmatpush1.bf16.msra.mxu1 %v7473_v25  ;;  %v7483_v7 = vld [vmem:[#allocation73_spill] sm:$0xff]  ;;  %v7484_v25 = vld [vmem:[#allocation74_spill] sm:$0xff] }
 0x4fe   :  { %2589 = vmatprep.subr.bf16.mxu0 %v7474_v42  ;;  %2630 = vmatprep.subr.bf16.mxu1 %v7475_v43  ;;  %v7485_v42 = vld [vmem:[#allocation75_spill] sm:$0xff]  ;;  %v7486_v43 = vld [vmem:[#allocation76_spill] sm:$0xff] }
 0x501   :  { %2590 = vmatpush1.bf16.msra.mxu0 %v7476_v50  ;;  %2631 = vmatpush1.bf16.msra.mxu1 %v7477_v29  ;;  %v7487_v50 = vld [vmem:[#allocation77_spill] sm:$0xff]  ;;  %v7488_v29 = vld [vmem:[#allocation78_spill] sm:$0xff] }
 0x502   :  { %2591 = vmatprep.subr.bf16.mxu0 %v7478_v62  ;;  %2632 = vmatprep.subr.bf16.mxu1 %v7479_v49  ;;  %v7489_v62 = vld [vmem:[#allocation79_spill] sm:$0xff]  ;;  %v7490_v49 = vld [vmem:[#allocation80_spill] sm:$0xff] }
 0x505   :  { %2592 = vmatpush1.bf16.msra.mxu0 %v7480_v44  ;;  %2633 = vmatpush1.bf16.msra.mxu1 %v7481_v46  ;;  %v7491_v44 = vld [vmem:[#allocation81_spill] sm:$0xff]  ;;  %v7492_v46 = vld [vmem:[#allocation82_spill] sm:$0xff] }
 0x506   :  { %2593 = vmatprep.subr.bf16.mxu0 %v7482_v47  ;;  %2634 = vmatprep.subr.bf16.mxu1 %v7483_v7  ;;  %v7493_v47 = vld [vmem:[#allocation83_spill] sm:$0xff]  ;;  %v7494_v7 = vld [vmem:[#allocation84_spill] sm:$0xff] }
 0x509   :  { %2594 = vmatpush1.bf16.msra.mxu0 %v7484_v25  ;;  %2635 = vmatpush1.bf16.msra.mxu1 %v7485_v42  ;;  %v7495_v25 = vld [vmem:[#allocation85_spill] sm:$0xff] }
 0x50a   :  { %2595 = vmatprep.subr.bf16.mxu0 %v7486_v43  ;;  %2636 = vmatprep.subr.bf16.mxu1 %v7487_v50 }
 0x50d   :  { %2596 = vmatpush1.bf16.msra.mxu0 %v7488_v29  ;;  %2637 = vmatpush1.bf16.msra.mxu1 %v7489_v62 }
 0x50e   :  { %2597 = vmatprep.subr.bf16.mxu0 %v7490_v49  ;;  %2638 = vmatprep.subr.bf16.mxu1 %v7491_v44 }
 0x511   :  { %2598 = vmatpush1.bf16.msra.mxu0 %v7492_v46  ;;  %2639 = vmatpush1.bf16.msra.mxu1 %v7493_v47 }
 0x512   :  { %2649 = vmatprep.subr.bf16.mxu0 %v7494_v7  ;;  %2690 = vmatprep.subr.bf16.mxu1 %v7495_v25 }
 0x567   :  { %v2383_v42 = vpop.f32.mrb[56].mxu0  ;;  %v2424_v43 = vpop.f32.mrb[56].mxu1 }
 0x568   :  { %v2513_v50 = vadd.f32 %v2383_v42, %v7496_v34  ;;  %v2515_v29 = vadd.f32 %v2424_v43, %v7497_v9  ;;  %v2385_v14 = vpop.f32.mrb[57].mxu0  ;;  %v2426_v62 = vpop.f32.mrb[57].mxu1  ;;  %v7500_v42 = vld [vmem:[#allocation186_spill] sm:$0xff] }
 0x569   :  { %v2514_v49 = vadd.f32 %v2385_v14, %v7498_v30  ;;  %v2516_v44 = vadd.f32 %v2426_v62, %v7499_v5  ;;  %v2387_v10 = vpop.f32.mrb[58].mxu0  ;;  %v2428_v46 = vpop.f32.mrb[58].mxu1 }
 0x56a   :  { %v2388_v11 = vpop.f32.mrb[59].mxu0  ;;  %v2429_v47 = vpop.f32.mrb[59].mxu1  ;;  %v2523_v57 = vmul.f32 0.5, %v2515_v29  ;;  %v2521_v63 = vmul.f32 0.5, %v2513_v50  ;;  %v7502_v10 = vld [vmem:[#allocation188_spill] sm:$0xff] }
 0x56b   :  { %v2524_v7 = vmul.f32 0.5, %v2516_v44  ;;  %v2522_v25 = vmul.f32 0.5, %v2514_v49  ;;  %v7503_v11 = vld [vmem:[#allocation189_spill] sm:$0xff] }
 0x56c   :  { %4526 = vtanh.f32 %v2523_v57 }
 0x56d   :  { %4528 = vtanh.f32 %v2524_v7 }
 0x56e   :  { %4530 = vtanh.f32 %v2521_v63 }
 0x56f   :  { %4532 = vtanh.f32 %v2522_v25 }
 0x576   :  { %v4527_v50 = vpop.eup %4526 }
 0x577   :  { %v4529_v63 = vpop.eup %4528  ;;  %v2535_v46 = vadd.f32 1.0, %v4527_v50 }
 0x578   :  { %v4531_v25 = vpop.eup %4530 }
 0x579   :  { %v4533_v49 = vpop.eup %4532  ;;  %v2541_v1 = vmul.f32 0.5, %v2535_v46 }
 0x57a   :  { %v2534_v13 = vadd.f32 1.0, %v4533_v49 }
 0x5a7   :  { %v2465_v34 = vpop.f32.mrb[60].mxu0  ;;  %v2506_v9 = vpop.f32.mrb[60].mxu1 }
 0x5a8   :  { %v2517_v43 = vadd.f32 %v2465_v34, %v7500_v42  ;;  %v2519_v30 = vadd.f32 %v2506_v9, %v7501_v41  ;;  %v2467_v14 = vpop.f32.mrb[61].mxu0  ;;  %v2508_v5 = vpop.f32.mrb[61].mxu1  ;;  %v2536_v42 = vadd.f32 1.0, %v4529_v63  ;;  %v2533_v9 = vadd.f32 1.0, %v4531_v25 }
 0x5a9   :  { %v2518_v62 = vadd.f32 %v2467_v14, %v7502_v10  ;;  %v2520_v47 = vadd.f32 %v2508_v5, %v7503_v11  ;;  %v2469_v29 = vpop.f32.mrb[62].mxu0  ;;  %v2510_v44 = vpop.f32.mrb[62].mxu1  ;;  %v2540_v11 = vmul.f32 0.5, %v2534_v13 }
 0x5aa   :  { %4534 = vtanh.f32 %v2519_v30  ;;  %v2470_v57 = vpop.f32.mrb[63].mxu0  ;;  %v2511_v7 = vpop.f32.mrb[63].mxu1  ;;  %v2525_v34 = vmul.f32 0.5, %v2517_v43  ;;  %v2542_v14 = vmul.f32 0.5, %v2536_v42  ;;  %v2539_v5 = vmul.f32 0.5, %v2533_v9  ;;  %v7505_v9 = vld [vmem:[#allocation126_spill] sm:$0xff] }
 0x5ab   :  { %4536 = vtanh.f32 %v2520_v47  ;;  %v2526_v41 = vmul.f32 0.5, %v2518_v62  ;;  %v2547_v29 = vmul.f32 %v2541_v1, %v5998_v0 }
 0x5ac   :  { %4538 = vtanh.f32 %v2525_v34  ;;  %v2548_v47 = vmul.f32 %v2542_v14, %v6000_v45  ;;  %v7506_v14 = vld [vmem:[#allocation127_spill] sm:$0xff] }
 0x5ad   :  { %4540 = vtanh.f32 %v2526_v41  ;;  %v7504_v41 = vld [vmem:[#allocation125_spill] sm:$0xff] }
 0x5b4   :  { %v4535_v10 = vpop.eup %4534 }
 0x5b5   :  { %v4537_v30 = vpop.eup %4536  ;;  %v2549_v44 = vmul.f32 %v4535_v10, %v2539_v5  ;;  %v7507_v5 = vld [vmem:[#allocation128_spill] sm:$0xff]  ;;  %v7508_v10 = vld [vmem:[#allocation129_spill] sm:$0xff] }
 0x5b6   :  { %v2550_v57 = vmul.f32 %v4537_v30, %v2540_v11  ;;  %v4539_v62 = vpop.eup %4538  ;;  %v7509_v11 = vld [vmem:[#allocation130_spill] sm:$0xff]  ;;  %v7510_v30 = vld [vmem:[#allocation131_spill] sm:$0xff] }
 0x5b7   :  { %v6148_v50 = vadd.f32 %v2549_v44, %v2547_v29  ;;  %v4541_v7 = vpop.eup %4540  ;;  %v2537_v63 = vadd.f32 1.0, %v4539_v62  ;;  %v7511_v29 = vld [vmem:[#allocation132_spill] sm:$0xff]  ;;  %v7512_v44 = vld [vmem:[#allocation133_spill] sm:$0xff] }
 0x5b8   :  { %v6150_v43 = vadd.f32 %v2550_v57, %v2548_v47  ;;  %v2538_v25 = vadd.f32 1.0, %v4541_v7  ;;  %v7513_v47 = vld [vmem:[#allocation134_spill] sm:$0xff]  ;;  %v7514_v57 = vld [vmem:[#allocation135_spill] sm:$0xff]  ;;  %v7515_v62 = vld [vmem:[#allocation136_spill] sm:$0xff] }
 0x5b9   :  { %4542 = vtanh.f32 %v6148_v50  ;;  %v2543_v13 = vmul.f32 0.5, %v2537_v63  ;;  %v7516_v7 = vld [vmem:[#allocation137_spill] sm:$0xff]  ;;  %v7517_v63 = vld [vmem:[#allocation138_spill] sm:$0xff] }
 0x5ba   :  { %4544 = vtanh.f32 %v6150_v43  ;;  %v2544_v46 = vmul.f32 0.5, %v2538_v25  ;;  %v7518_v25 = vld [vmem:[#allocation139_spill] sm:$0xff] }
 0x5c3   :  { %v4543_v49 = vpop.eup %4542 }
 0x5c4   :  { %v4545_v0 = vpop.eup %4544  ;;  %v2555_v1 = vmul.f32 %v4543_v49, %v2543_v13  ;;  %v7519_v13 = vld [vmem:[#allocation140_spill] sm:$0xff]  ;;  %v7520_v49 = vld [vmem:[#allocation141_spill] sm:$0xff] }
 0x5c5   :  { %v2556_v34 = vmul.f32 %v4545_v0, %v2544_v46  ;;  %v7521_v46 = vld [vmem:[#allocation142_spill] sm:$0xff]  ;;  %v7522_v0 = vld [vmem:[#allocation143_spill] sm:$0xff] }
 0x5c6   :  { %v6154_v42 = vpack.c.bf16 %v2555_v1, %v2555_v1  ;;  %v7523_v1 = vld [vmem:[#allocation144_spill] sm:$0xff] }
 0x5c7   :  { %v2566_v45 = vpack.c.bf16 %v2556_v34, %v2556_v34  ;;  %v7524_v34 = vld [vmem:[#allocation145_spill] sm:$0xff] }
 0x5c9   :  { %2599 = vmatprep.mubr.bf16.mxu0 %v2566_v45  ;;  %2640 = vmatprep.mubr.bf16.mxu1 %v2566_v45 }
 0x5ca   :  { %2600 = vmatmul.mubr.bf16.vlgmr.msra.gmra.mrb[64].mxu0 %v6154_v42  ;;  %2641 = vmatmul.mubr.bf16.vlgmr.msra.gmra.mrb[64].mxu1 %v6154_v42 }
 0x5cb   :  { %2650 = vmatpush1.bf16.msra.mxu0 %v7207_v53  ;;  %2691 = vmatpush1.bf16.msra.mxu1 %v7208_v23 }
 0x5cc   :  { %2681 = vmatprep.mubr.bf16.mxu0 %v2566_v45  ;;  %2722 = vmatprep.mubr.bf16.mxu1 %v2566_v45  ;;  %v7525_v45 = vld [vmem:[#allocation146_spill] sm:$0xff] }
 0x5cd   :  { %2651 = vmatprep.subr.bf16.mxu0 %v7209_v24  ;;  %2692 = vmatprep.subr.bf16.mxu1 %v7210_v19 }
 0x5cf   :  { %2652 = vmatpush1.bf16.msra.mxu0 %v7211_v33  ;;  %2693 = vmatpush1.bf16.msra.mxu1 %v7212_v15 }
 0x5d0   :  { %2653 = vmatprep.subr.bf16.mxu0 %v7213_v22  ;;  %2694 = vmatprep.subr.bf16.mxu1 %v7214_v18 }
 0x5d3   :  { %2654 = vmatpush1.bf16.msra.mxu0 %v7215_v60  ;;  %2695 = vmatpush1.bf16.msra.mxu1 %v7216_v40 }
 0x5d4   :  { %2655 = vmatprep.subr.bf16.mxu0 %v7217_v52  ;;  %2696 = vmatprep.subr.bf16.mxu1 %v7218_v37 }
 0x5d7   :  { %2656 = vmatpush1.bf16.msra.mxu0 %v7219_v48  ;;  %2697 = vmatpush1.bf16.msra.mxu1 %v7220_v59 }
 0x5d8   :  { %2657 = vmatprep.subr.bf16.mxu0 %v7221_v56  ;;  %2698 = vmatprep.subr.bf16.mxu1 %v7222_v8 }
 0x5db   :  { %2658 = vmatpush1.bf16.msra.mxu0 %v7223_v3  ;;  %2699 = vmatpush1.bf16.msra.mxu1 %v7310_v20 }
 0x5dc   :  { %2659 = vmatprep.subr.bf16.mxu0 %v7311_v39  ;;  %2700 = vmatprep.subr.bf16.mxu1 %v7312_v38 }
 0x5df   :  { %2660 = vmatpush1.bf16.msra.mxu0 %v7313_v32  ;;  %2701 = vmatpush1.bf16.msra.mxu1 %v7314_v28 }
 0x5e0   :  { %2661 = vmatprep.subr.bf16.mxu0 %v7315_v27  ;;  %2702 = vmatprep.subr.bf16.mxu1 %v7316_v35 }
 0x5e3   :  { %2662 = vmatpush1.bf16.msra.mxu0 %v7317_v51  ;;  %2703 = vmatpush1.bf16.msra.mxu1 %v7318_v58 }
 0x5e4   :  { %2663 = vmatprep.subr.bf16.mxu0 %v7319_v31  ;;  %2704 = vmatprep.subr.bf16.mxu1 %v7320_v26 }
 0x5e7   :  { %2664 = vmatpush1.bf16.msra.mxu0 %v7321_v54  ;;  %2705 = vmatpush1.bf16.msra.mxu1 %v7322_v55 }
 0x5e8   :  { %2665 = vmatprep.subr.bf16.mxu0 %v7323_v21  ;;  %2706 = vmatprep.subr.bf16.mxu1 %v7324_v12 }
 0x5eb   :  { %2666 = vmatpush1.bf16.msra.mxu0 %v7325_v4  ;;  %2707 = vmatpush1.bf16.msra.mxu1 %v7326_v61 }
 0x5ec   :  { %2667 = vmatprep.subr.bf16.mxu0 %v7327_v6  ;;  %2708 = vmatprep.subr.bf16.mxu1 %v7328_v17 }
 0x5ef   :  { %2668 = vmatpush1.bf16.msra.mxu0 %v7329_v2  ;;  %2709 = vmatpush1.bf16.msra.mxu1 %v7244_v36 }
 0x5f0   :  { %2669 = vmatprep.subr.bf16.mxu0 %v7245_v16  ;;  %2710 = vmatprep.subr.bf16.mxu1 %v7504_v41 }
 0x5f3   :  { %2670 = vmatpush1.bf16.msra.mxu0 %v7505_v9  ;;  %2711 = vmatpush1.bf16.msra.mxu1 %v7506_v14  ;;  %v7598_v14 = vld [vmem:[#allocation191_spill] sm:$0xff] }
 0x5f4   :  { %2671 = vmatprep.subr.bf16.mxu0 %v7507_v5  ;;  %2712 = vmatprep.subr.bf16.mxu1 %v7508_v10 }
 0x5f7   :  { %2672 = vmatpush1.bf16.msra.mxu0 %v7509_v11  ;;  %2713 = vmatpush1.bf16.msra.mxu1 %v7510_v30 }
 0x5f8   :  { %2673 = vmatprep.subr.bf16.mxu0 %v7511_v29  ;;  %2714 = vmatprep.subr.bf16.mxu1 %v7512_v44  ;;  %v7595_v44 = vld [vmem:[#allocation164_spill] sm:$0xff]  ;;  %v7596_v29 = vld [vmem:[#allocation165_spill] sm:$0xff] }
 0x5fb   :  { %2674 = vmatpush1.bf16.msra.mxu0 %v7513_v47  ;;  %2715 = vmatpush1.bf16.msra.mxu1 %v7514_v57  ;;  %v7594_v57 = vld [vmem:[#allocation163_spill] sm:$0xff] }
 0x5fc   :  { %2675 = vmatprep.subr.bf16.mxu0 %v7515_v62  ;;  %2716 = vmatprep.subr.bf16.mxu1 %v7516_v7  ;;  %v7526_v62 = vld [vmem:[#allocation147_spill] sm:$0xff]  ;;  %v7527_v7 = vld [vmem:[#allocation20_spill] sm:$0xff] }
 0x5ff   :  { %2676 = vmatpush1.bf16.msra.mxu0 %v7517_v63  ;;  %2717 = vmatpush1.bf16.msra.mxu1 %v7518_v25  ;;  %v7528_v63 = vld [vmem:[#allocation21_spill] sm:$0xff]  ;;  %v7593_v25 = vld [vmem:[#allocation162_spill] sm:$0xff] }
 0x600   :  { %2677 = vmatprep.subr.bf16.mxu0 %v7519_v13  ;;  %2718 = vmatprep.subr.bf16.mxu1 %v7520_v49  ;;  %v7529_v49 = vld [vmem:[#allocation22_spill] sm:$0xff]  ;;  %v7538_v13 = vld [vmem:[#allocation31_spill] sm:$0xff] }
 0x603   :  { %2678 = vmatpush1.bf16.msra.mxu0 %v7521_v46  ;;  %2719 = vmatpush1.bf16.msra.mxu1 %v7522_v0  ;;  %v7530_v46 = vld [vmem:[#allocation23_spill] sm:$0xff]  ;;  %v7531_v0 = vld [vmem:[#allocation24_spill] sm:$0xff] }
 0x604   :  { %2679 = vmatprep.subr.bf16.mxu0 %v7523_v1  ;;  %2720 = vmatprep.subr.bf16.mxu1 %v7524_v34  ;;  %v7532_v1 = vld [vmem:[#allocation25_spill] sm:$0xff]  ;;  %v7533_v34 = vld [vmem:[#allocation26_spill] sm:$0xff] }
 0x607   :  { %2680 = vmatpush1.bf16.msra.mxu0 %v7525_v45  ;;  %2721 = vmatpush1.bf16.msra.mxu1 %v7526_v62  ;;  %v7534_v45 = vld [vmem:[#allocation27_spill] sm:$0xff]  ;;  %v7535_v62 = vld [vmem:[#allocation28_spill] sm:$0xff] }
 0x608   :  { %2785 = vmatprep.subr.bf16.mxu0 %v7527_v7  ;;  %2826 = vmatprep.subr.bf16.mxu1 %v7528_v63  ;;  %v7536_v7 = vld [vmem:[#allocation29_spill] sm:$0xff]  ;;  %v7537_v63 = vld [vmem:[#allocation30_spill] sm:$0xff] }
 0x60a   :  { %2682 = vmatmul.mubr.bf16.vlgmr.msra.gmra.mrb[68].mxu0 %v6154_v42  ;;  %2723 = vmatmul.mubr.bf16.vlgmr.msra.gmra.mrb[68].mxu1 %v6154_v42  ;;  %v7539_v42 = vld [vmem:[#allocation32_spill] sm:$0xff] }
 0x60b   :  { %2786 = vmatpush1.bf16.msra.mxu0 %v7529_v49  ;;  %2827 = vmatpush1.bf16.msra.mxu1 %v7530_v46  ;;  %v7540_v49 = vld [vmem:[#allocation33_spill] sm:$0xff]  ;;  %v7541_v46 = vld [vmem:[#allocation34_spill] sm:$0xff] }
 0x60c   :  { %2787 = vmatprep.subr.bf16.mxu0 %v7531_v0  ;;  %2828 = vmatprep.subr.bf16.mxu1 %v7532_v1  ;;  %v7542_v0 = vld [vmem:[#allocation35_spill] sm:$0xff]  ;;  %v7543_v1 = vld [vmem:[#allocation36_spill] sm:$0xff] }
 0x60f   :  { %2788 = vmatpush1.bf16.msra.mxu0 %v7533_v34  ;;  %2829 = vmatpush1.bf16.msra.mxu1 %v7534_v45  ;;  %v7544_v34 = vld [vmem:[#allocation37_spill] sm:$0xff]  ;;  %v7545_v45 = vld [vmem:[#allocation38_spill] sm:$0xff] }
 0x610   :  { %2789 = vmatprep.subr.bf16.mxu0 %v7535_v62  ;;  %2830 = vmatprep.subr.bf16.mxu1 %v7536_v7  ;;  %v7546_v62 = vld [vmem:[#allocation39_spill] sm:$0xff]  ;;  %v7547_v7 = vld [vmem:[#allocation40_spill] sm:$0xff] }
 0x613   :  { %2790 = vmatpush1.bf16.msra.mxu0 %v7537_v63  ;;  %2831 = vmatpush1.bf16.msra.mxu1 %v7538_v13  ;;  %v7548_v63 = vld [vmem:[#allocation41_spill] sm:$0xff]  ;;  %v7549_v13 = vld [vmem:[#allocation42_spill] sm:$0xff] }
 0x614   :  { %2791 = vmatprep.subr.bf16.mxu0 %v7539_v42  ;;  %2832 = vmatprep.subr.bf16.mxu1 %v7540_v49  ;;  %v7550_v42 = vld [vmem:[#allocation43_spill] sm:$0xff]  ;;  %v7551_v49 = vld [vmem:[#allocation44_spill] sm:$0xff] }
 0x617   :  { %2792 = vmatpush1.bf16.msra.mxu0 %v7541_v46  ;;  %2833 = vmatpush1.bf16.msra.mxu1 %v7542_v0  ;;  %v7552_v46 = vld [vmem:[#allocation45_spill] sm:$0xff]  ;;  %v7553_v0 = vld [vmem:[#allocation46_spill] sm:$0xff] }
 0x618   :  { %2793 = vmatprep.subr.bf16.mxu0 %v7543_v1  ;;  %2834 = vmatprep.subr.bf16.mxu1 %v7544_v34  ;;  %v7554_v1 = vld [vmem:[#allocation47_spill] sm:$0xff]  ;;  %v7555_v34 = vld [vmem:[#allocation48_spill] sm:$0xff] }
 0x61b   :  { %2794 = vmatpush1.bf16.msra.mxu0 %v7545_v45  ;;  %2835 = vmatpush1.bf16.msra.mxu1 %v7546_v62  ;;  %v7556_v45 = vld [vmem:[#allocation49_spill] sm:$0xff]  ;;  %v7557_v62 = vld [vmem:[#allocation50_spill] sm:$0xff] }
 0x61c   :  { %2795 = vmatprep.subr.bf16.mxu0 %v7547_v7  ;;  %2836 = vmatprep.subr.bf16.mxu1 %v7548_v63  ;;  %v7558_v7 = vld [vmem:[#allocation51_spill] sm:$0xff]  ;;  %v7559_v63 = vld [vmem:[#allocation52_spill] sm:$0xff] }
 0x61f   :  { %2796 = vmatpush1.bf16.msra.mxu0 %v7549_v13  ;;  %2837 = vmatpush1.bf16.msra.mxu1 %v7550_v42  ;;  %v7560_v13 = vld [vmem:[#allocation53_spill] sm:$0xff]  ;;  %v7561_v42 = vld [vmem:[#allocation54_spill] sm:$0xff] }
 0x620   :  { %2797 = vmatprep.subr.bf16.mxu0 %v7551_v49  ;;  %2838 = vmatprep.subr.bf16.mxu1 %v7552_v46  ;;  %v7562_v49 = vld [vmem:[#allocation55_spill] sm:$0xff]  ;;  %v7563_v46 = vld [vmem:[#allocation56_spill] sm:$0xff] }
 0x623   :  { %2798 = vmatpush1.bf16.msra.mxu0 %v7553_v0  ;;  %2839 = vmatpush1.bf16.msra.mxu1 %v7554_v1  ;;  %v7564_v0 = vld [vmem:[#allocation57_spill] sm:$0xff]  ;;  %v7565_v1 = vld [vmem:[#allocation58_spill] sm:$0xff] }
 0x624   :  { %2799 = vmatprep.subr.bf16.mxu0 %v7555_v34  ;;  %2840 = vmatprep.subr.bf16.mxu1 %v7556_v45  ;;  %v7566_v34 = vld [vmem:[#allocation59_spill] sm:$0xff]  ;;  %v7567_v45 = vld [vmem:[#allocation60_spill] sm:$0xff] }
 0x627   :  { %2800 = vmatpush1.bf16.msra.mxu0 %v7557_v62  ;;  %2841 = vmatpush1.bf16.msra.mxu1 %v7558_v7  ;;  %v7568_v62 = vld [vmem:[#allocation61_spill] sm:$0xff]  ;;  %v7569_v7 = vld [vmem:[#allocation62_spill] sm:$0xff] }
 0x628   :  { %2801 = vmatprep.subr.bf16.mxu0 %v7559_v63  ;;  %2842 = vmatprep.subr.bf16.mxu1 %v7560_v13  ;;  %v7570_v63 = vld [vmem:[#allocation63_spill] sm:$0xff]  ;;  %v7571_v13 = vld [vmem:[#allocation64_spill] sm:$0xff] }
 0x62b   :  { %2802 = vmatpush1.bf16.msra.mxu0 %v7561_v42  ;;  %2843 = vmatpush1.bf16.msra.mxu1 %v7562_v49  ;;  %v7572_v42 = vld [vmem:[#allocation65_spill] sm:$0xff]  ;;  %v7573_v49 = vld [vmem:[#allocation66_spill] sm:$0xff] }
 0x62c   :  { %2803 = vmatprep.subr.bf16.mxu0 %v7563_v46  ;;  %2844 = vmatprep.subr.bf16.mxu1 %v7564_v0  ;;  %v7574_v46 = vld [vmem:[#allocation67_spill] sm:$0xff]  ;;  %v7575_v0 = vld [vmem:[#allocation68_spill] sm:$0xff] }
 0x62f   :  { %2804 = vmatpush1.bf16.msra.mxu0 %v7565_v1  ;;  %2845 = vmatpush1.bf16.msra.mxu1 %v7566_v34  ;;  %v7576_v1 = vld [vmem:[#allocation69_spill] sm:$0xff]  ;;  %v7577_v34 = vld [vmem:[#allocation70_spill] sm:$0xff] }
 0x630   :  { %2805 = vmatprep.subr.bf16.mxu0 %v7567_v45  ;;  %2846 = vmatprep.subr.bf16.mxu1 %v7568_v62  ;;  %v7578_v45 = vld [vmem:[#allocation71_spill] sm:$0xff]  ;;  %v7579_v62 = vld [vmem:[#allocation72_spill] sm:$0xff] }
 0x633   :  { %2806 = vmatpush1.bf16.msra.mxu0 %v7569_v7  ;;  %2847 = vmatpush1.bf16.msra.mxu1 %v7570_v63  ;;  %v7580_v7 = vld [vmem:[#allocation73_spill] sm:$0xff]  ;;  %v7581_v63 = vld [vmem:[#allocation74_spill] sm:$0xff] }
 0x634   :  { %2807 = vmatprep.subr.bf16.mxu0 %v7571_v13  ;;  %2848 = vmatprep.subr.bf16.mxu1 %v7572_v42  ;;  %v7582_v13 = vld [vmem:[#allocation75_spill] sm:$0xff]  ;;  %v7583_v42 = vld [vmem:[#allocation76_spill] sm:$0xff] }
 0x637   :  { %2808 = vmatpush1.bf16.msra.mxu0 %v7573_v49  ;;  %2849 = vmatpush1.bf16.msra.mxu1 %v7574_v46  ;;  %v7584_v49 = vld [vmem:[#allocation77_spill] sm:$0xff]  ;;  %v7585_v46 = vld [vmem:[#allocation78_spill] sm:$0xff] }
 0x638   :  { %2809 = vmatprep.subr.bf16.mxu0 %v7575_v0  ;;  %2850 = vmatprep.subr.bf16.mxu1 %v7576_v1  ;;  %v7586_v0 = vld [vmem:[#allocation79_spill] sm:$0xff]  ;;  %v7587_v1 = vld [vmem:[#allocation80_spill] sm:$0xff] }
 0x63b   :  { %2810 = vmatpush1.bf16.msra.mxu0 %v7577_v34  ;;  %2851 = vmatpush1.bf16.msra.mxu1 %v7578_v45  ;;  %v7588_v34 = vld [vmem:[#allocation81_spill] sm:$0xff]  ;;  %v7589_v45 = vld [vmem:[#allocation82_spill] sm:$0xff] }
 0x63c   :  { %2811 = vmatprep.subr.bf16.mxu0 %v7579_v62  ;;  %2852 = vmatprep.subr.bf16.mxu1 %v7580_v7  ;;  %v7590_v62 = vld [vmem:[#allocation83_spill] sm:$0xff]  ;;  %v7591_v7 = vld [vmem:[#allocation84_spill] sm:$0xff] }
 0x63f   :  { %2812 = vmatpush1.bf16.msra.mxu0 %v7581_v63  ;;  %2853 = vmatpush1.bf16.msra.mxu1 %v7582_v13  ;;  %v7592_v63 = vld [vmem:[#allocation85_spill] sm:$0xff] }
 0x640   :  { %2813 = vmatprep.subr.bf16.mxu0 %v7583_v42  ;;  %2854 = vmatprep.subr.bf16.mxu1 %v7584_v49 }
 0x643   :  { %2814 = vmatpush1.bf16.msra.mxu0 %v7585_v46  ;;  %2855 = vmatpush1.bf16.msra.mxu1 %v7586_v0 }
 0x644   :  { %2815 = vmatprep.subr.bf16.mxu0 %v7587_v1  ;;  %2856 = vmatprep.subr.bf16.mxu1 %v7588_v34 }
 0x647   :  { %2816 = vmatpush1.bf16.msra.mxu0 %v7589_v45  ;;  %2857 = vmatpush1.bf16.msra.mxu1 %v7590_v62 }
 0x648   :  { %2867 = vmatprep.subr.bf16.mxu0 %v7591_v7  ;;  %2908 = vmatprep.subr.bf16.mxu1 %v7592_v63 }
 0x69d   :  { %v2601_v13 = vpop.f32.mrb[64].mxu0  ;;  %v2642_v42 = vpop.f32.mrb[64].mxu1 }
 0x69e   :  { %v2731_v49 = vadd.f32 %v2601_v13, %v7593_v25  ;;  %v2733_v46 = vadd.f32 %v2642_v42, %v7594_v57  ;;  %v2603_v47 = vpop.f32.mrb[65].mxu0  ;;  %v2644_v0 = vpop.f32.mrb[65].mxu1  ;;  %v7597_v13 = vld [vmem:[#allocation190_spill] sm:$0xff] }
 0x69f   :  { %v2732_v1 = vadd.f32 %v2603_v47, %v7595_v44  ;;  %v2734_v34 = vadd.f32 %v2644_v0, %v7596_v29  ;;  %v2605_v30 = vpop.f32.mrb[66].mxu0  ;;  %v2646_v45 = vpop.f32.mrb[66].mxu1 }
 0x6a0   :  { %v2606_v11 = vpop.f32.mrb[67].mxu0  ;;  %v2647_v62 = vpop.f32.mrb[67].mxu1  ;;  %v2741_v10 = vmul.f32 0.5, %v2733_v46  ;;  %v2739_v5 = vmul.f32 0.5, %v2731_v49  ;;  %v7599_v30 = vld [vmem:[#allocation192_spill] sm:$0xff] }
 0x6a1   :  { %v2742_v7 = vmul.f32 0.5, %v2734_v34  ;;  %v2740_v63 = vmul.f32 0.5, %v2732_v1  ;;  %v7600_v11 = vld [vmem:[#allocation193_spill] sm:$0xff] }
 0x6a2   :  { %4546 = vtanh.f32 %v2741_v10 }
 0x6a3   :  { %4548 = vtanh.f32 %v2742_v7 }
 0x6a4   :  { %4550 = vtanh.f32 %v2739_v5 }
 0x6a5   :  { %4552 = vtanh.f32 %v2740_v63 }
 0x6ac   :  { %v4547_v49 = vpop.eup %4546 }
 0x6ad   :  { %v4549_v5 = vpop.eup %4548  ;;  %v2753_v45 = vadd.f32 1.0, %v4547_v49 }
 0x6ae   :  { %v4551_v63 = vpop.eup %4550 }
 0x6af   :  { %v4553_v1 = vpop.eup %4552  ;;  %v2759_v41 = vmul.f32 0.5, %v2753_v45 }
 0x6b0   :  { %v2752_v9 = vadd.f32 1.0, %v4553_v1 }
 0x6dd   :  { %v2683_v25 = vpop.f32.mrb[68].mxu0  ;;  %v2724_v57 = vpop.f32.mrb[68].mxu1 }
 0x6de   :  { %v2735_v42 = vadd.f32 %v2683_v25, %v7597_v13  ;;  %v2737_v44 = vadd.f32 %v2724_v57, %v7598_v14  ;;  %v2685_v47 = vpop.f32.mrb[69].mxu0  ;;  %v2726_v29 = vpop.f32.mrb[69].mxu1  ;;  %v2754_v13 = vadd.f32 1.0, %v4549_v5  ;;  %v2751_v57 = vadd.f32 1.0, %v4551_v63 }
 0x6df   :  { %v2736_v0 = vadd.f32 %v2685_v47, %v7599_v30  ;;  %v2738_v62 = vadd.f32 %v2726_v29, %v7600_v11  ;;  %v2687_v46 = vpop.f32.mrb[70].mxu0  ;;  %v2728_v34 = vpop.f32.mrb[70].mxu1  ;;  %v2758_v11 = vmul.f32 0.5, %v2752_v9 }
 0x6e0   :  { %4554 = vtanh.f32 %v2737_v44  ;;  %v2688_v10 = vpop.f32.mrb[71].mxu0  ;;  %v2729_v7 = vpop.f32.mrb[71].mxu1  ;;  %v2743_v25 = vmul.f32 0.5, %v2735_v42  ;;  %v2760_v47 = vmul.f32 0.5, %v2754_v13  ;;  %v2757_v29 = vmul.f32 0.5, %v2751_v57  ;;  %v7602_v57 = vld [vmem:[#allocation126_spill] sm:$0xff] }
 0x6e1   :  { %4556 = vtanh.f32 %v2738_v62  ;;  %v2744_v14 = vmul.f32 0.5, %v2736_v0  ;;  %v2765_v46 = vmul.f32 %v2759_v41, %v6148_v50 }
 0x6e2   :  { %4558 = vtanh.f32 %v2743_v25  ;;  %v2766_v62 = vmul.f32 %v2760_v47, %v6150_v43  ;;  %v7603_v47 = vld [vmem:[#allocation127_spill] sm:$0xff] }
 0x6e3   :  { %4560 = vtanh.f32 %v2744_v14  ;;  %v7601_v14 = vld [vmem:[#allocation125_spill] sm:$0xff] }
 0x6ea   :  { %v4555_v30 = vpop.eup %4554 }
 0x6eb   :  { %v4557_v44 = vpop.eup %4556  ;;  %v2767_v34 = vmul.f32 %v4555_v30, %v2757_v29  ;;  %v7604_v29 = vld [vmem:[#allocation128_spill] sm:$0xff]  ;;  %v7605_v30 = vld [vmem:[#allocation129_spill] sm:$0xff] }
 0x6ec   :  { %v2768_v10 = vmul.f32 %v4557_v44, %v2758_v11  ;;  %v4559_v0 = vpop.eup %4558  ;;  %v7606_v11 = vld [vmem:[#allocation130_spill] sm:$0xff]  ;;  %v7607_v44 = vld [vmem:[#allocation131_spill] sm:$0xff] }
 0x6ed   :  { %v6298_v49 = vadd.f32 %v2767_v34, %v2765_v46  ;;  %v4561_v7 = vpop.eup %4560  ;;  %v2755_v5 = vadd.f32 1.0, %v4559_v0  ;;  %v7608_v46 = vld [vmem:[#allocation132_spill] sm:$0xff]  ;;  %v7609_v34 = vld [vmem:[#allocation133_spill] sm:$0xff] }
 0x6ee   :  { %v6300_v42 = vadd.f32 %v2768_v10, %v2766_v62  ;;  %v2756_v63 = vadd.f32 1.0, %v4561_v7  ;;  %v7610_v62 = vld [vmem:[#allocation134_spill] sm:$0xff]  ;;  %v7611_v10 = vld [vmem:[#allocation135_spill] sm:$0xff]  ;;  %v7612_v0 = vld [vmem:[#allocation136_spill] sm:$0xff] }
 0x6ef   :  { %4562 = vtanh.f32 %v6298_v49  ;;  %v2761_v9 = vmul.f32 0.5, %v2755_v5  ;;  %v7613_v7 = vld [vmem:[#allocation137_spill] sm:$0xff]  ;;  %v7614_v5 = vld [vmem:[#allocation138_spill] sm:$0xff] }
 0x6f0   :  { %4564 = vtanh.f32 %v6300_v42  ;;  %v2762_v45 = vmul.f32 0.5, %v2756_v63  ;;  %v7615_v63 = vld [vmem:[#allocation139_spill] sm:$0xff] }
 0x6f9   :  { %v4563_v1 = vpop.eup %4562 }
 0x6fa   :  { %v4565_v50 = vpop.eup %4564  ;;  %v2773_v41 = vmul.f32 %v4563_v1, %v2761_v9  ;;  %v7616_v9 = vld [vmem:[#allocation140_spill] sm:$0xff]  ;;  %v7617_v1 = vld [vmem:[#allocation141_spill] sm:$0xff] }
 0x6fb   :  { %v2774_v25 = vmul.f32 %v4565_v50, %v2762_v45  ;;  %v7618_v45 = vld [vmem:[#allocation142_spill] sm:$0xff]  ;;  %v7619_v50 = vld [vmem:[#allocation143_spill] sm:$0xff] }
 0x6fc   :  { %v6304_v13 = vpack.c.bf16 %v2773_v41, %v2773_v41  ;;  %v7620_v41 = vld [vmem:[#allocation144_spill] sm:$0xff] }
 0x6fd   :  { %v2784_v43 = vpack.c.bf16 %v2774_v25, %v2774_v25  ;;  %v7621_v25 = vld [vmem:[#allocation145_spill] sm:$0xff] }
 0x6ff   :  { %2817 = vmatprep.mubr.bf16.mxu0 %v2784_v43  ;;  %2858 = vmatprep.mubr.bf16.mxu1 %v2784_v43 }
 0x700   :  { %2818 = vmatmul.mubr.bf16.vlgmr.msra.gmra.mrb[72].mxu0 %v6304_v13  ;;  %2859 = vmatmul.mubr.bf16.vlgmr.msra.gmra.mrb[72].mxu1 %v6304_v13 }
 0x701   :  { %2868 = vmatpush1.bf16.msra.mxu0 %v7207_v53  ;;  %2909 = vmatpush1.bf16.msra.mxu1 %v7208_v23 }
 0x702   :  { %2899 = vmatprep.mubr.bf16.mxu0 %v2784_v43  ;;  %2940 = vmatprep.mubr.bf16.mxu1 %v2784_v43  ;;  %v7622_v43 = vld [vmem:[#allocation146_spill] sm:$0xff] }
 0x703   :  { %2869 = vmatprep.subr.bf16.mxu0 %v7209_v24  ;;  %2910 = vmatprep.subr.bf16.mxu1 %v7210_v19 }
 0x705   :  { %2870 = vmatpush1.bf16.msra.mxu0 %v7211_v33  ;;  %2911 = vmatpush1.bf16.msra.mxu1 %v7212_v15 }
 0x706   :  { %2871 = vmatprep.subr.bf16.mxu0 %v7213_v22  ;;  %2912 = vmatprep.subr.bf16.mxu1 %v7214_v18 }
 0x709   :  { %2872 = vmatpush1.bf16.msra.mxu0 %v7215_v60  ;;  %2913 = vmatpush1.bf16.msra.mxu1 %v7216_v40 }
 0x70a   :  { %2873 = vmatprep.subr.bf16.mxu0 %v7217_v52  ;;  %2914 = vmatprep.subr.bf16.mxu1 %v7218_v37 }
 0x70d   :  { %2874 = vmatpush1.bf16.msra.mxu0 %v7219_v48  ;;  %2915 = vmatpush1.bf16.msra.mxu1 %v7220_v59 }
 0x70e   :  { %2875 = vmatprep.subr.bf16.mxu0 %v7221_v56  ;;  %2916 = vmatprep.subr.bf16.mxu1 %v7222_v8 }
 0x711   :  { %2876 = vmatpush1.bf16.msra.mxu0 %v7223_v3  ;;  %2917 = vmatpush1.bf16.msra.mxu1 %v7310_v20 }
 0x712   :  { %2877 = vmatprep.subr.bf16.mxu0 %v7311_v39  ;;  %2918 = vmatprep.subr.bf16.mxu1 %v7312_v38 }
 0x715   :  { %2878 = vmatpush1.bf16.msra.mxu0 %v7313_v32  ;;  %2919 = vmatpush1.bf16.msra.mxu1 %v7314_v28 }
 0x716   :  { %2879 = vmatprep.subr.bf16.mxu0 %v7315_v27  ;;  %2920 = vmatprep.subr.bf16.mxu1 %v7316_v35 }
 0x719   :  { %2880 = vmatpush1.bf16.msra.mxu0 %v7317_v51  ;;  %2921 = vmatpush1.bf16.msra.mxu1 %v7318_v58 }
 0x71a   :  { %2881 = vmatprep.subr.bf16.mxu0 %v7319_v31  ;;  %2922 = vmatprep.subr.bf16.mxu1 %v7320_v26 }
 0x71d   :  { %2882 = vmatpush1.bf16.msra.mxu0 %v7321_v54  ;;  %2923 = vmatpush1.bf16.msra.mxu1 %v7322_v55 }
 0x71e   :  { %2883 = vmatprep.subr.bf16.mxu0 %v7323_v21  ;;  %2924 = vmatprep.subr.bf16.mxu1 %v7324_v12 }
 0x721   :  { %2884 = vmatpush1.bf16.msra.mxu0 %v7325_v4  ;;  %2925 = vmatpush1.bf16.msra.mxu1 %v7326_v61 }
 0x722   :  { %2885 = vmatprep.subr.bf16.mxu0 %v7327_v6  ;;  %2926 = vmatprep.subr.bf16.mxu1 %v7328_v17 }
 0x725   :  { %2886 = vmatpush1.bf16.msra.mxu0 %v7329_v2  ;;  %2927 = vmatpush1.bf16.msra.mxu1 %v7244_v36 }
 0x726   :  { %2887 = vmatprep.subr.bf16.mxu0 %v7245_v16  ;;  %2928 = vmatprep.subr.bf16.mxu1 %v7601_v14 }
 0x729   :  { %2888 = vmatpush1.bf16.msra.mxu0 %v7602_v57  ;;  %2929 = vmatpush1.bf16.msra.mxu1 %v7603_v47  ;;  %v7695_v47 = vld [vmem:[#allocation195_spill] sm:$0xff] }
 0x72a   :  { %2889 = vmatprep.subr.bf16.mxu0 %v7604_v29  ;;  %2930 = vmatprep.subr.bf16.mxu1 %v7605_v30 }
 0x72d   :  { %2890 = vmatpush1.bf16.msra.mxu0 %v7606_v11  ;;  %2931 = vmatpush1.bf16.msra.mxu1 %v7607_v44 }
 0x72e   :  { %2891 = vmatprep.subr.bf16.mxu0 %v7608_v46  ;;  %2932 = vmatprep.subr.bf16.mxu1 %v7609_v34  ;;  %v7692_v34 = vld [vmem:[#allocation168_spill] sm:$0xff]  ;;  %v7693_v46 = vld [vmem:[#allocation169_spill] sm:$0xff] }
 0x731   :  { %2892 = vmatpush1.bf16.msra.mxu0 %v7610_v62  ;;  %2933 = vmatpush1.bf16.msra.mxu1 %v7611_v10  ;;  %v7691_v10 = vld [vmem:[#allocation167_spill] sm:$0xff] }
 0x732   :  { %2893 = vmatprep.subr.bf16.mxu0 %v7612_v0  ;;  %2934 = vmatprep.subr.bf16.mxu1 %v7613_v7  ;;  %v7623_v0 = vld [vmem:[#allocation147_spill] sm:$0xff]  ;;  %v7624_v7 = vld [vmem:[#allocation20_spill] sm:$0xff] }
 0x735   :  { %2894 = vmatpush1.bf16.msra.mxu0 %v7614_v5  ;;  %2935 = vmatpush1.bf16.msra.mxu1 %v7615_v63  ;;  %v7625_v5 = vld [vmem:[#allocation21_spill] sm:$0xff]  ;;  %v7690_v63 = vld [vmem:[#allocation166_spill] sm:$0xff] }
 0x736   :  { %2895 = vmatprep.subr.bf16.mxu0 %v7616_v9  ;;  %2936 = vmatprep.subr.bf16.mxu1 %v7617_v1  ;;  %v7626_v1 = vld [vmem:[#allocation22_spill] sm:$0xff]  ;;  %v7635_v9 = vld [vmem:[#allocation31_spill] sm:$0xff] }
 0x739   :  { %2896 = vmatpush1.bf16.msra.mxu0 %v7618_v45  ;;  %2937 = vmatpush1.bf16.msra.mxu1 %v7619_v50  ;;  %v7627_v45 = vld [vmem:[#allocation23_spill] sm:$0xff]  ;;  %v7628_v50 = vld [vmem:[#allocation24_spill] sm:$0xff] }
 0x73a   :  { %2897 = vmatprep.subr.bf16.mxu0 %v7620_v41  ;;  %2938 = vmatprep.subr.bf16.mxu1 %v7621_v25  ;;  %v7629_v41 = vld [vmem:[#allocation25_spill] sm:$0xff]  ;;  %v7630_v25 = vld [vmem:[#allocation26_spill] sm:$0xff] }
 0x73d   :  { %2898 = vmatpush1.bf16.msra.mxu0 %v7622_v43  ;;  %2939 = vmatpush1.bf16.msra.mxu1 %v7623_v0  ;;  %v7631_v43 = vld [vmem:[#allocation27_spill] sm:$0xff]  ;;  %v7632_v0 = vld [vmem:[#allocation28_spill] sm:$0xff] }
 0x73e   :  { %3003 = vmatprep.subr.bf16.mxu0 %v7624_v7  ;;  %3044 = vmatprep.subr.bf16.mxu1 %v7625_v5  ;;  %v7633_v7 = vld [vmem:[#allocation29_spill] sm:$0xff]  ;;  %v7634_v5 = vld [vmem:[#allocation30_spill] sm:$0xff] }
 0x740   :  { %2900 = vmatmul.mubr.bf16.vlgmr.msra.gmra.mrb[76].mxu0 %v6304_v13  ;;  %2941 = vmatmul.mubr.bf16.vlgmr.msra.gmra.mrb[76].mxu1 %v6304_v13  ;;  %v7636_v13 = vld [vmem:[#allocation32_spill] sm:$0xff] }
 0x741   :  { %3004 = vmatpush1.bf16.msra.mxu0 %v7626_v1  ;;  %3045 = vmatpush1.bf16.msra.mxu1 %v7627_v45  ;;  %v7637_v1 = vld [vmem:[#allocation33_spill] sm:$0xff]  ;;  %v7638_v45 = vld [vmem:[#allocation34_spill] sm:$0xff] }
 0x742   :  { %3005 = vmatprep.subr.bf16.mxu0 %v7628_v50  ;;  %3046 = vmatprep.subr.bf16.mxu1 %v7629_v41  ;;  %v7639_v50 = vld [vmem:[#allocation35_spill] sm:$0xff]  ;;  %v7640_v41 = vld [vmem:[#allocation36_spill] sm:$0xff] }
 0x745   :  { %3006 = vmatpush1.bf16.msra.mxu0 %v7630_v25  ;;  %3047 = vmatpush1.bf16.msra.mxu1 %v7631_v43  ;;  %v7641_v25 = vld [vmem:[#allocation37_spill] sm:$0xff]  ;;  %v7642_v43 = vld [vmem:[#allocation38_spill] sm:$0xff] }
 0x746   :  { %3007 = vmatprep.subr.bf16.mxu0 %v7632_v0  ;;  %3048 = vmatprep.subr.bf16.mxu1 %v7633_v7  ;;  %v7643_v0 = vld [vmem:[#allocation39_spill] sm:$0xff]  ;;  %v7644_v7 = vld [vmem:[#allocation40_spill] sm:$0xff] }
 0x749   :  { %3008 = vmatpush1.bf16.msra.mxu0 %v7634_v5  ;;  %3049 = vmatpush1.bf16.msra.mxu1 %v7635_v9  ;;  %v7645_v5 = vld [vmem:[#allocation41_spill] sm:$0xff]  ;;  %v7646_v9 = vld [vmem:[#allocation42_spill] sm:$0xff] }
 0x74a   :  { %3009 = vmatprep.subr.bf16.mxu0 %v7636_v13  ;;  %3050 = vmatprep.subr.bf16.mxu1 %v7637_v1  ;;  %v7647_v13 = vld [vmem:[#allocation43_spill] sm:$0xff]  ;;  %v7648_v1 = vld [vmem:[#allocation44_spill] sm:$0xff] }
 0x74d   :  { %3010 = vmatpush1.bf16.msra.mxu0 %v7638_v45  ;;  %3051 = vmatpush1.bf16.msra.mxu1 %v7639_v50  ;;  %v7649_v45 = vld [vmem:[#allocation45_spill] sm:$0xff]  ;;  %v7650_v50 = vld [vmem:[#allocation46_spill] sm:$0xff] }
 0x74e   :  { %3011 = vmatprep.subr.bf16.mxu0 %v7640_v41  ;;  %3052 = vmatprep.subr.bf16.mxu1 %v7641_v25  ;;  %v7651_v41 = vld [vmem:[#allocation47_spill] sm:$0xff]  ;;  %v7652_v25 = vld [vmem:[#allocation48_spill] sm:$0xff] }
 0x751   :  { %3012 = vmatpush1.bf16.msra.mxu0 %v7642_v43  ;;  %3053 = vmatpush1.bf16.msra.mxu1 %v7643_v0  ;;  %v7653_v43 = vld [vmem:[#allocation49_spill] sm:$0xff]  ;;  %v7654_v0 = vld [vmem:[#allocation50_spill] sm:$0xff] }
 0x752   :  { %3013 = vmatprep.subr.bf16.mxu0 %v7644_v7  ;;  %3054 = vmatprep.subr.bf16.mxu1 %v7645_v5  ;;  %v7655_v7 = vld [vmem:[#allocation51_spill] sm:$0xff]  ;;  %v7656_v5 = vld [vmem:[#allocation52_spill] sm:$0xff] }
 0x755   :  { %3014 = vmatpush1.bf16.msra.mxu0 %v7646_v9  ;;  %3055 = vmatpush1.bf16.msra.mxu1 %v7647_v13  ;;  %v7657_v9 = vld [vmem:[#allocation53_spill] sm:$0xff]  ;;  %v7658_v13 = vld [vmem:[#allocation54_spill] sm:$0xff] }
 0x756   :  { %3015 = vmatprep.subr.bf16.mxu0 %v7648_v1  ;;  %3056 = vmatprep.subr.bf16.mxu1 %v7649_v45  ;;  %v7659_v1 = vld [vmem:[#allocation55_spill] sm:$0xff]  ;;  %v7660_v45 = vld [vmem:[#allocation56_spill] sm:$0xff] }
 0x759   :  { %3016 = vmatpush1.bf16.msra.mxu0 %v7650_v50  ;;  %3057 = vmatpush1.bf16.msra.mxu1 %v7651_v41  ;;  %v7661_v50 = vld [vmem:[#allocation57_spill] sm:$0xff]  ;;  %v7662_v41 = vld [vmem:[#allocation58_spill] sm:$0xff] }
 0x75a   :  { %3017 = vmatprep.subr.bf16.mxu0 %v7652_v25  ;;  %3058 = vmatprep.subr.bf16.mxu1 %v7653_v43  ;;  %v7663_v25 = vld [vmem:[#allocation59_spill] sm:$0xff]  ;;  %v7664_v43 = vld [vmem:[#allocation60_spill] sm:$0xff] }
 0x75d   :  { %3018 = vmatpush1.bf16.msra.mxu0 %v7654_v0  ;;  %3059 = vmatpush1.bf16.msra.mxu1 %v7655_v7  ;;  %v7665_v0 = vld [vmem:[#allocation61_spill] sm:$0xff]  ;;  %v7666_v7 = vld [vmem:[#allocation62_spill] sm:$0xff] }
 0x75e   :  { %3019 = vmatprep.subr.bf16.mxu0 %v7656_v5  ;;  %3060 = vmatprep.subr.bf16.mxu1 %v7657_v9  ;;  %v7667_v5 = vld [vmem:[#allocation63_spill] sm:$0xff]  ;;  %v7668_v9 = vld [vmem:[#allocation64_spill] sm:$0xff] }
 0x761   :  { %3020 = vmatpush1.bf16.msra.mxu0 %v7658_v13  ;;  %3061 = vmatpush1.bf16.msra.mxu1 %v7659_v1  ;;  %v7669_v13 = vld [vmem:[#allocation65_spill] sm:$0xff]  ;;  %v7670_v1 = vld [vmem:[#allocation66_spill] sm:$0xff] }
 0x762   :  { %3021 = vmatprep.subr.bf16.mxu0 %v7660_v45  ;;  %3062 = vmatprep.subr.bf16.mxu1 %v7661_v50  ;;  %v7671_v45 = vld [vmem:[#allocation67_spill] sm:$0xff]  ;;  %v7672_v50 = vld [vmem:[#allocation68_spill] sm:$0xff] }
 0x765   :  { %3022 = vmatpush1.bf16.msra.mxu0 %v7662_v41  ;;  %3063 = vmatpush1.bf16.msra.mxu1 %v7663_v25  ;;  %v7673_v41 = vld [vmem:[#allocation69_spill] sm:$0xff]  ;;  %v7674_v25 = vld [vmem:[#allocation70_spill] sm:$0xff] }
 0x766   :  { %3023 = vmatprep.subr.bf16.mxu0 %v7664_v43  ;;  %3064 = vmatprep.subr.bf16.mxu1 %v7665_v0  ;;  %v7675_v43 = vld [vmem:[#allocation71_spill] sm:$0xff]  ;;  %v7676_v0 = vld [vmem:[#allocation72_spill] sm:$0xff] }
 0x769   :  { %3024 = vmatpush1.bf16.msra.mxu0 %v7666_v7  ;;  %3065 = vmatpush1.bf16.msra.mxu1 %v7667_v5  ;;  %v7677_v7 = vld [vmem:[#allocation73_spill] sm:$0xff]  ;;  %v7678_v5 = vld [vmem:[#allocation74_spill] sm:$0xff] }
 0x76a   :  { %3025 = vmatprep.subr.bf16.mxu0 %v7668_v9  ;;  %3066 = vmatprep.subr.bf16.mxu1 %v7669_v13  ;;  %v7679_v9 = vld [vmem:[#allocation75_spill] sm:$0xff]  ;;  %v7680_v13 = vld [vmem:[#allocation76_spill] sm:$0xff] }
 0x76d   :  { %3026 = vmatpush1.bf16.msra.mxu0 %v7670_v1  ;;  %3067 = vmatpush1.bf16.msra.mxu1 %v7671_v45  ;;  %v7681_v1 = vld [vmem:[#allocation77_spill] sm:$0xff]  ;;  %v7682_v45 = vld [vmem:[#allocation78_spill] sm:$0xff] }
 0x76e   :  { %3027 = vmatprep.subr.bf16.mxu0 %v7672_v50  ;;  %3068 = vmatprep.subr.bf16.mxu1 %v7673_v41  ;;  %v7683_v50 = vld [vmem:[#allocation79_spill] sm:$0xff]  ;;  %v7684_v41 = vld [vmem:[#allocation80_spill] sm:$0xff] }
 0x771   :  { %3028 = vmatpush1.bf16.msra.mxu0 %v7674_v25  ;;  %3069 = vmatpush1.bf16.msra.mxu1 %v7675_v43  ;;  %v7685_v25 = vld [vmem:[#allocation81_spill] sm:$0xff]  ;;  %v7686_v43 = vld [vmem:[#allocation82_spill] sm:$0xff] }
 0x772   :  { %3029 = vmatprep.subr.bf16.mxu0 %v7676_v0  ;;  %3070 = vmatprep.subr.bf16.mxu1 %v7677_v7  ;;  %v7687_v0 = vld [vmem:[#allocation83_spill] sm:$0xff]  ;;  %v7688_v7 = vld [vmem:[#allocation84_spill] sm:$0xff] }
 0x775   :  { %3030 = vmatpush1.bf16.msra.mxu0 %v7678_v5  ;;  %3071 = vmatpush1.bf16.msra.mxu1 %v7679_v9  ;;  %v7689_v5 = vld [vmem:[#allocation85_spill] sm:$0xff] }
 0x776   :  { %3031 = vmatprep.subr.bf16.mxu0 %v7680_v13  ;;  %3072 = vmatprep.subr.bf16.mxu1 %v7681_v1 }
 0x779   :  { %3032 = vmatpush1.bf16.msra.mxu0 %v7682_v45  ;;  %3073 = vmatpush1.bf16.msra.mxu1 %v7683_v50 }
 0x77a   :  { %3033 = vmatprep.subr.bf16.mxu0 %v7684_v41  ;;  %3074 = vmatprep.subr.bf16.mxu1 %v7685_v25 }
 0x77d   :  { %3034 = vmatpush1.bf16.msra.mxu0 %v7686_v43  ;;  %3075 = vmatpush1.bf16.msra.mxu1 %v7687_v0 }
 0x77e   :  { %3085 = vmatprep.subr.bf16.mxu0 %v7688_v7  ;;  %3126 = vmatprep.subr.bf16.mxu1 %v7689_v5 }
 0x7d3   :  { %v2819_v9 = vpop.f32.mrb[72].mxu0  ;;  %v2860_v13 = vpop.f32.mrb[72].mxu1 }
 0x7d4   :  { %v2949_v1 = vadd.f32 %v2819_v9, %v7690_v63  ;;  %v2951_v45 = vadd.f32 %v2860_v13, %v7691_v10  ;;  %v2821_v62 = vpop.f32.mrb[73].mxu0  ;;  %v2862_v50 = vpop.f32.mrb[73].mxu1  ;;  %v7694_v9 = vld [vmem:[#allocation194_spill] sm:$0xff] }
 0x7d5   :  { %v2950_v41 = vadd.f32 %v2821_v62, %v7692_v34  ;;  %v2952_v25 = vadd.f32 %v2862_v50, %v7693_v46  ;;  %v2823_v44 = vpop.f32.mrb[74].mxu0  ;;  %v2864_v43 = vpop.f32.mrb[74].mxu1 }
 0x7d6   :  { %v2824_v11 = vpop.f32.mrb[75].mxu0  ;;  %v2865_v0 = vpop.f32.mrb[75].mxu1  ;;  %v2959_v30 = vmul.f32 0.5, %v2951_v45  ;;  %v2957_v29 = vmul.f32 0.5, %v2949_v1  ;;  %v7696_v44 = vld [vmem:[#allocation196_spill] sm:$0xff] }
 0x7d7   :  { %v2960_v7 = vmul.f32 0.5, %v2952_v25  ;;  %v2958_v5 = vmul.f32 0.5, %v2950_v41  ;;  %v7697_v11 = vld [vmem:[#allocation197_spill] sm:$0xff] }
 0x7d8   :  { %4566 = vtanh.f32 %v2959_v30 }
 0x7d9   :  { %4568 = vtanh.f32 %v2960_v7 }
 0x7da   :  { %4570 = vtanh.f32 %v2957_v29 }
 0x7db   :  { %4572 = vtanh.f32 %v2958_v5 }
 0x7e2   :  { %v4567_v1 = vpop.eup %4566 }
 0x7e3   :  { %v4569_v29 = vpop.eup %4568  ;;  %v2971_v43 = vadd.f32 1.0, %v4567_v1 }
 0x7e4   :  { %v4571_v5 = vpop.eup %4570 }
 0x7e5   :  { %v4573_v41 = vpop.eup %4572  ;;  %v2977_v14 = vmul.f32 0.5, %v2971_v43 }
 0x7e6   :  { %v2970_v57 = vadd.f32 1.0, %v4573_v41 }
 0x813   :  { %v2901_v63 = vpop.f32.mrb[76].mxu0  ;;  %v2942_v10 = vpop.f32.mrb[76].mxu1 }
 0x814   :  { %v2953_v13 = vadd.f32 %v2901_v63, %v7694_v9  ;;  %v2955_v34 = vadd.f32 %v2942_v10, %v7695_v47  ;;  %v2903_v62 = vpop.f32.mrb[77].mxu0  ;;  %v2944_v46 = vpop.f32.mrb[77].mxu1  ;;  %v2972_v9 = vadd.f32 1.0, %v4569_v29  ;;  %v2969_v10 = vadd.f32 1.0, %v4571_v5 }
 0x815   :  { %v2954_v50 = vadd.f32 %v2903_v62, %v7696_v44  ;;  %v2956_v0 = vadd.f32 %v2944_v46, %v7697_v11  ;;  %v2905_v45 = vpop.f32.mrb[78].mxu0  ;;  %v2946_v25 = vpop.f32.mrb[78].mxu1  ;;  %v2976_v11 = vmul.f32 0.5, %v2970_v57 }
 0x816   :  { %4574 = vtanh.f32 %v2955_v34  ;;  %v2906_v30 = vpop.f32.mrb[79].mxu0  ;;  %v2947_v7 = vpop.f32.mrb[79].mxu1  ;;  %v2961_v63 = vmul.f32 0.5, %v2953_v13  ;;  %v2978_v62 = vmul.f32 0.5, %v2972_v9  ;;  %v2975_v46 = vmul.f32 0.5, %v2969_v10  ;;  %v7699_v10 = vld [vmem:[#allocation126_spill] sm:$0xff] }
 0x817   :  { %4576 = vtanh.f32 %v2956_v0  ;;  %v2962_v47 = vmul.f32 0.5, %v2954_v50  ;;  %v2983_v45 = vmul.f32 %v2977_v14, %v6298_v49 }
 0x818   :  { %4578 = vtanh.f32 %v2961_v63  ;;  %v2984_v0 = vmul.f32 %v2978_v62, %v6300_v42  ;;  %v7700_v62 = vld [vmem:[#allocation127_spill] sm:$0xff] }
 0x819   :  { %4580 = vtanh.f32 %v2962_v47  ;;  %v7698_v47 = vld [vmem:[#allocation125_spill] sm:$0xff] }
 0x820   :  { %v4575_v44 = vpop.eup %4574 }
 0x821   :  { %v4577_v34 = vpop.eup %4576  ;;  %v2985_v25 = vmul.f32 %v4575_v44, %v2975_v46  ;;  %v7701_v46 = vld [vmem:[#allocation128_spill] sm:$0xff]  ;;  %v7702_v44 = vld [vmem:[#allocation129_spill] sm:$0xff] }
 0x822   :  { %v2986_v30 = vmul.f32 %v4577_v34, %v2976_v11  ;;  %v4579_v50 = vpop.eup %4578  ;;  %v7703_v11 = vld [vmem:[#allocation130_spill] sm:$0xff]  ;;  %v7704_v34 = vld [vmem:[#allocation131_spill] sm:$0xff] }
 0x823   :  { %v6448_v1 = vadd.f32 %v2985_v25, %v2983_v45  ;;  %v4581_v7 = vpop.eup %4580  ;;  %v2973_v29 = vadd.f32 1.0, %v4579_v50  ;;  %v7705_v45 = vld [vmem:[#allocation132_spill] sm:$0xff]  ;;  %v7706_v25 = vld [vmem:[#allocation133_spill] sm:$0xff] }
 0x824   :  { %v6450_v13 = vadd.f32 %v2986_v30, %v2984_v0  ;;  %v2974_v5 = vadd.f32 1.0, %v4581_v7  ;;  %v7707_v0 = vld [vmem:[#allocation134_spill] sm:$0xff]  ;;  %v7708_v30 = vld [vmem:[#allocation135_spill] sm:$0xff]  ;;  %v7709_v50 = vld [vmem:[#allocation136_spill] sm:$0xff] }
 0x825   :  { %4582 = vtanh.f32 %v6448_v1  ;;  %v2979_v57 = vmul.f32 0.5, %v2973_v29  ;;  %v7710_v7 = vld [vmem:[#allocation137_spill] sm:$0xff]  ;;  %v7711_v29 = vld [vmem:[#allocation138_spill] sm:$0xff] }
 0x826   :  { %4584 = vtanh.f32 %v6450_v13  ;;  %v2980_v43 = vmul.f32 0.5, %v2974_v5  ;;  %v7712_v5 = vld [vmem:[#allocation139_spill] sm:$0xff] }
 0x82f   :  { %v4583_v41 = vpop.eup %4582 }
 0x830   :  { %v4585_v49 = vpop.eup %4584  ;;  %v2991_v14 = vmul.f32 %v4583_v41, %v2979_v57  ;;  %v7713_v57 = vld [vmem:[#allocation140_spill] sm:$0xff]  ;;  %v7714_v41 = vld [vmem:[#allocation141_spill] sm:$0xff] }
 0x831   :  { %v2992_v63 = vmul.f32 %v4585_v49, %v2980_v43  ;;  %v7715_v43 = vld [vmem:[#allocation142_spill] sm:$0xff]  ;;  %v7716_v49 = vld [vmem:[#allocation143_spill] sm:$0xff] }
 0x832   :  { %v6454_v9 = vpack.c.bf16 %v2991_v14, %v2991_v14  ;;  %v7717_v14 = vld [vmem:[#allocation144_spill] sm:$0xff] }
 0x833   :  { %v3002_v42 = vpack.c.bf16 %v2992_v63, %v2992_v63  ;;  %v7718_v63 = vld [vmem:[#allocation145_spill] sm:$0xff] }
 0x835   :  { %3035 = vmatprep.mubr.bf16.mxu0 %v3002_v42  ;;  %3076 = vmatprep.mubr.bf16.mxu1 %v3002_v42 }
 0x836   :  { %3036 = vmatmul.mubr.bf16.vlgmr.msra.gmra.mrb[80].mxu0 %v6454_v9  ;;  %3077 = vmatmul.mubr.bf16.vlgmr.msra.gmra.mrb[80].mxu1 %v6454_v9 }
 0x837   :  { %3086 = vmatpush1.bf16.msra.mxu0 %v7207_v53  ;;  %3127 = vmatpush1.bf16.msra.mxu1 %v7208_v23 }
 0x838   :  { %3117 = vmatprep.mubr.bf16.mxu0 %v3002_v42  ;;  %3158 = vmatprep.mubr.bf16.mxu1 %v3002_v42  ;;  %v7719_v42 = vld [vmem:[#allocation146_spill] sm:$0xff] }
 0x839   :  { %3087 = vmatprep.subr.bf16.mxu0 %v7209_v24  ;;  %3128 = vmatprep.subr.bf16.mxu1 %v7210_v19 }
 0x83b   :  { %3088 = vmatpush1.bf16.msra.mxu0 %v7211_v33  ;;  %3129 = vmatpush1.bf16.msra.mxu1 %v7212_v15 }
 0x83c   :  { %3089 = vmatprep.subr.bf16.mxu0 %v7213_v22  ;;  %3130 = vmatprep.subr.bf16.mxu1 %v7214_v18 }
 0x83f   :  { %3090 = vmatpush1.bf16.msra.mxu0 %v7215_v60  ;;  %3131 = vmatpush1.bf16.msra.mxu1 %v7216_v40 }
 0x840   :  { %3091 = vmatprep.subr.bf16.mxu0 %v7217_v52  ;;  %3132 = vmatprep.subr.bf16.mxu1 %v7218_v37 }
 0x843   :  { %3092 = vmatpush1.bf16.msra.mxu0 %v7219_v48  ;;  %3133 = vmatpush1.bf16.msra.mxu1 %v7220_v59 }
 0x844   :  { %3093 = vmatprep.subr.bf16.mxu0 %v7221_v56  ;;  %3134 = vmatprep.subr.bf16.mxu1 %v7222_v8 }
 0x847   :  { %3094 = vmatpush1.bf16.msra.mxu0 %v7223_v3  ;;  %3135 = vmatpush1.bf16.msra.mxu1 %v7310_v20 }
 0x848   :  { %3095 = vmatprep.subr.bf16.mxu0 %v7311_v39  ;;  %3136 = vmatprep.subr.bf16.mxu1 %v7312_v38 }
 0x84b   :  { %3096 = vmatpush1.bf16.msra.mxu0 %v7313_v32  ;;  %3137 = vmatpush1.bf16.msra.mxu1 %v7314_v28 }
 0x84c   :  { %3097 = vmatprep.subr.bf16.mxu0 %v7315_v27  ;;  %3138 = vmatprep.subr.bf16.mxu1 %v7316_v35 }
 0x84f   :  { %3098 = vmatpush1.bf16.msra.mxu0 %v7317_v51  ;;  %3139 = vmatpush1.bf16.msra.mxu1 %v7318_v58 }
 0x850   :  { %3099 = vmatprep.subr.bf16.mxu0 %v7319_v31  ;;  %3140 = vmatprep.subr.bf16.mxu1 %v7320_v26 }
 0x853   :  { %3100 = vmatpush1.bf16.msra.mxu0 %v7321_v54  ;;  %3141 = vmatpush1.bf16.msra.mxu1 %v7322_v55 }
 0x854   :  { %3101 = vmatprep.subr.bf16.mxu0 %v7323_v21  ;;  %3142 = vmatprep.subr.bf16.mxu1 %v7324_v12 }
 0x857   :  { %3102 = vmatpush1.bf16.msra.mxu0 %v7325_v4  ;;  %3143 = vmatpush1.bf16.msra.mxu1 %v7326_v61 }
 0x858   :  { %3103 = vmatprep.subr.bf16.mxu0 %v7327_v6  ;;  %3144 = vmatprep.subr.bf16.mxu1 %v7328_v17 }
 0x85b   :  { %3104 = vmatpush1.bf16.msra.mxu0 %v7329_v2  ;;  %3145 = vmatpush1.bf16.msra.mxu1 %v7244_v36 }
 0x85c   :  { %3105 = vmatprep.subr.bf16.mxu0 %v7245_v16  ;;  %3146 = vmatprep.subr.bf16.mxu1 %v7698_v47 }
 0x85f   :  { %3106 = vmatpush1.bf16.msra.mxu0 %v7699_v10  ;;  %3147 = vmatpush1.bf16.msra.mxu1 %v7700_v62  ;;  %v7792_v62 = vld [vmem:[#allocation199_spill] sm:$0xff] }
 0x860   :  { %3107 = vmatprep.subr.bf16.mxu0 %v7701_v46  ;;  %3148 = vmatprep.subr.bf16.mxu1 %v7702_v44 }
 0x863   :  { %3108 = vmatpush1.bf16.msra.mxu0 %v7703_v11  ;;  %3149 = vmatpush1.bf16.msra.mxu1 %v7704_v34 }
 0x864   :  { %3109 = vmatprep.subr.bf16.mxu0 %v7705_v45  ;;  %3150 = vmatprep.subr.bf16.mxu1 %v7706_v25  ;;  %v7789_v25 = vld [vmem:[#allocation172_spill] sm:$0xff]  ;;  %v7790_v45 = vld [vmem:[#allocation173_spill] sm:$0xff] }
 0x867   :  { %3110 = vmatpush1.bf16.msra.mxu0 %v7707_v0  ;;  %3151 = vmatpush1.bf16.msra.mxu1 %v7708_v30  ;;  %v7788_v30 = vld [vmem:[#allocation171_spill] sm:$0xff] }
 0x868   :  { %3111 = vmatprep.subr.bf16.mxu0 %v7709_v50  ;;  %3152 = vmatprep.subr.bf16.mxu1 %v7710_v7  ;;  %v7720_v50 = vld [vmem:[#allocation147_spill] sm:$0xff]  ;;  %v7721_v7 = vld [vmem:[#allocation20_spill] sm:$0xff] }
 0x86b   :  { %3112 = vmatpush1.bf16.msra.mxu0 %v7711_v29  ;;  %3153 = vmatpush1.bf16.msra.mxu1 %v7712_v5  ;;  %v7722_v29 = vld [vmem:[#allocation21_spill] sm:$0xff]  ;;  %v7787_v5 = vld [vmem:[#allocation170_spill] sm:$0xff] }
 0x86c   :  { %3113 = vmatprep.subr.bf16.mxu0 %v7713_v57  ;;  %3154 = vmatprep.subr.bf16.mxu1 %v7714_v41  ;;  %v7723_v41 = vld [vmem:[#allocation22_spill] sm:$0xff]  ;;  %v7732_v57 = vld [vmem:[#allocation31_spill] sm:$0xff] }
 0x86f   :  { %3114 = vmatpush1.bf16.msra.mxu0 %v7715_v43  ;;  %3155 = vmatpush1.bf16.msra.mxu1 %v7716_v49  ;;  %v7724_v43 = vld [vmem:[#allocation23_spill] sm:$0xff]  ;;  %v7725_v49 = vld [vmem:[#allocation24_spill] sm:$0xff] }
 0x870   :  { %3115 = vmatprep.subr.bf16.mxu0 %v7717_v14  ;;  %3156 = vmatprep.subr.bf16.mxu1 %v7718_v63  ;;  %v7726_v14 = vld [vmem:[#allocation25_spill] sm:$0xff]  ;;  %v7727_v63 = vld [vmem:[#allocation26_spill] sm:$0xff] }
 0x873   :  { %3116 = vmatpush1.bf16.msra.mxu0 %v7719_v42  ;;  %3157 = vmatpush1.bf16.msra.mxu1 %v7720_v50  ;;  %v7728_v42 = vld [vmem:[#allocation27_spill] sm:$0xff]  ;;  %v7729_v50 = vld [vmem:[#allocation28_spill] sm:$0xff] }
 0x874   :  { %3221 = vmatprep.subr.bf16.mxu0 %v7721_v7  ;;  %3262 = vmatprep.subr.bf16.mxu1 %v7722_v29  ;;  %v7730_v7 = vld [vmem:[#allocation29_spill] sm:$0xff]  ;;  %v7731_v29 = vld [vmem:[#allocation30_spill] sm:$0xff] }
 0x876   :  { %3118 = vmatmul.mubr.bf16.vlgmr.msra.gmra.mrb[84].mxu0 %v6454_v9  ;;  %3159 = vmatmul.mubr.bf16.vlgmr.msra.gmra.mrb[84].mxu1 %v6454_v9  ;;  %v7733_v9 = vld [vmem:[#allocation32_spill] sm:$0xff] }
 0x877   :  { %3222 = vmatpush1.bf16.msra.mxu0 %v7723_v41  ;;  %3263 = vmatpush1.bf16.msra.mxu1 %v7724_v43  ;;  %v7734_v41 = vld [vmem:[#allocation33_spill] sm:$0xff]  ;;  %v7735_v43 = vld [vmem:[#allocation34_spill] sm:$0xff] }
 0x878   :  { %3223 = vmatprep.subr.bf16.mxu0 %v7725_v49  ;;  %3264 = vmatprep.subr.bf16.mxu1 %v7726_v14  ;;  %v7736_v49 = vld [vmem:[#allocation35_spill] sm:$0xff]  ;;  %v7737_v14 = vld [vmem:[#allocation36_spill] sm:$0xff] }
 0x87b   :  { %3224 = vmatpush1.bf16.msra.mxu0 %v7727_v63  ;;  %3265 = vmatpush1.bf16.msra.mxu1 %v7728_v42  ;;  %v7738_v63 = vld [vmem:[#allocation37_spill] sm:$0xff]  ;;  %v7739_v42 = vld [vmem:[#allocation38_spill] sm:$0xff] }
 0x87c   :  { %3225 = vmatprep.subr.bf16.mxu0 %v7729_v50  ;;  %3266 = vmatprep.subr.bf16.mxu1 %v7730_v7  ;;  %v7740_v50 = vld [vmem:[#allocation39_spill] sm:$0xff]  ;;  %v7741_v7 = vld [vmem:[#allocation40_spill] sm:$0xff] }
 0x87f   :  { %3226 = vmatpush1.bf16.msra.mxu0 %v7731_v29  ;;  %3267 = vmatpush1.bf16.msra.mxu1 %v7732_v57  ;;  %v7742_v29 = vld [vmem:[#allocation41_spill] sm:$0xff]  ;;  %v7743_v57 = vld [vmem:[#allocation42_spill] sm:$0xff] }
 0x880   :  { %3227 = vmatprep.subr.bf16.mxu0 %v7733_v9  ;;  %3268 = vmatprep.subr.bf16.mxu1 %v7734_v41  ;;  %v7744_v9 = vld [vmem:[#allocation43_spill] sm:$0xff]  ;;  %v7745_v41 = vld [vmem:[#allocation44_spill] sm:$0xff] }
 0x883   :  { %3228 = vmatpush1.bf16.msra.mxu0 %v7735_v43  ;;  %3269 = vmatpush1.bf16.msra.mxu1 %v7736_v49  ;;  %v7746_v43 = vld [vmem:[#allocation45_spill] sm:$0xff]  ;;  %v7747_v49 = vld [vmem:[#allocation46_spill] sm:$0xff] }
 0x884   :  { %3229 = vmatprep.subr.bf16.mxu0 %v7737_v14  ;;  %3270 = vmatprep.subr.bf16.mxu1 %v7738_v63  ;;  %v7748_v14 = vld [vmem:[#allocation47_spill] sm:$0xff]  ;;  %v7749_v63 = vld [vmem:[#allocation48_spill] sm:$0xff] }
 0x887   :  { %3230 = vmatpush1.bf16.msra.mxu0 %v7739_v42  ;;  %3271 = vmatpush1.bf16.msra.mxu1 %v7740_v50  ;;  %v7750_v42 = vld [vmem:[#allocation49_spill] sm:$0xff]  ;;  %v7751_v50 = vld [vmem:[#allocation50_spill] sm:$0xff] }
 0x888   :  { %3231 = vmatprep.subr.bf16.mxu0 %v7741_v7  ;;  %3272 = vmatprep.subr.bf16.mxu1 %v7742_v29  ;;  %v7752_v7 = vld [vmem:[#allocation51_spill] sm:$0xff]  ;;  %v7753_v29 = vld [vmem:[#allocation52_spill] sm:$0xff] }
 0x88b   :  { %3232 = vmatpush1.bf16.msra.mxu0 %v7743_v57  ;;  %3273 = vmatpush1.bf16.msra.mxu1 %v7744_v9  ;;  %v7754_v57 = vld [vmem:[#allocation53_spill] sm:$0xff]  ;;  %v7755_v9 = vld [vmem:[#allocation54_spill] sm:$0xff] }
 0x88c   :  { %3233 = vmatprep.subr.bf16.mxu0 %v7745_v41  ;;  %3274 = vmatprep.subr.bf16.mxu1 %v7746_v43  ;;  %v7756_v41 = vld [vmem:[#allocation55_spill] sm:$0xff]  ;;  %v7757_v43 = vld [vmem:[#allocation56_spill] sm:$0xff] }
 0x88f   :  { %3234 = vmatpush1.bf16.msra.mxu0 %v7747_v49  ;;  %3275 = vmatpush1.bf16.msra.mxu1 %v7748_v14  ;;  %v7758_v49 = vld [vmem:[#allocation57_spill] sm:$0xff]  ;;  %v7759_v14 = vld [vmem:[#allocation58_spill] sm:$0xff] }
 0x890   :  { %3235 = vmatprep.subr.bf16.mxu0 %v7749_v63  ;;  %3276 = vmatprep.subr.bf16.mxu1 %v7750_v42  ;;  %v7760_v63 = vld [vmem:[#allocation59_spill] sm:$0xff]  ;;  %v7761_v42 = vld [vmem:[#allocation60_spill] sm:$0xff] }
 0x893   :  { %3236 = vmatpush1.bf16.msra.mxu0 %v7751_v50  ;;  %3277 = vmatpush1.bf16.msra.mxu1 %v7752_v7  ;;  %v7762_v50 = vld [vmem:[#allocation61_spill] sm:$0xff]  ;;  %v7763_v7 = vld [vmem:[#allocation62_spill] sm:$0xff] }
 0x894   :  { %3237 = vmatprep.subr.bf16.mxu0 %v7753_v29  ;;  %3278 = vmatprep.subr.bf16.mxu1 %v7754_v57  ;;  %v7764_v29 = vld [vmem:[#allocation63_spill] sm:$0xff]  ;;  %v7765_v57 = vld [vmem:[#allocation64_spill] sm:$0xff] }
 0x897   :  { %3238 = vmatpush1.bf16.msra.mxu0 %v7755_v9  ;;  %3279 = vmatpush1.bf16.msra.mxu1 %v7756_v41  ;;  %v7766_v9 = vld [vmem:[#allocation65_spill] sm:$0xff]  ;;  %v7767_v41 = vld [vmem:[#allocation66_spill] sm:$0xff] }
 0x898   :  { %3239 = vmatprep.subr.bf16.mxu0 %v7757_v43  ;;  %3280 = vmatprep.subr.bf16.mxu1 %v7758_v49  ;;  %v7768_v43 = vld [vmem:[#allocation67_spill] sm:$0xff]  ;;  %v7769_v49 = vld [vmem:[#allocation68_spill] sm:$0xff] }
 0x89b   :  { %3240 = vmatpush1.bf16.msra.mxu0 %v7759_v14  ;;  %3281 = vmatpush1.bf16.msra.mxu1 %v7760_v63  ;;  %v7770_v14 = vld [vmem:[#allocation69_spill] sm:$0xff]  ;;  %v7771_v63 = vld [vmem:[#allocation70_spill] sm:$0xff] }
 0x89c   :  { %3241 = vmatprep.subr.bf16.mxu0 %v7761_v42  ;;  %3282 = vmatprep.subr.bf16.mxu1 %v7762_v50  ;;  %v7772_v42 = vld [vmem:[#allocation71_spill] sm:$0xff]  ;;  %v7773_v50 = vld [vmem:[#allocation72_spill] sm:$0xff] }
 0x89f   :  { %3242 = vmatpush1.bf16.msra.mxu0 %v7763_v7  ;;  %3283 = vmatpush1.bf16.msra.mxu1 %v7764_v29  ;;  %v7774_v7 = vld [vmem:[#allocation73_spill] sm:$0xff]  ;;  %v7775_v29 = vld [vmem:[#allocation74_spill] sm:$0xff] }
 0x8a0   :  { %3243 = vmatprep.subr.bf16.mxu0 %v7765_v57  ;;  %3284 = vmatprep.subr.bf16.mxu1 %v7766_v9  ;;  %v7776_v57 = vld [vmem:[#allocation75_spill] sm:$0xff]  ;;  %v7777_v9 = vld [vmem:[#allocation76_spill] sm:$0xff] }
 0x8a3   :  { %3244 = vmatpush1.bf16.msra.mxu0 %v7767_v41  ;;  %3285 = vmatpush1.bf16.msra.mxu1 %v7768_v43  ;;  %v7778_v41 = vld [vmem:[#allocation77_spill] sm:$0xff]  ;;  %v7779_v43 = vld [vmem:[#allocation78_spill] sm:$0xff] }
 0x8a4   :  { %3245 = vmatprep.subr.bf16.mxu0 %v7769_v49  ;;  %3286 = vmatprep.subr.bf16.mxu1 %v7770_v14  ;;  %v7780_v49 = vld [vmem:[#allocation79_spill] sm:$0xff]  ;;  %v7781_v14 = vld [vmem:[#allocation80_spill] sm:$0xff] }
 0x8a7   :  { %3246 = vmatpush1.bf16.msra.mxu0 %v7771_v63  ;;  %3287 = vmatpush1.bf16.msra.mxu1 %v7772_v42  ;;  %v7782_v63 = vld [vmem:[#allocation81_spill] sm:$0xff]  ;;  %v7783_v42 = vld [vmem:[#allocation82_spill] sm:$0xff] }
 0x8a8   :  { %3247 = vmatprep.subr.bf16.mxu0 %v7773_v50  ;;  %3288 = vmatprep.subr.bf16.mxu1 %v7774_v7  ;;  %v7784_v50 = vld [vmem:[#allocation83_spill] sm:$0xff]  ;;  %v7785_v7 = vld [vmem:[#allocation84_spill] sm:$0xff] }
 0x8ab   :  { %3248 = vmatpush1.bf16.msra.mxu0 %v7775_v29  ;;  %3289 = vmatpush1.bf16.msra.mxu1 %v7776_v57  ;;  %v7786_v29 = vld [vmem:[#allocation85_spill] sm:$0xff] }
 0x8ac   :  { %3249 = vmatprep.subr.bf16.mxu0 %v7777_v9  ;;  %3290 = vmatprep.subr.bf16.mxu1 %v7778_v41 }
 0x8af   :  { %3250 = vmatpush1.bf16.msra.mxu0 %v7779_v43  ;;  %3291 = vmatpush1.bf16.msra.mxu1 %v7780_v49 }
 0x8b0   :  { %3251 = vmatprep.subr.bf16.mxu0 %v7781_v14  ;;  %3292 = vmatprep.subr.bf16.mxu1 %v7782_v63 }
 0x8b3   :  { %3252 = vmatpush1.bf16.msra.mxu0 %v7783_v42  ;;  %3293 = vmatpush1.bf16.msra.mxu1 %v7784_v50 }
 0x8b4   :  { %3303 = vmatprep.subr.bf16.mxu0 %v7785_v7  ;;  %3344 = vmatprep.subr.bf16.mxu1 %v7786_v29 }
 0x909   :  { %v3037_v57 = vpop.f32.mrb[80].mxu0  ;;  %v3078_v9 = vpop.f32.mrb[80].mxu1 }
 0x90a   :  { %v3167_v41 = vadd.f32 %v3037_v57, %v7787_v5  ;;  %v3169_v43 = vadd.f32 %v3078_v9, %v7788_v30  ;;  %v3039_v0 = vpop.f32.mrb[81].mxu0  ;;  %v3080_v49 = vpop.f32.mrb[81].mxu1  ;;  %v7791_v57 = vld [vmem:[#allocation198_spill] sm:$0xff] }
 0x90b   :  { %v3168_v14 = vadd.f32 %v3039_v0, %v7789_v25  ;;  %v3170_v63 = vadd.f32 %v3080_v49, %v7790_v45  ;;  %v3041_v34 = vpop.f32.mrb[82].mxu0  ;;  %v3082_v42 = vpop.f32.mrb[82].mxu1 }
 0x90c   :  { %v3042_v11 = vpop.f32.mrb[83].mxu0  ;;  %v3083_v50 = vpop.f32.mrb[83].mxu1  ;;  %v3177_v44 = vmul.f32 0.5, %v3169_v43  ;;  %v3175_v46 = vmul.f32 0.5, %v3167_v41  ;;  %v7793_v34 = vld [vmem:[#allocation200_spill] sm:$0xff] }
 0x90d   :  { %v3178_v7 = vmul.f32 0.5, %v3170_v63  ;;  %v3176_v29 = vmul.f32 0.5, %v3168_v14  ;;  %v7794_v11 = vld [vmem:[#allocation201_spill] sm:$0xff] }
 0x90e   :  { %4586 = vtanh.f32 %v3177_v44 }
 0x90f   :  { %4588 = vtanh.f32 %v3178_v7 }
 0x910   :  { %4590 = vtanh.f32 %v3175_v46 }
 0x911   :  { %4592 = vtanh.f32 %v3176_v29 }
 0x918   :  { %v4587_v41 = vpop.eup %4586 }
 0x919   :  { %v4589_v46 = vpop.eup %4588  ;;  %v3189_v29 = vadd.f32 1.0, %v4587_v41 }
 0x91a   :  { %v4591_v50 = vpop.eup %4590 }
 0x91b   :  { %v4593_v7 = vpop.eup %4592  ;;  %v3195_v47 = vmul.f32 0.5, %v3189_v29 }
 0x91c   :  { %v3188_v10 = vadd.f32 1.0, %v4593_v7 }
 0x949   :  { %v3119_v5 = vpop.f32.mrb[84].mxu0  ;;  %v3160_v30 = vpop.f32.mrb[84].mxu1 }
 0x94a   :  { %v3171_v9 = vadd.f32 %v3119_v5, %v7791_v57  ;;  %v3173_v25 = vadd.f32 %v3160_v30, %v7792_v62  ;;  %v3121_v0 = vpop.f32.mrb[85].mxu0  ;;  %v3162_v45 = vpop.f32.mrb[85].mxu1  ;;  %v3190_v57 = vadd.f32 1.0, %v4589_v46  ;;  %v3187_v30 = vadd.f32 1.0, %v4591_v50 }
 0x94b   :  { %v3172_v49 = vadd.f32 %v3121_v0, %v7793_v34  ;;  %v3174_v42 = vadd.f32 %v3162_v45, %v7794_v11  ;;  %v3123_v43 = vpop.f32.mrb[86].mxu0  ;;  %v3164_v63 = vpop.f32.mrb[86].mxu1  ;;  %v3194_v11 = vmul.f32 0.5, %v3188_v10 }
 0x94c   :  { %4594 = vtanh.f32 %v3173_v25  ;;  %v3124_v44 = vpop.f32.mrb[87].mxu0  ;;  %v3165_v14 = vpop.f32.mrb[87].mxu1  ;;  %v3179_v5 = vmul.f32 0.5, %v3171_v9  ;;  %v3196_v0 = vmul.f32 0.5, %v3190_v57  ;;  %v3193_v45 = vmul.f32 0.5, %v3187_v30 }
 0x94d   :  { %4596 = vtanh.f32 %v3174_v42  ;;  %v3180_v62 = vmul.f32 0.5, %v3172_v49  ;;  %v3201_v43 = vmul.f32 %v3195_v47, %v6448_v1  ;;  %v4418_v30 = vld [vmem:[#allocation9 + $0x80] ss:$8 sps:$4 sm:$0xff]  }
 0x94e   :  { %4598 = vtanh.f32 %v3179_v5  ;;  %v3202_v42 = vmul.f32 %v3196_v0, %v6450_v13  ;;  %v4423_v0 = vld [vmem:[#allocation9 + $0x94] ss:$8 sps:$4 sm:$0xff]  }
 0x94f   :  { %4600 = vtanh.f32 %v3180_v62  ;;  %v4420_v62 = vld [vmem:[#allocation9 + $0x84] ss:$8 sps:$4 sm:$0xff]  }
 0x956   :  { %v4595_v34 = vpop.eup %4594 }
 0x957   :  { %v4597_v25 = vpop.eup %4596  ;;  %v3203_v63 = vmul.f32 %v4595_v34, %v3193_v45  ;;  %v4421_v45 = vld [vmem:[#allocation9 + $0x90] ss:$8 sps:$4 sm:$0xff]   ;;  %v4426_v34 = vld [vmem:[#allocation9 + $0xa4] ss:$8 sps:$4 sm:$0xff]  }
 0x958   :  { %v3204_v44 = vmul.f32 %v4597_v25, %v3194_v11  ;;  %v4599_v49 = vpop.eup %4598  ;;  %v4424_v11 = vld [vmem:[#allocation9 + $0xa0] ss:$8 sps:$4 sm:$0xff]   ;;  %v4429_v25 = vld [vmem:[#allocation9 + $0xb4] ss:$8 sps:$4 sm:$0xff]  }
 0x959   :  { %v6598_v41 = vadd.f32 %v3203_v63, %v3201_v43  ;;  %v4601_v14 = vpop.eup %4600  ;;  %v3191_v46 = vadd.f32 1.0, %v4599_v49  ;;  %v4427_v43 = vld [vmem:[#allocation9 + $0xb0] ss:$8 sps:$4 sm:$0xff]   ;;  %v4432_v63 = vld [vmem:[#allocation9 + $0xc4] ss:$8 sps:$4 sm:$0xff]  }
 0x95a   :  { %v6600_v9 = vadd.f32 %v3204_v44, %v3202_v42  ;;  %v3192_v50 = vadd.f32 1.0, %v4601_v14  ;;  %v4430_v42 = vld [vmem:[#allocation9 + $0xc0] ss:$8 sps:$4 sm:$0xff]   ;;  %v4435_v44 = vld [vmem:[#allocation9 + $0xd4] ss:$8 sps:$4 sm:$0xff]  }
 0x95b   :  { %4602 = vtanh.f32 %v6598_v41  ;;  %v3197_v10 = vmul.f32 0.5, %v3191_v46  ;;  %v4433_v49 = vld [vmem:[#allocation9 + $0xd0] ss:$8 sps:$4 sm:$0xff]   ;;  %v4438_v14 = vld [vmem:[#allocation9 + $0xe4] ss:$8 sps:$4 sm:$0xff]  }
 0x95c   :  { %4604 = vtanh.f32 %v6600_v9  ;;  %v3198_v29 = vmul.f32 0.5, %v3192_v50  ;;  %v4436_v46 = vld [vmem:[#allocation9 + $0xe0] ss:$8 sps:$4 sm:$0xff]   ;;  %v4441_v50 = vld [vmem:[#allocation9 + $0xf4] ss:$8 sps:$4 sm:$0xff]  }
 0x965   :  { %v4603_v7 = vpop.eup %4602 }
 0x966   :  { %v4605_v1 = vpop.eup %4604  ;;  %v3209_v47 = vmul.f32 %v4603_v7, %v3197_v10  ;;  %v4439_v10 = vld [vmem:[#allocation9 + $0xf0] ss:$8 sps:$4 sm:$0xff]  }
 0x967   :  { %v3210_v5 = vmul.f32 %v4605_v1, %v3198_v29  ;;  %v7818_v1 = vld [vmem:[#allocation174_spill] sm:$0xff] }
 0x968   :  { %v6604_v57 = vpack.c.bf16 %v3209_v47, %v3209_v47 }
 0x969   :  { %v3220_v13 = vpack.c.bf16 %v3210_v5, %v3210_v5  ;;  %v7819_v5 = vld [vmem:[#allocation175_spill] sm:$0xff] }
 0x96b   :  { %3253 = vmatprep.mubr.bf16.mxu0 %v3220_v13  ;;  %3294 = vmatprep.mubr.bf16.mxu1 %v3220_v13 }
 0x96c   :  { %3254 = vmatmul.mubr.bf16.vlgmr.msra.gmra.mrb[88].mxu0 %v6604_v57  ;;  %3295 = vmatmul.mubr.bf16.vlgmr.msra.gmra.mrb[88].mxu1 %v6604_v57 }
 0x96d   :  { %3304 = vmatpush1.bf16.msra.mxu0 %v7207_v53  ;;  %3345 = vmatpush1.bf16.msra.mxu1 %v7208_v23  ;;  %v7795_v53 = vld [vmem:[#allocation125_spill] sm:$0xff]  ;;  %v7796_v23 = vld [vmem:[#allocation126_spill] sm:$0xff] }
 0x96e   :  { %3335 = vmatprep.mubr.bf16.mxu0 %v3220_v13  ;;  %3376 = vmatprep.mubr.bf16.mxu1 %v3220_v13 }
 0x96f   :  { %3305 = vmatprep.subr.bf16.mxu0 %v7209_v24  ;;  %3346 = vmatprep.subr.bf16.mxu1 %v7210_v19  ;;  %v7797_v24 = vld [vmem:[#allocation127_spill] sm:$0xff]  ;;  %v7798_v19 = vld [vmem:[#allocation128_spill] sm:$0xff] }
 0x971   :  { %3306 = vmatpush1.bf16.msra.mxu0 %v7211_v33  ;;  %3347 = vmatpush1.bf16.msra.mxu1 %v7212_v15  ;;  %v7799_v33 = vld [vmem:[#allocation129_spill] sm:$0xff]  ;;  %v7800_v15 = vld [vmem:[#allocation130_spill] sm:$0xff] }
 0x972   :  { %3307 = vmatprep.subr.bf16.mxu0 %v7213_v22  ;;  %3348 = vmatprep.subr.bf16.mxu1 %v7214_v18  ;;  %v7801_v22 = vld [vmem:[#allocation131_spill] sm:$0xff]  ;;  %v7802_v18 = vld [vmem:[#allocation132_spill] sm:$0xff] }
 0x975   :  { %3308 = vmatpush1.bf16.msra.mxu0 %v7215_v60  ;;  %3349 = vmatpush1.bf16.msra.mxu1 %v7216_v40  ;;  %v7803_v60 = vld [vmem:[#allocation133_spill] sm:$0xff]  ;;  %v7804_v40 = vld [vmem:[#allocation134_spill] sm:$0xff] }
 0x976   :  { %3309 = vmatprep.subr.bf16.mxu0 %v7217_v52  ;;  %3350 = vmatprep.subr.bf16.mxu1 %v7218_v37  ;;  %v7805_v52 = vld [vmem:[#allocation135_spill] sm:$0xff]  ;;  %v7806_v37 = vld [vmem:[#allocation136_spill] sm:$0xff] }
 0x979   :  { %3310 = vmatpush1.bf16.msra.mxu0 %v7219_v48  ;;  %3351 = vmatpush1.bf16.msra.mxu1 %v7220_v59  ;;  %v7807_v48 = vld [vmem:[#allocation137_spill] sm:$0xff]  ;;  %v7808_v59 = vld [vmem:[#allocation138_spill] sm:$0xff] }
 0x97a   :  { %3311 = vmatprep.subr.bf16.mxu0 %v7221_v56  ;;  %3352 = vmatprep.subr.bf16.mxu1 %v7222_v8  ;;  %v7809_v56 = vld [vmem:[#allocation139_spill] sm:$0xff]  ;;  %v7810_v8 = vld [vmem:[#allocation140_spill] sm:$0xff] }
 0x97d   :  { %3312 = vmatpush1.bf16.msra.mxu0 %v7223_v3  ;;  %3353 = vmatpush1.bf16.msra.mxu1 %v7310_v20  ;;  %v7811_v3 = vld [vmem:[#allocation141_spill] sm:$0xff]  ;;  %v7814_v20 = vld [vmem:[#allocation144_spill] sm:$0xff] }
 0x97e   :  { %3313 = vmatprep.subr.bf16.mxu0 %v7311_v39  ;;  %3354 = vmatprep.subr.bf16.mxu1 %v7312_v38  ;;  %v7815_v39 = vld [vmem:[#allocation145_spill] sm:$0xff]  ;;  %v7816_v38 = vld [vmem:[#allocation146_spill] sm:$0xff] }
 0x981   :  { %3314 = vmatpush1.bf16.msra.mxu0 %v7313_v32  ;;  %3355 = vmatpush1.bf16.msra.mxu1 %v7314_v28  ;;  %v7817_v32 = vld [vmem:[#allocation147_spill] sm:$0xff] }
 0x982   :  { %3315 = vmatprep.subr.bf16.mxu0 %v7315_v27  ;;  %3356 = vmatprep.subr.bf16.mxu1 %v7316_v35  ;;  %v4394_v28 = vld [vmem:[#allocation9] ss:$8 sps:$4 sm:$0xff]   ;;  %v4396_v27 = vld [vmem:[#allocation9 + $0x4] ss:$8 sps:$4 sm:$0xff]   ;;  %v4399_v35 = vld [vmem:[#allocation9 + $0x14] ss:$8 sps:$4 sm:$0xff]  }
 0x985   :  { %3316 = vmatpush1.bf16.msra.mxu0 %v7317_v51  ;;  %3357 = vmatpush1.bf16.msra.mxu1 %v7318_v58  ;;  %v4397_v51 = vld [vmem:[#allocation9 + $0x10] ss:$8 sps:$4 sm:$0xff]   ;;  %v4402_v58 = vld [vmem:[#allocation9 + $0x24] ss:$8 sps:$4 sm:$0xff]  }
 0x986   :  { %3317 = vmatprep.subr.bf16.mxu0 %v7319_v31  ;;  %3358 = vmatprep.subr.bf16.mxu1 %v7320_v26  ;;  %v4400_v31 = vld [vmem:[#allocation9 + $0x20] ss:$8 sps:$4 sm:$0xff]   ;;  %v4405_v26 = vld [vmem:[#allocation9 + $0x34] ss:$8 sps:$4 sm:$0xff]  }
 0x989   :  { %3318 = vmatpush1.bf16.msra.mxu0 %v7321_v54  ;;  %3359 = vmatpush1.bf16.msra.mxu1 %v7322_v55  ;;  %v4403_v54 = vld [vmem:[#allocation9 + $0x30] ss:$8 sps:$4 sm:$0xff]   ;;  %v4408_v55 = vld [vmem:[#allocation9 + $0x44] ss:$8 sps:$4 sm:$0xff]  }
 0x98a   :  { %3319 = vmatprep.subr.bf16.mxu0 %v7323_v21  ;;  %3360 = vmatprep.subr.bf16.mxu1 %v7324_v12  ;;  %v4406_v21 = vld [vmem:[#allocation9 + $0x40] ss:$8 sps:$4 sm:$0xff]   ;;  %v4411_v12 = vld [vmem:[#allocation9 + $0x54] ss:$8 sps:$4 sm:$0xff]  }
 0x98d   :  { %3320 = vmatpush1.bf16.msra.mxu0 %v7325_v4  ;;  %3361 = vmatpush1.bf16.msra.mxu1 %v7326_v61  ;;  %v4409_v4 = vld [vmem:[#allocation9 + $0x50] ss:$8 sps:$4 sm:$0xff]   ;;  %v4414_v61 = vld [vmem:[#allocation9 + $0x64] ss:$8 sps:$4 sm:$0xff]  }
 0x98e   :  { %3321 = vmatprep.subr.bf16.mxu0 %v7327_v6  ;;  %3362 = vmatprep.subr.bf16.mxu1 %v7328_v17  ;;  %v4412_v6 = vld [vmem:[#allocation9 + $0x60] ss:$8 sps:$4 sm:$0xff]   ;;  %v4417_v17 = vld [vmem:[#allocation9 + $0x74] ss:$8 sps:$4 sm:$0xff]  }
 0x991   :  { %3322 = vmatpush1.bf16.msra.mxu0 %v7329_v2  ;;  %3363 = vmatpush1.bf16.msra.mxu1 %v7244_v36  ;;  %v7812_v36 = vld [vmem:[#allocation142_spill] sm:$0xff] }
 0x992   :  { %3323 = vmatprep.subr.bf16.mxu0 %v7245_v16  ;;  %3364 = vmatprep.subr.bf16.mxu1 %v7795_v53  ;;  %v7813_v16 = vld [vmem:[#allocation143_spill] sm:$0xff]  ;;  %v4415_v2 = vld [vmem:[#allocation9 + $0x70] ss:$8 sps:$4 sm:$0xff]  }
 0x995   :  { %3324 = vmatpush1.bf16.msra.mxu0 %v7796_v23  ;;  %3365 = vmatpush1.bf16.msra.mxu1 %v7797_v24  ;;  %v7820_v23 = vld [vmem:[#allocation176_spill] sm:$0xff] }
 0x996   :  { %3325 = vmatprep.subr.bf16.mxu0 %v7798_v19  ;;  %3366 = vmatprep.subr.bf16.mxu1 %v7799_v33  ;;  %v7821_v19 = vld [vmem:[#allocation177_spill] sm:$0xff] }
 0x999   :  { %3326 = vmatpush1.bf16.msra.mxu0 %v7800_v15  ;;  %3367 = vmatpush1.bf16.msra.mxu1 %v7801_v22 }
 0x99a   :  { %3327 = vmatprep.subr.bf16.mxu0 %v7802_v18  ;;  %3368 = vmatprep.subr.bf16.mxu1 %v7803_v60 }
 0x99d   :  { %3328 = vmatpush1.bf16.msra.mxu0 %v7804_v40  ;;  %3369 = vmatpush1.bf16.msra.mxu1 %v7805_v52 }
 0x99e   :  { %3329 = vmatprep.subr.bf16.mxu0 %v7806_v37  ;;  %3370 = vmatprep.subr.bf16.mxu1 %v7807_v48 }
 0x9a1   :  { %3330 = vmatpush1.bf16.msra.mxu0 %v7808_v59  ;;  %3371 = vmatpush1.bf16.msra.mxu1 %v7809_v56 }
 0x9a2   :  { %3331 = vmatprep.subr.bf16.mxu0 %v7810_v8  ;;  %3372 = vmatprep.subr.bf16.mxu1 %v7811_v3  ;;  %v7822_v8 = vld [vmem:[#allocation202_spill] sm:$0xff] }
 0x9a5   :  { %3332 = vmatpush1.bf16.msra.mxu0 %v7812_v36  ;;  %3373 = vmatpush1.bf16.msra.mxu1 %v7813_v16  ;;  %v7823_v36 = vld [vmem:[#allocation203_spill] sm:$0xff] }
 0x9a6   :  { %3333 = vmatprep.subr.bf16.mxu0 %v7814_v20  ;;  %3374 = vmatprep.subr.bf16.mxu1 %v7815_v39 }
 0x9a9   :  { %3334 = vmatpush1.bf16.msra.mxu0 %v7816_v38  ;;  %3375 = vmatpush1.bf16.msra.mxu1 %v7817_v32  ;;  %v7824_v38 = vld [vmem:[#allocation204_spill] sm:$0xff] }
 0x9aa   :  { %3623 = vmatprep.subr.bf16.mxu0 %v4396_v27 }
 0x9ac   :  { %3336 = vmatmul.mubr.bf16.vlgmr.msra.gmra.mrb[92].mxu0 %v6604_v57  ;;  %3377 = vmatmul.mubr.bf16.vlgmr.msra.gmra.mrb[92].mxu1 %v6604_v57 }
 0x9ad   :  { %3624 = vmatpush1.bf16.msra.mxu0 %v4394_v28  ;;  %v7825_v28 = vld [vmem:[#allocation205_spill] sm:$0xff] }
 0x9ae   :  { %3625 = vmatprep.subr.bf16.mxu0 %v4399_v35 }
 0x9b1   :  { %3626 = vmatpush1.bf16.msra.mxu0 %v4397_v51 }
 0x9b2   :  { %3627 = vmatprep.subr.bf16.mxu0 %v4402_v58 }
 0x9b5   :  { %3628 = vmatpush1.bf16.msra.mxu0 %v4400_v31 }
 0x9b6   :  { %3629 = vmatprep.subr.bf16.mxu0 %v4405_v26 }
 0x9b9   :  { %3630 = vmatpush1.bf16.msra.mxu0 %v4403_v54 }
 0x9ba   :  { %3631 = vmatprep.subr.bf16.mxu0 %v4408_v55 }
 0x9bd   :  { %3632 = vmatpush1.bf16.msra.mxu0 %v4406_v21 }
 0x9be   :  { %3633 = vmatprep.subr.bf16.mxu0 %v4411_v12 }
 0x9c1   :  { %3634 = vmatpush1.bf16.msra.mxu0 %v4409_v4 }
 0x9c2   :  { %3635 = vmatprep.subr.bf16.mxu0 %v4414_v61 }
 0x9c5   :  { %3636 = vmatpush1.bf16.msra.mxu0 %v4412_v6 }
 0x9c6   :  { %3637 = vmatprep.subr.bf16.mxu0 %v4417_v17 }
 0x9c9   :  { %3638 = vmatpush1.bf16.msra.mxu0 %v4415_v2 }
 0x9ca   :  { %3639 = vmatprep.subr.bf16.mxu0 %v4420_v62 }
 0x9cd   :  { %3640 = vmatpush1.bf16.msra.mxu0 %v4418_v30 }
 0x9ce   :  { %3641 = vmatprep.subr.bf16.mxu0 %v4423_v0 }
 0x9d1   :  { %3642 = vmatpush1.bf16.msra.mxu0 %v4421_v45 }
 0x9d2   :  { %3643 = vmatprep.subr.bf16.mxu0 %v4426_v34 }
 0x9d5   :  { %3644 = vmatpush1.bf16.msra.mxu0 %v4424_v11 }
 0x9d6   :  { %3645 = vmatprep.subr.bf16.mxu0 %v4429_v25 }
 0x9d9   :  { %3646 = vmatpush1.bf16.msra.mxu0 %v4427_v43 }
 0x9da   :  { %3647 = vmatprep.subr.bf16.mxu0 %v4432_v63 }
 0x9dd   :  { %3648 = vmatpush1.bf16.msra.mxu0 %v4430_v42 }
 0x9de   :  { %3649 = vmatprep.subr.bf16.mxu0 %v4435_v44 }
 0x9e1   :  { %3650 = vmatpush1.bf16.msra.mxu0 %v4433_v49 }
 0x9e2   :  { %3651 = vmatprep.subr.bf16.mxu0 %v4438_v14 }
 0x9e5   :  { %3652 = vmatpush1.bf16.msra.mxu0 %v4436_v46 }
 0x9e6   :  { %3653 = vmatprep.subr.bf16.mxu0 %v4441_v50 }
 0x9e9   :  { %3654 = vmatpush1.bf16.msra.mxu0 %v4439_v10 }
 0xa3f   :  { %v3255_v7 = vpop.f32.mrb[88].mxu0  ;;  %v3296_v29 = vpop.f32.mrb[88].mxu1 }
 0xa40   :  { %v3385_v47 = vadd.f32 %v3255_v7, %v7818_v1  ;;  %v3387_v13 = vadd.f32 %v3296_v29, %v7819_v5  ;;  %v3257_v57 = vpop.f32.mrb[89].mxu0  ;;  %v3298_v53 = vpop.f32.mrb[89].mxu1 }
 0xa41   :  { %v3386_v24 = vadd.f32 %v3257_v57, %v7820_v23  ;;  %v3388_v33 = vadd.f32 %v3298_v53, %v7821_v19  ;;  %v3259_v15 = vpop.f32.mrb[90].mxu0  ;;  %v3300_v22 = vpop.f32.mrb[90].mxu1  ;;  %v4443_v53 = vld [vmem:[#allocation11] sm:$0xff]   ;;  %v4444_v23 = vld [vmem:[#allocation11 + $0x48] sm:$0xff]   ;;  %v4446_v19 = vld [vmem:[#allocation11 + $0x50] sm:$0xff]  }
 0xa42   :  { %v3260_v18 = vpop.f32.mrb[91].mxu0  ;;  %v3301_v60 = vpop.f32.mrb[91].mxu1  ;;  %v3395_v40 = vmul.f32 0.5, %v3387_v13  ;;  %v3393_v37 = vmul.f32 0.5, %v3385_v47  ;;  %v4448_v15 = vld [vmem:[#allocation11 + $0x58] sm:$0xff]  }
 0xa43   :  { %v3396_v52 = vmul.f32 0.5, %v3388_v33  ;;  %v3394_v48 = vmul.f32 0.5, %v3386_v24  ;;  %v4445_v24 = vld [vmem:[#allocation11 + $0x8] sm:$0xff]   ;;  %v4447_v33 = vld [vmem:[#allocation11 + $0x10] sm:$0xff]   ;;  %v4449_v22 = vld [vmem:[#allocation11 + $0x18] sm:$0xff]  }
 0xa44   :  { %4606 = vtanh.f32 %v3395_v40  ;;  %v4450_v18 = vld [vmem:[#allocation11 + $0x60] sm:$0xff]   ;;  %v4452_v40 = vld [vmem:[#allocation11 + $0x68] sm:$0xff]  }
 0xa45   :  { %4608 = vtanh.f32 %v3396_v52  ;;  %v4451_v60 = vld [vmem:[#allocation11 + $0x20] sm:$0xff]   ;;  %v4453_v52 = vld [vmem:[#allocation11 + $0x28] sm:$0xff]  }
 0xa46   :  { %4610 = vtanh.f32 %v3393_v37  ;;  %v4454_v37 = vld [vmem:[#allocation11 + $0x70] sm:$0xff]  }
 0xa47   :  { %4612 = vtanh.f32 %v3394_v48  ;;  %v4455_v48 = vld [vmem:[#allocation11 + $0x30] sm:$0xff]  }
 0xa4e   :  { %v4607_v58 = vpop.eup %4606 }
 0xa4f   :  { %v4609_v54 = vpop.eup %4608  ;;  %v3407_v12 = vadd.f32 1.0, %v4607_v58 }
 0xa50   :  { %v4611_v55 = vpop.eup %4610  ;;  %v3408_v61 = vadd.f32 1.0, %v4609_v54 }
 0xa51   :  { %v4613_v21 = vpop.eup %4612  ;;  %v3405_v17 = vadd.f32 1.0, %v4611_v55  ;;  %v3413_v62 = vmul.f32 0.5, %v3407_v12 }
 0xa52   :  { %v3406_v2 = vadd.f32 1.0, %v4613_v21  ;;  %v3414_v30 = vmul.f32 0.5, %v3408_v61 }
 0xa53   :  { %v3411_v0 = vmul.f32 0.5, %v3405_v17  ;;  %v3419_v25 = vmul.f32 %v3413_v62, %v6598_v41 }
 0xa54   :  { %v3412_v34 = vmul.f32 0.5, %v3406_v2  ;;  %v3420_v63 = vmul.f32 %v3414_v30, %v6600_v9  ;;  %v4442_v9 = vld [vmem:[#allocation11 + $0x40] sm:$0xff]  }
 0xa55   :  { %4327 = vmatprep.subr.bf16.mxu1 %v4442_v9 }
 0xa56   :  { %4328 = vmatpush3.bf16.msra.mxu1 %v4443_v53 }
 0xa57   :  { %4329 = vmatprep.subr.bf16.mxu1 %v4444_v23 }
 0xa5a   :  { %4330 = vmatpush3.bf16.msra.mxu1 %v4445_v24 }
 0xa5b   :  { %4331 = vmatprep.subr.bf16.mxu1 %v4446_v19 }
 0xa5e   :  { %4332 = vmatpush3.bf16.msra.mxu1 %v4447_v33 }
 0xa5f   :  { %4333 = vmatprep.subr.bf16.mxu1 %v4448_v15 }
 0xa62   :  { %4334 = vmatpush3.bf16.msra.mxu1 %v4449_v22 }
 0xa63   :  { %4335 = vmatprep.subr.bf16.mxu1 %v4450_v18 }
 0xa66   :  { %4336 = vmatpush3.bf16.msra.mxu1 %v4451_v60 }
 0xa67   :  { %4337 = vmatprep.subr.bf16.mxu1 %v4452_v40 }
 0xa6a   :  { %4338 = vmatpush3.bf16.msra.mxu1 %v4453_v52 }
 0xa6b   :  { %4339 = vmatprep.subr.bf16.mxu1 %v4454_v37  ;;  %v4458_v37 = vld [vmem:[#allocation12] sm:$0xff]  }
 0xa6e   :  { %4340 = vmatpush3.bf16.msra.mxu1 %v4455_v48  ;;  %v4809_v48 = vmov 0.0  }
 0xa7f   :  { %v3337_v59 = vpop.f32.mrb[92].mxu0  ;;  %v3378_v56 = vpop.f32.mrb[92].mxu1 }
 0xa80   :  { %v3389_v3 = vadd.f32 %v3337_v59, %v7822_v8  ;;  %v3391_v16 = vadd.f32 %v3378_v56, %v7823_v36  ;;  %v3339_v20 = vpop.f32.mrb[93].mxu0  ;;  %v3380_v39 = vpop.f32.mrb[93].mxu1  ;;  %v4456_v59 = vld [vmem:[#allocation11 + $0x78] sm:$0xff]  }
 0xa81   :  { %v3390_v32 = vadd.f32 %v3339_v20, %v7824_v38  ;;  %v3392_v27 = vadd.f32 %v3380_v39, %v7825_v28  ;;  %v3341_v35 = vpop.f32.mrb[94].mxu0  ;;  %v3382_v51 = vpop.f32.mrb[94].mxu1  ;;  %v4457_v56 = vld [vmem:[#allocation11 + $0x38] sm:$0xff]   ;;  %4341 = vmatprep.subr.bf16.mxu1 %v4456_v59  ;;  %v4459_v59 = vld [vmem:[#allocation12 + $0x8] sm:$0xff]  }
 0xa82   :  { %4614 = vtanh.f32 %v3391_v16  ;;  %v3342_v31 = vpop.f32.mrb[95].mxu0  ;;  %v3383_v26 = vpop.f32.mrb[95].mxu1  ;;  %v3397_v4 = vmul.f32 0.5, %v3389_v3  ;;  %4342 = vmatpush3.bf16.msra.mxu1 %v4457_v56  ;;  %v4460_v56 = vld [vmem:[#allocation12 + $0x10] sm:$0xff]  }
 0xa83   :  { %4616 = vtanh.f32 %v3392_v27  ;;  %v3398_v6 = vmul.f32 0.5, %v3390_v32  ;;  %4358 = vmatprep.subr.bf16.mxu1 %v4809_v48 }
 0xa84   :  { %4618 = vtanh.f32 %v3397_v4 }
 0xa85   :  { %4620 = vtanh.f32 %v3398_v6 }
 0xa8c   :  { %v4615_v45 = vpop.eup %4614 }
 0xa8d   :  { %v4617_v11 = vpop.eup %4616  ;;  %v3421_v43 = vmul.f32 %v4615_v45, %v3411_v0 }
 0xa8e   :  { %v3422_v42 = vmul.f32 %v4617_v11, %v3412_v34  ;;  %v4619_v14 = vpop.eup %4618 }
 0xa8f   :  { %v3423_v44 = vadd.f32 %v3421_v43, %v3419_v25  ;;  %v4621_v46 = vpop.eup %4620  ;;  %v3409_v50 = vadd.f32 1.0, %v4619_v14 }
 0xa90   :  { %v3424_v49 = vadd.f32 %v3422_v42, %v3420_v63  ;;  %v3410_v10 = vadd.f32 1.0, %v4621_v46 }
 0xa91   :  { %4622 = vtanh.f32 %v3423_v44  ;;  %v3415_v7 = vmul.f32 0.5, %v3409_v50  ;;  %v3664_v50 = vld [vmem:[%s6718_s5] sm:$0x3] }
 0xa92   :  { %4624 = vtanh.f32 %v3424_v49  ;;  %v3416_v1 = vmul.f32 0.5, %v3410_v10  ;;  %v3665_v10 = vld [vmem:[%s6719_s6] sm:$0x3] }
 0xa9b   :  { %v4623_v29 = vpop.eup %4622 }
 0xa9c   :  { %v4625_v47 = vpop.eup %4624  ;;  %v3427_v5 = vmul.f32 %v4623_v29, %v3415_v7  ;;  %v7826_v7 = vld [vmem:[#allocation148_spill] sm:$0xff] }
 0xa9d   :  { %v3428_v13 = vmul.f32 %v4625_v47, %v3416_v1  ;;  %v3709_v29 = vrot.slane %v3664_v50, %v7826_v7  ;;  %v7827_v47 = vld [vmem:[#allocation149_spill] sm:$0xff] }
 0xa9e   :  { %v3429_v41 = vpack.c.bf16 %v3427_v5, %v3427_v5  ;;  %v3713_v5 = vrot.slane %v3664_v50, %v7827_v47  ;;  %v3726_v53 = vrot.slane %v3665_v10, %v7827_v47 }
 0xa9f   :  { %v3430_v57 = vpack.c.bf16 %v3428_v13, %v3428_v13 }
 0xaa1   :  { %3655 = vmatprep.mubr.bf16.mxu0 %v3430_v57 }
 0xaa2   :  { %3656 = vmatmul.mubr.bf16.vlgmr.msra.gmra.mrb[96].mxu0 %v3429_v41  ;;  %v3722_v41 = vrot.slane %v3665_v10, %v7826_v7 }
 0xb75   :  { %v3657_v8 = vpop.f32.mrb[96].mxu0 }
 0xb76   :  { %v3666_v3 = vrot.slane %v3657_v8, 4  ;;  %v3659_v36 = vpop.f32.mrb[97].mxu0 }
 0xb77   :  { %v3672_v16 = vrot.slane %v3659_v36, 4  ;;  %v3661_v20 = vpop.f32.mrb[98].mxu0 }
 0xb78   :  { %v3667_v39 = vadd.f32 %v3666_v3, %v3657_v8  ;;  %v3662_v38 = vpop.f32.mrb[99].mxu0  ;;  %v4462_v3 = vld [vmem:[#allocation12 + $0x20] sm:$0xff]   ;;  %v4465_v20 = vld [vmem:[#allocation12 + $0x38] sm:$0xff]  }
 0xb79   :  { %v3673_v32 = vadd.f32 %v3672_v16, %v3659_v36  ;;  %v4464_v16 = vld [vmem:[#allocation12 + $0x30] sm:$0xff]  }
 0xb7a   :  { %v3668_v28 = vrot.slane %v3667_v39, 2 }
 0xb7b   :  { %v3674_v27 = vrot.slane %v3673_v32, 2 }
 0xb7c   :  { %v3669_v35 = vadd.f32 %v3668_v28, %v3667_v39 }
 0xb7d   :  { %v3675_v51 = vadd.f32 %v3674_v27, %v3673_v32 }
 0xb7e   :  { %v3670_v58 = vrot.slane %v3669_v35, 1 }
 0xb7f   :  { %v3676_v31 = vrot.slane %v3675_v51, 1 }
 0xb80   :  { %v3671_v26 = vadd.f32 %v3670_v58, %v3669_v35 }
 0xb81   :  { %v3677_v54 = vadd.f32 %v3676_v31, %v3675_v51 }
 0xb82   :  { %v3679_v55 = vmul.f32 0.125, %v3671_v26 }
 0xb83   :  { %v3680_v21 = vmul.f32 0.125, %v3677_v54 }
 0xb84   :  { %v3681_v12 = vsub.f32 %v3657_v8, %v3679_v55  ;;  %v4461_v8 = vld [vmem:[#allocation12 + $0x18] sm:$0xff]  }
 0xb85   :  { %v3682_v4 = vsub.f32 %v3659_v36, %v3680_v21  ;;  %v4463_v36 = vld [vmem:[#allocation12 + $0x28] sm:$0xff]  }
 0xb86   :  { %v3683_v61 = vmul.f32 %v3681_v12, %v3681_v12 }
 0xb87   :  { %v3684_v6 = vmul.f32 %v3682_v4, %v3682_v4 }
 0xb88   :  { %v3685_v17 = vrot.slane %v3683_v61, 4 }
 0xb89   :  { %v3691_v2 = vrot.slane %v3684_v6, 4 }
 0xb8a   :  { %v3686_v62 = vadd.f32 %v3685_v17, %v3683_v61 }
 0xb8b   :  { %v3692_v30 = vadd.f32 %v3691_v2, %v3684_v6 }
 0xb8c   :  { %v3687_v0 = vrot.slane %v3686_v62, 2 }
 0xb8d   :  { %v3693_v45 = vrot.slane %v3692_v30, 2 }
 0xb8e   :  { %v3688_v34 = vadd.f32 %v3687_v0, %v3686_v62 }
 0xb8f   :  { %v3694_v11 = vadd.f32 %v3693_v45, %v3692_v30 }
 0xb90   :  { %v3689_v25 = vrot.slane %v3688_v34, 1 }
 0xb91   :  { %v3695_v43 = vrot.slane %v3694_v11, 1 }
 0xb92   :  { %v3690_v63 = vadd.f32 %v3689_v25, %v3688_v34  ;;  %v4316_v34 = vld [vmem:[%s6721_s8] ss:$0 sm:$0xff]  ;;  %s4764_s8 = scalar_lea.vmem %s4065_s14, 128 }
 0xb93   :  { %v3696_v42 = vadd.f32 %v3695_v43, %v3694_v11  ;;  %v4317_v25 = vld [vmem:[%s6722_s9] ss:$0 sm:$0xff]  ;;  %p4765_p6 = scmp.ne.s32.totalorder %s4065_s14, %s4764_s8  ;;  %p4770_p8 = scmp.lt.s32.totalorder %s4764_s8, %s4764_s8 }
 0xb94   :  { %v3697_v44 = vmul.f32 0.125, %v3690_v63 }
 0xb95   :  { %v3698_v49 = vmul.f32 0.125, %v3696_v42  ;;  %p4771_p9 = por %p4770_p8, %p4769_p7 }
 0xb96   :  { %v3699_v14 = vadd.f32 1e-05, %v3697_v44 }
 0xb97   :  { %v3700_v46 = vadd.f32 1e-05, %v3698_v49  ;;  %p4772_p10 = pnand %p4771_p9, %p4765_p6 }
 0xb98   :  { %4626 = vrsqrt.f32 %v3699_v14  ;;  %v4318_v14 = vld [vmem:[%s6724_s11] ss:$0 sm:$0xff] }
 0xb99   :  { %4628 = vrsqrt.f32 %v3700_v46 }
 0xba2   :  { %v4627_v1 = vpop.eup %4626 }
 0xba3   :  { %v4629_v13 = vpop.eup %4628  ;;  %v3703_v57 = vmul.f32 %v4627_v1, %v3681_v12 }
 0xba4   :  { %v3704_v9 = vmul.f32 %v4629_v13, %v3682_v4 }
 0xba5   :  { %v3716_v23 = vmul.f32 %v3709_v29, %v3703_v57 }
 0xba6   :  { %v3717_v24 = vmul.f32 %v3713_v5, %v3704_v9 }
 0xba7   :  { %v3729_v19 = vadd.f32 %v3722_v41, %v3716_v23 }
 0xba8   :  { %v3730_v33 = vadd.f32 %v3726_v53, %v3717_v24 }
 0xba9   :  { %vm3731_vm0 = vcmp.gt.f32.partialorder %v3729_v19, 0.0  ;;  %v3733_v15 = vmul.f32 0.01, %v3729_v19 }
 0xbaa   :  { %vm3732_vm1 = vcmp.gt.f32.partialorder %v3730_v33, 0.0  ;;  %v3734_v22 = vmul.f32 0.01, %v3730_v33 }
 0xbab   :  { %v3735_v18 = vsel %vm3731_vm0, %v3729_v19, %v3733_v15 }
 0xbac   :  { %v3736_v60 = vsel %vm3732_vm1, %v3730_v33, %v3734_v22  ;;  %v3737_v52 = vpack.c.bf16 %v3735_v18, %v3735_v18 }
 0xbad   :  { %v3738_v40 = vpack.c.bf16 %v3736_v60, %v3736_v60 }
 0xbaf   :  { %3899 = vmatprep.mubr.bf16.mxu1 %v3738_v40 }
 0xbb0   :  { %3900 = vmatmul.mubr.bf16.vlgmr.msra.gmra.mrb[96].mxu1 %v3737_v52 }
 0xbb1   :  { %4359 = vmatpush3.bf16.msra.mxu1 %v4458_v37  ;;  %4374 = vmatprep.mubr.msk.bf16.mxu1 %vm4810_vm2, %v4809_v48 }
 0xbb2   :  { %4360 = vmatprep.subr.bf16.mxu1 %v4809_v48 }
 0xbb5   :  { %4361 = vmatpush3.bf16.msra.mxu1 %v4459_v59 }
 0xbb6   :  { %4362 = vmatprep.subr.bf16.mxu1 %v4809_v48 }
 0xbb9   :  { %4363 = vmatpush3.bf16.msra.mxu1 %v4460_v56 }
 0xbba   :  { %4364 = vmatprep.subr.bf16.mxu1 %v4809_v48 }
 0xbbd   :  { %4365 = vmatpush3.bf16.msra.mxu1 %v4461_v8 }
 0xbbe   :  { %4366 = vmatprep.subr.bf16.mxu1 %v4809_v48 }
 0xbc1   :  { %4367 = vmatpush3.bf16.msra.mxu1 %v4462_v3 }
 0xbc2   :  { %4368 = vmatprep.subr.bf16.mxu1 %v4809_v48 }
 0xbc5   :  { %4369 = vmatpush3.bf16.msra.mxu1 %v4463_v36 }
 0xbc6   :  { %4370 = vmatprep.subr.bf16.mxu1 %v4809_v48 }
 0xbc9   :  { %4371 = vmatpush3.bf16.msra.mxu1 %v4464_v16 }
 0xbca   :  { %4372 = vmatprep.subr.bf16.mxu1 %v4809_v48 }
 0xbcd   :  { %4373 = vmatpush3.bf16.msra.mxu1 %v4465_v20 }
 0xc83   :  { %v4343_v39 = vpop.f32.mrb[96].mxu1 }
 0xc84   :  { %v4344_v38 = vpop.f32.mrb[97].mxu1 }
 0xc85   :  { %v4345_v32 = vadd.f32 %v4344_v38, %v4343_v39  ;;  %v4346_v28 = vpop.f32.mrb[98].mxu1 }
 0xc86   :  { %v4347_v27 = vpop.f32.mrb[99].mxu1 }
 0xc87   :  { %v3909_v35 = vrot.slane %v4345_v32, 4 }
 0xc89   :  { %v3910_v51 = vadd.f32 %v4345_v32, %v3909_v35 }
 0xc8b   :  { %v3911_v58 = vrot.slane %v3910_v51, 2 }
 0xc8d   :  { %v3912_v31 = vadd.f32 %v3911_v58, %v3910_v51 }
 0xc8f   :  { %v3913_v26 = vrot.slane %v3912_v31, 1 }
 0xc91   :  { %v3914_v54 = vadd.f32 %v3913_v26, %v3912_v31 }
 0xc93   :  { %v3915_v55 = vmul.f32 0.125, %v3914_v54 }
 0xc95   :  { %v3916_v21 = vsub.f32 %v4345_v32, %v3915_v55 }
 0xc97   :  { %v3917_v12 = vmul.f32 %v3916_v21, %v3916_v21 }
 0xc99   :  { %v3918_v4 = vrot.slane %v3917_v12, 4 }
 0xc9b   :  { %v3919_v61 = vadd.f32 %v3918_v4, %v3917_v12 }
 0xc9d   :  { %v3920_v6 = vrot.slane %v3919_v61, 2 }
 0xc9f   :  { %v3921_v17 = vadd.f32 %v3920_v6, %v3919_v61 }
 0xca1   :  { %v3922_v2 = vrot.slane %v3921_v17, 1 }
 0xca3   :  { %v3923_v62 = vadd.f32 %v3922_v2, %v3921_v17 }
 0xca5   :  { %v3924_v30 = vmul.f32 0.125, %v3923_v62 }
 0xca7   :  { %v3925_v0 = vadd.f32 1e-05, %v3924_v30 }
 0xca9   :  { %4630 = vrsqrt.f32 %v3925_v0 }
 0xcb3   :  { %v4631_v45 = vpop.eup %4630 }
 0xcb4   :  { %v3927_v11 = vmul.f32 %v4631_v45, %v3916_v21 }
 0xcb6   :  { %v3934_v43 = vmul.f32 %v4316_v34, %v3927_v11 }
 0xcb8   :  { %v3941_v63 = vadd.f32 %v4317_v25, %v3934_v43 }
 0xcba   :  { %vm3942_vm3 = vcmp.gt.f32.partialorder %v3941_v63, 0.0  ;;  %v3943_v42 = vmul.f32 0.01, %v3941_v63 }
 0xcbc   :  { %v3944_v44 = vsel %vm3942_vm3, %v3941_v63, %v3943_v42 }
 0xcbd   :  { %v3945_v49 = vpack.c.bf16 %v3944_v44, %v3944_v44 }
 0xcbf   :  { %4375 = vmatmul.mubr.bf16.vlgmr.msra.gmra.mrb[100].mxu1 %v3945_v49 }
 0xd92   :  { %v4051_v46 = vpop.f32.mrb[100].mxu1 }
 0xd93   :  { %v4052_v50 = vadd.f32 %v4318_v14, %v4051_v46  ;;  %v4376_v10 = vpop.f32.mrb[101].mxu1 }
 0xd94   :  { %v4054_v7 = vpop.f32.mrb[102].mxu1 }
 0xd95   :  { %4057 = vst [vmem:[#allocation14] sm:$0xff] %v4052_v50  ;;  %v4377_v29 = vpop.f32.mrb[103].mxu1 }
 0xd96   :  { %4775 = shalt.err (!%p4772_p10)
}
 0xd97   :  { %s4776_s11 = scalar_lea.hbm %s6725_s12, 128 }
 0xd98   :  { %p4777_p11 = scmp.ne.s32.totalorder %s6725_s12, %s4776_s11  ;;  %p4780_p12 = scmp.lt.u32.totalorder %s4776_s11, %s6725_s12 }
 0xd9a   :  { %p4782_p13 = pnand %p4780_p12, %p4777_p11 }
 0xd9c   :  { %4785 = shalt.err (!%p4782_p13)
}
 0xd9d   :  { %4067 = dma.vmem_to_hbm [thread:$0]  %s4065_s14, 128, %s6725_s12, [#allocation5]  }
 0xd9e   :  { %4794 = dma.done.wait [#allocation5], 128  }
 0xd9f   :  { %4795 = vsyncadd [#allocation5], 4294967168 }
 0xda0   :  { %4071 = vsyncpa [#allocation4], 1 }
 0xda1   :  { %4072 = vsyncpa [#allocation7], 1 }
 0xda2   :  { %4073 = vsyncpa [#allocation10], 1 }
 0xda3   :  { %4074 = vsyncpa [#allocation13], 1 }
 0xda4   :  { %4075 = vsyncpa [#allocation5], 1 }

</bundles_post_ra>
